<compile_context>
chip_gen: v6e
topology: v6e:2x2x1
jax: 0.10.0
libtpu: 0.0.40
codegen_flags: <defaults>
</compile_context>

<pallas_src>
import math
from functools import partial

import jax
import jax.numpy as jnp
from jax.experimental import pallas as pl
from jax.experimental.pallas import tpu as pltpu


# --------------------------- tiling helpers ---------------------------------

_MAX_ROW_TILE = 512   # measured sweet spot for mem-bound f32 tiles (fits v7x VMEM easily)


def _row_tiles(M, max_tile=_MAX_ROW_TILE):
    """Pick a row tile (multiple of 8) and the zero-padded row count."""
    if M >= max_tile:
        tm = max_tile
    else:
        tm = -(-M // 8) * 8
    Mp = -(-M // tm) * tm
    return tm, Mp


def _pad_rows(x, Mp):
    M = x.shape[0]
    if Mp == M:
        return x
    return jnp.pad(x, ((0, Mp - M), (0, 0)))


# ----------------------------- Pallas kernels ------------------------------

def _linear_kernel(x_ref, w_ref, b_ref, o_ref, *, apply_relu):
    acc = jnp.dot(x_ref[...], w_ref[...], preferred_element_type=jnp.float32)
    acc = acc + b_ref[...]
    if apply_relu:
        acc = jnp.maximum(acc, 0.0)
    o_ref[...] = acc.astype(o_ref.dtype)


def linear_pallas(x, w, b=None, apply_relu=False):
    """y = x @ w (+ b) (+ relu).  x: (M, K), w: (K, N).  bf16 MXU, f32 accumulate."""
    M, K = x.shape
    K2, N = w.shape
    assert K == K2
    if b is None:
        b = jnp.zeros((N,), jnp.float32)
    b = jnp.asarray(b, jnp.float32).reshape(1, N)
    tm, Mp = _row_tiles(M)
    xp = _pad_rows(x, Mp).astype(jnp.bfloat16)
    wb = w.astype(jnp.bfloat16)
    out = pl.pallas_call(
        partial(_linear_kernel, apply_relu=apply_relu),
        out_shape=jax.ShapeDtypeStruct((Mp, N), jnp.float32),
        grid=(Mp // tm,),
        in_specs=[
            pl.BlockSpec((tm, K), lambda i: (i, 0)),
            pl.BlockSpec((K, N), lambda i: (0, 0)),
            pl.BlockSpec((1, N), lambda i: (0, 0)),
        ],
        out_specs=pl.BlockSpec((tm, N), lambda i: (i, 0)),
        compiler_params=pltpu.CompilerParams(dimension_semantics=("parallel",)),
    )(xp, wb, b)
    return out if Mp == M else out[:M]


def _fused_qproj_kernel(x_ref, w_ref, b_ref, o_ref, *, n_heads, n_points):
    """One matmul producing [attn logits (72) | offsets (144) | pad] and the
    per-head (9-point) softmax of the attn segment, stored lane-dense."""
    acc = jnp.dot(x_ref[...], w_ref[...], preferred_element_type=jnp.float32)
    acc = acc + b_ref[...]
    n_attn = n_heads * n_points
    pieces = []
    for h in range(n_heads):                       # static loop: 8 segments of 9
        seg = acc[:, h * n_points:(h + 1) * n_points]
        m = jnp.max(seg, axis=-1, keepdims=True)
        e = jnp.exp(seg - m)
        s = jnp.sum(e, axis=-1, keepdims=True)
        pieces.append(e * pl.reciprocal(s, approx=True))
    pieces.append(acc[:, n_attn:])                 # offsets + zero padding, as-is
    o_ref[...] = jnp.concatenate(pieces, axis=-1).astype(o_ref.dtype)


def fused_offsets_attn_pallas(q, attn_w, attn_b, off_w, off_b,
                              n_heads=8, n_points=9):
    """Fused sampling_offsets + attention_weights projection + per-head softmax.

    q: (M, d).  Returns (attn_softmaxed (M, H*P), sampling_offsets (M, H*P*2)).
    """
    M, K = q.shape
    n_attn = n_heads * n_points
    n_off = n_heads * n_points * 2
    n_used = n_attn + n_off
    Np = -(-n_used // 128) * 128                    # pad N to lane-dense 256
    w = jnp.concatenate([attn_w, off_w], axis=1)
    b = jnp.concatenate([jnp.asarray(attn_b, jnp.float32),
                         jnp.asarray(off_b, jnp.float32)], axis=0)
    if Np != n_used:
        w = jnp.pad(w, ((0, 0), (0, Np - n_used)))
        b = jnp.pad(b, ((0, Np - n_used),))
    b = b.reshape(1, Np)
    tm, Mp = _row_tiles(M)
    qp = _pad_rows(q, Mp).astype(jnp.bfloat16)
    wb = w.astype(jnp.bfloat16)
    out = pl.pallas_call(
        partial(_fused_qproj_kernel, n_heads=n_heads, n_points=n_points),
        out_shape=jax.ShapeDtypeStruct((Mp, Np), jnp.float32),
        grid=(Mp // tm,),
        in_specs=[
            pl.BlockSpec((tm, K), lambda i: (i, 0)),
            pl.BlockSpec((K, Np), lambda i: (0, 0)),
            pl.BlockSpec((1, Np), lambda i: (0, 0)),
        ],
        out_specs=pl.BlockSpec((tm, Np), lambda i: (i, 0)),
        compiler_params=pltpu.CompilerParams(dimension_semantics=("parallel",)),
    )(qp, wb, b)
    out = out if Mp == M else out[:M]
    return out[:, :n_attn], out[:, n_attn:n_attn + n_off]


def _outproj_norm_kernel(x_ref, fq_ref, w_ref, b_ref, o_ref, *, att_wt):
    """sa = x @ out_w + out_b;  comb = normalize(f_q) + att_wt * normalize(sa).
    Output packs [sa | comb] into one lane-dense 2*C slab."""
    sa = jnp.dot(x_ref[...], w_ref[...], preferred_element_type=jnp.float32)
    sa = sa + b_ref[...]
    fq = fq_ref[...].astype(jnp.float32)
    eps2 = 1e-24                                    # == F.normalize eps (1e-12) squared
    inv_fq = jax.lax.rsqrt(jnp.maximum(jnp.sum(fq * fq, axis=-1, keepdims=True), eps2))
    inv_sa = jax.lax.rsqrt(jnp.maximum(jnp.sum(sa * sa, axis=-1, keepdims=True), eps2))
    comb = fq * inv_fq + att_wt * (sa * inv_sa)
    o_ref[...] = jnp.concatenate([sa, comb], axis=-1).astype(o_ref.dtype)


def outproj_norm_combine_pallas(x, fq, w, b, att_wt):
    """Fused MSDeformAttn output projection + normalize-combine.  x, fq: (M, C)."""
    M, K = x.shape
    K2, N = w.shape
    assert K == K2 and fq.shape == (M, N)
    b = jnp.asarray(b, jnp.float32).reshape(1, N)
    tm, Mp = _row_tiles(M)
    xp = _pad_rows(x, Mp).astype(jnp.bfloat16)
    fqp = _pad_rows(fq, Mp).astype(jnp.float32)
    wb = w.astype(jnp.bfloat16)
    out = pl.pallas_call(
        partial(_outproj_norm_kernel, att_wt=float(att_wt)),
        out_shape=jax.ShapeDtypeStruct((Mp, 2 * N), jnp.float32),
        grid=(Mp // tm,),
        in_specs=[
            pl.BlockSpec((tm, K), lambda i: (i, 0)),
            pl.BlockSpec((tm, N), lambda i: (i, 0)),
            pl.BlockSpec((K, N), lambda i: (0, 0)),
            pl.BlockSpec((1, N), lambda i: (0, 0)),
        ],
        out_specs=pl.BlockSpec((tm, 2 * N), lambda i: (i, 0)),
        compiler_params=pltpu.CompilerParams(dimension_semantics=("parallel",)),
    )(xp, fqp, wb, b)
    return out if Mp == M else out[:M]


# ------------------------------ JAX glue ------------------------------------

def sine_pos_encoding_flat(B, H, W, num_feats, temperature=10000.0, eps=1e-6,
                           scale=2.0 * math.pi):
    """SinePositionalEncoding(num_feats, normalize=True), mask = all-valid,
    produced directly channels-last and flattened to (B*H*W, 2*num_feats)."""
    y_embed = jnp.broadcast_to(jnp.arange(1, H + 1, dtype=jnp.float32)[:, None], (H, W))
    x_embed = jnp.broadcast_to(jnp.arange(1, W + 1, dtype=jnp.float32)[None, :], (H, W))
    y_embed = y_embed / (float(H) + eps) * scale
    x_embed = x_embed / (float(W) + eps) * scale
    dim_t = jnp.arange(num_feats, dtype=jnp.float32)
    dim_t = temperature ** (2.0 * jnp.floor(dim_t / 2.0) / num_feats)
    pos_x = x_embed[..., None] / dim_t                                 # (H, W, nf)
    pos_y = y_embed[..., None] / dim_t
    pos_x = jnp.stack((jnp.sin(pos_x[..., 0::2]), jnp.cos(pos_x[..., 1::2])),
                      axis=-1).reshape(H, W, -1)
    pos_y = jnp.stack((jnp.sin(pos_y[..., 0::2]), jnp.cos(pos_y[..., 1::2])),
                      axis=-1).reshape(H, W, -1)
    pos = jnp.concatenate((pos_y, pos_x), axis=-1)                     # (H, W, 2*nf)
    pos = jnp.broadcast_to(pos[None], (B, H, W, 2 * num_feats))
    return pos.reshape(B * H * W, 2 * num_feats)


def ms_deform_attn_core(value, spatial_shape, sampling_locations, attention_weights):
    """Pure-JAX equivalent of ms_deform_attn_core_pytorch for n_levels=1.

    value: (B, S, M, D); sampling_locations: (B, Lq, M, 1, P, 2) in [0,1];
    attention_weights: (B, Lq, M, 1, P).  Bilinear, zeros padding,
    align_corners=False (matches F.grid_sample with grid = 2*loc - 1).
    """
    B, S, M, D = value.shape
    _, Lq, _, L, P, _ = sampling_locations.shape
    H, W = spatial_shape
    val = value.transpose(0, 2, 1, 3).reshape(B * M, S, D)             # (BM, HW, D)
    grid = sampling_locations[:, :, :, 0]                              # (B, Lq, M, P, 2)
    grid = grid.transpose(0, 2, 1, 3, 4).reshape(B * M, Lq * P, 2)
    x = grid[..., 0] * W - 0.5
    y = grid[..., 1] * H - 0.5
    x0 = jnp.floor(x)
    y0 = jnp.floor(y)

    def corner(xc, yc, wgt):
        valid = ((xc >= 0) & (xc <= W - 1) & (yc >= 0) & (yc <= H - 1))
        xi = jnp.clip(xc, 0, W - 1).astype(jnp.int32)
        yi = jnp.clip(yc, 0, H - 1).astype(jnp.int32)
        idx = yi * W + xi                                              # (BM, Lq*P)
        v = jax.vmap(lambda vv, ii: vv[ii])(val, idx)                  # (BM, Lq*P, D)
        return v * (wgt * valid.astype(jnp.float32))[..., None]

    samp = (corner(x0, y0, (x0 + 1 - x) * (y0 + 1 - y))
            + corner(x0 + 1, y0, (x - x0) * (y0 + 1 - y))
            + corner(x0, y0 + 1, (x0 + 1 - x) * (y - y0))
            + corner(x0 + 1, y0 + 1, (x - x0) * (y - y0)))
    samp = samp.reshape(B * M, Lq, P, D)
    aw = attention_weights.transpose(0, 2, 1, 3, 4).reshape(B * M, Lq, L * P)
    out = jnp.sum(samp * aw[..., None], axis=2)                        # (BM, Lq, D)
    out = out.reshape(B, M, Lq, D).transpose(0, 2, 1, 3).reshape(B, Lq, M * D)
    return out


def deform_att_forward(params, fq_fea_flat, f_q_flat, B, H, W,
                       n_heads=8, n_points=9):
    """DeformAtt + MSDeformAttn, up to (not including) the output projection.

    fq_fea_flat, f_q_flat: (B*H*W, d), channels-last, row order (b, h, w).
    Returns the pre-output-projection deformable-attention result, (B*H*W, d).
    """
    Lq = H * W
    d = fq_fea_flat.shape[-1]
    hd = d // n_heads

    # query = flattened fq_fea + sine positional encoding (padding_mask=None)
    pos_flat = sine_pos_encoding_flat(B, H, W, num_feats=d // 2)       # (B*Lq, d)
    query = fq_fea_flat + pos_flat
    # level_embed not added (num_levels == 1)

    # get_reference_points (single level)
    ref_y, ref_x = jnp.meshgrid((jnp.arange(H, dtype=jnp.float32) + 0.5) / H,
                                (jnp.arange(W, dtype=jnp.float32) + 0.5) / W,
                                indexing="ij")
    ref = jnp.stack([ref_x.reshape(-1), ref_y.reshape(-1)], axis=-1)   # (Lq, 2)

    # value projection
    value = linear_pallas(f_q_flat, params["value_w"], params["value_b"])
    value = value.reshape(B, Lq, n_heads, hd)

    # fused sampling-offset + attention-weight projection (+ per-head softmax)
    attn, samp_off = fused_offsets_attn_pallas(
        query, params["attn_w"], params["attn_b"],
        params["off_w"], params["off_b"], n_heads=n_heads, n_points=n_points)
    samp_off = samp_off.reshape(B, Lq, n_heads, 1, n_points, 2)
    attn = attn.reshape(B, Lq, n_heads, 1, n_points)

    offset_norm = jnp.array([W, H], dtype=jnp.float32)                 # (W, H) per level
    samp_loc = (ref[None, :, None, None, None, :]
                + samp_off / offset_norm[None, None, None, None, None, :])

    out = ms_deform_attn_core(value, (H, W), samp_loc, attn)           # (B, Lq, d)
    return out.reshape(B * Lq, d)


def detr_forward(params, fq_lst, fs_lst, f_q, f_s, att_wt, idx=(1, 2)):
    """DeTr.forward with sf_att=True, cs_att=False (MatchNet unavailable)."""
    del f_s  # only used by the (disabled) cross-attention branch
    B, C, H, W = f_q.shape
    M = B * H * W

    # single channels-last entry transpose per activation
    fq_cat = jnp.concatenate([fq_lst[i].transpose(0, 2, 3, 1) for i in idx],
                             axis=-1).reshape(M, -1)
    f_q_flat = f_q.transpose(0, 2, 3, 1).reshape(M, C)
    # NOTE: fs_fea = adjust_feature(fs_cat) of compute_feat is dead when
    # cs_att=False; removed per perf review (output-identical).

    # adjust_feature: 1x1 conv (no bias) + ReLU
    fq_fea_flat = linear_pallas(fq_cat, params["adjust_w"], b=None, apply_relu=True)

    # self-attention (DeformAtt) branch, pre output-projection
    deform_out = deform_att_forward(params, fq_fea_flat, f_q_flat, B, H, W)

    # fused: output projection + F.normalize(f_q) + att_wt * F.normalize(sa_fq)
    packed = outproj_norm_combine_pallas(deform_out, f_q_flat,
                                         params["out_w"], params["out_b"], att_wt)
    sa_flat = packed[:, :C]
    comb_flat = packed[:, C:]

    # single exit transpose back to NCHW
    sa_fq = sa_flat.reshape(B, H, W, C).transpose(0, 3, 1, 2)
    fq_out = comb_flat.reshape(B, H, W, C).transpose(0, 3, 1, 2)
    return fq_out, sa_fq, None


# ------------------------------- main ---------------------------------------

def make_params(key, in_fea_dim, reduce_dim, n_heads=8, n_points=9, n_levels=1):
    ks = jax.random.split(key, 12)
    d = reduce_dim

    def w(k, shape, scale=0.05):
        return (scale * jax.random.normal(k, shape)).astype(jnp.float32)

    return {
        "adjust_w": w(ks[0], (in_fea_dim, reduce_dim)),                 # Conv2d 1x1, no bias
        "level_embed": w(ks[1], (n_levels, reduce_dim)),                # unused (n_levels=1)
        "value_w": w(ks[2], (d, d)),
        "value_b": w(ks[3], (d,)),
        "off_w": w(ks[4], (d, n_heads * n_levels * n_points * 2)),
        "off_b": w(ks[5], (n_heads * n_levels * n_points * 2,)),
        "attn_w": w(ks[6], (d, n_heads * n_levels * n_points)),
        "attn_b": w(ks[7], (n_heads * n_levels * n_points,)),
        "out_w": w(ks[8], (d, d)),
        "out_b": w(ks[9], (d,)),
    }


if __name__ == "__main__":
    key = jax.random.PRNGKey(0)
    kin, kparam = jax.random.split(key)
    kk = jax.random.split(kin, 10)

    # Small-scale analogue of args: rmid='l34' (idx -> [1, 2]), att_wt=0.5.
    B, H, W = 2, 8, 8
    c_l2, c_l3, c_l4 = 32, 64, 64
    in_fea_dim = c_l3 + c_l4            # small-scale in_fea_dim_lookup['l34']
    reduce_dim = 64                     # divisible by n_heads=8
    att_wt = 0.5

    fq_lst = [jax.random.normal(kk[0], (B, c_l2, H, W), jnp.float32),
              jax.random.normal(kk[1], (B, c_l3, H, W), jnp.float32),
              jax.random.normal(kk[2], (B, c_l4, H, W), jnp.float32)]
    fs_lst = [jax.random.normal(kk[3], (B, c_l2, H, W), jnp.float32),
              jax.random.normal(kk[4], (B, c_l3, H, W), jnp.float32),
              jax.random.normal(kk[5], (B, c_l4, H, W), jnp.float32)]
    f_q = jax.random.normal(kk[6], (B, reduce_dim, H, W), jnp.float32)
    f_s = jax.random.normal(kk[7], (B, reduce_dim, H, W), jnp.float32)

    params = make_params(kparam, in_fea_dim, reduce_dim)

    # jit so the plain-JAX glue (pos encoding, gather, entry/exit transposes)
    # is fused by XLA around the Pallas calls; att_wt / idx are static.
    detr_jit = jax.jit(partial(detr_forward, att_wt=att_wt, idx=(1, 2)))

    fq_out, sa_fq, ca_fq = detr_jit(params, fq_lst, fs_lst, f_q, f_s)
    jax.block_until_ready(fq_out)
    jax.block_until_ready(sa_fq)
    assert fq_out.shape == f_q.shape and sa_fq.shape == f_q.shape and ca_fq is None
    assert bool(jnp.all(jnp.isfinite(fq_out))) and bool(jnp.all(jnp.isfinite(sa_fq)))
    print("KERNEL_OK")
</pallas_src>

<mosaic_0001>
module attributes {stable_mosaic.version = 11 : i64} {
  func.func @_linear_kernel(%arg0: i32, %arg1: memref<128x128xbf16, #tpu.memory_space<vmem>>, %arg2: memref<128x64xbf16, #tpu.memory_space<vmem>>, %arg3: memref<1x64xf32, #tpu.memory_space<vmem>>, %arg4: memref<128x64xf32, #tpu.memory_space<vmem>>) attributes {dimension_semantics = [#tpu.dimension_semantics<parallel>], iteration_bounds = array<i64: 1>, scalar_prefetch = 0 : i64, scratch_operands = 0 : i64, tpu.core_type = #tpu.core_type<tc>, window_params = [{transform_indices = @transform_0, window_bounds = array<i64: 128, 128>}, {pipeline_mode = #tpu.pipeline_mode<synchronous>, transform_indices = @transform_1, window_bounds = array<i64: 128, 64>}, {pipeline_mode = #tpu.pipeline_mode<synchronous>, transform_indices = @transform_2, window_bounds = array<i64: 1, 64>}, {transform_indices = @transform_3, window_bounds = array<i64: 128, 64>}]} {
    %c0 = arith.constant 0 : index
    %c0_0 = arith.constant 0 : index
    %0 = vector.load %arg1[%c0, %c0_0] : memref<128x128xbf16, #tpu.memory_space<vmem>>, vector<128x128xbf16>
    %c0_1 = arith.constant 0 : index
    %c0_2 = arith.constant 0 : index
    %1 = vector.load %arg2[%c0_1, %c0_2] : memref<128x64xbf16, #tpu.memory_space<vmem>>, vector<128x64xbf16>
    %cst = arith.constant dense<0.000000e+00> : vector<128x64xf32>
    %2 = tpu.matmul %0, %1, %cst {dimension_numbers = #tpu.dot_dimension_numbers<[1], [0], [0], [1], [0, 0, 1, 1], [], []>} : vector<128x128xbf16>, vector<128x64xbf16>, vector<128x64xf32> -> vector<128x64xf32>
    %c0_3 = arith.constant 0 : index
    %c0_4 = arith.constant 0 : index
    %3 = vector.load %arg3[%c0_3, %c0_4] : memref<1x64xf32, #tpu.memory_space<vmem>>, vector<1x64xf32>
    %4 = vector.broadcast %3 : vector<1x64xf32> to vector<128x64xf32>
    %5 = arith.addf %2, %4 : vector<128x64xf32>
    %cst_5 = arith.constant 0.000000e+00 : f32
    %6 = vector.broadcast %cst_5 : f32 to vector<128x64xf32>
    %7 = arith.maximumf %5, %6 : vector<128x64xf32>
    %c0_6 = arith.constant 0 : index
    %c0_7 = arith.constant 0 : index
    %8 = vector.load %arg4[%c0_6, %c0_7] : memref<128x64xf32, #tpu.memory_space<vmem>>, vector<128x64xf32>
    tpu.vector_store %arg4[%c0_6, %c0_7], %7 {strides = array<i32>} : memref<128x64xf32, #tpu.memory_space<vmem>>, vector<128x64xf32>,
    return
  }
  func.func @transform_0(%arg0: i32) -> (i32, i32) {
    %c0_i32 = arith.constant 0 : i32
    %c0_i32_0 = arith.constant 0 : i32
    return %arg0, %c0_i32 : i32, i32
  }
  func.func @transform_1(%arg0: i32) -> (i32, i32) {
    %c0_i32 = arith.constant 0 : i32
    %c0_i32_0 = arith.constant 0 : i32
    %c0_i32_1 = arith.constant 0 : i32
    return %c0_i32, %c0_i32_0 : i32, i32
  }
  func.func @transform_2(%arg0: i32) -> (i32, i32) {
    %c0_i32 = arith.constant 0 : i32
    %c0_i32_0 = arith.constant 0 : i32
    %c0_i32_1 = arith.constant 0 : i32
    return %c0_i32, %c0_i32_0 : i32, i32
  }
  func.func @transform_3(%arg0: i32) -> (i32, i32) {
    %c0_i32 = arith.constant 0 : i32
    %c0_i32_0 = arith.constant 0 : i32
    return %arg0, %c0_i32 : i32, i32
  }
}

module attributes {stable_mosaic.version = 11 : i64} {
  func.func @_fused_qproj_kernel(%arg0: i32, %arg1: memref<128x64xbf16, #tpu.memory_space<vmem>>, %arg2: memref<64x256xbf16, #tpu.memory_space<vmem>>, %arg3: memref<1x256xf32, #tpu.memory_space<vmem>>, %arg4: memref<128x256xf32, #tpu.memory_space<vmem>>) attributes {dimension_semantics = [#tpu.dimension_semantics<parallel>], iteration_bounds = array<i64: 1>, scalar_prefetch = 0 : i64, scratch_operands = 0 : i64, tpu.core_type = #tpu.core_type<tc>, window_params = [{transform_indices = @transform_0, window_bounds = array<i64: 128, 64>}, {pipeline_mode = #tpu.pipeline_mode<synchronous>, transform_indices = @transform_1, window_bounds = array<i64: 64, 256>}, {pipeline_mode = #tpu.pipeline_mode<synchronous>, transform_indices = @transform_2, window_bounds = array<i64: 1, 256>}, {transform_indices = @transform_3, window_bounds = array<i64: 128, 256>}]} {
    %c0 = arith.constant 0 : index
    %c0_0 = arith.constant 0 : index
    %0 = vector.load %arg1[%c0, %c0_0] : memref<128x64xbf16, #tpu.memory_space<vmem>>, vector<128x64xbf16>
    %c0_1 = arith.constant 0 : index
    %c0_2 = arith.constant 0 : index
    %1 = vector.load %arg2[%c0_1, %c0_2] : memref<64x256xbf16, #tpu.memory_space<vmem>>, vector<64x256xbf16>
    %cst = arith.constant dense<0.000000e+00> : vector<128x256xf32>
    %2 = tpu.matmul %0, %1, %cst {dimension_numbers = #tpu.dot_dimension_numbers<[1], [0], [0], [1], [0, 0, 1, 1], [], []>} : vector<128x64xbf16>, vector<64x256xbf16>, vector<128x256xf32> -> vector<128x256xf32>
    %c0_3 = arith.constant 0 : index
    %c0_4 = arith.constant 0 : index
    %3 = vector.load %arg3[%c0_3, %c0_4] : memref<1x256xf32, #tpu.memory_space<vmem>>, vector<1x256xf32>
    %4 = vector.broadcast %3 : vector<1x256xf32> to vector<128x256xf32>
    %5 = arith.addf %2, %4 : vector<128x256xf32>
    %6 = vector.extract_strided_slice %5 {offsets = [0, 0], sizes = [128, 9], strides = [1, 1]} : vector<128x256xf32> to vector<128x9xf32>
    %cst_5 = arith.constant dense<0xFF800000> : vector<128xf32>
    %7 = vector.multi_reduction <maximumf>, %6, %cst_5 [1] : vector<128x9xf32> to vector<128xf32>
    %8 = vector.shape_cast %7 : vector<128xf32> to vector<128x1xf32>
    %9 = vector.broadcast %8 : vector<128x1xf32> to vector<128x9xf32>
    %10 = arith.subf %6, %9 : vector<128x9xf32>
    %11 = math.exp %10 : vector<128x9xf32>
    %cst_6 = arith.constant dense<0.000000e+00> : vector<128xf32>
    %12 = vector.multi_reduction <add>, %11, %cst_6 [1] : vector<128x9xf32> to vector<128xf32>
    %13 = vector.shape_cast %12 : vector<128xf32> to vector<128x1xf32>
    %14 = tpu.reciprocal %13 {approx = true} : vector<128x1xf32> -> vector<128x1xf32>
    %15 = vector.broadcast %14 : vector<128x1xf32> to vector<128x9xf32>
    %16 = arith.mulf %11, %15 : vector<128x9xf32>
    %17 = vector.extract_strided_slice %5 {offsets = [0, 9], sizes = [128, 9], strides = [1, 1]} : vector<128x256xf32> to vector<128x9xf32>
    %cst_7 = arith.constant dense<0xFF800000> : vector<128xf32>
    %18 = vector.multi_reduction <maximumf>, %17, %cst_7 [1] : vector<128x9xf32> to vector<128xf32>
    %19 = vector.shape_cast %18 : vector<128xf32> to vector<128x1xf32>
    %20 = vector.broadcast %19 : vector<128x1xf32> to vector<128x9xf32>
    %21 = arith.subf %17, %20 : vector<128x9xf32>
    %22 = math.exp %21 : vector<128x9xf32>
    %cst_8 = arith.constant dense<0.000000e+00> : vector<128xf32>
    %23 = vector.multi_reduction <add>, %22, %cst_8 [1] : vector<128x9xf32> to vector<128xf32>
    %24 = vector.shape_cast %23 : vector<128xf32> to vector<128x1xf32>
    %25 = tpu.reciprocal %24 {approx = true} : vector<128x1xf32> -> vector<128x1xf32>
    %26 = vector.broadcast %25 : vector<128x1xf32> to vector<128x9xf32>
    %27 = arith.mulf %22, %26 : vector<128x9xf32>
    %28 = vector.extract_strided_slice %5 {offsets = [0, 18], sizes = [128, 9], strides = [1, 1]} : vector<128x256xf32> to vector<128x9xf32>
    %cst_9 = arith.constant dense<0xFF800000> : vector<128xf32>
    %29 = vector.multi_reduction <maximumf>, %28, %cst_9 [1] : vector<128x9xf32> to vector<128xf32>
    %30 = vector.shape_cast %29 : vector<128xf32> to vector<128x1xf32>
    %31 = vector.broadcast %30 : vector<128x1xf32> to vector<128x9xf32>
    %32 = arith.subf %28, %31 : vector<128x9xf32>
    %33 = math.exp %32 : vector<128x9xf32>
    %cst_10 = arith.constant dense<0.000000e+00> : vector<128xf32>
    %34 = vector.multi_reduction <add>, %33, %cst_10 [1] : vector<128x9xf32> to vector<128xf32>
    %35 = vector.shape_cast %34 : vector<128xf32> to vector<128x1xf32>
    %36 = tpu.reciprocal %35 {approx = true} : vector<128x1xf32> -> vector<128x1xf32>
    %37 = vector.broadcast %36 : vector<128x1xf32> to vector<128x9xf32>
    %38 = arith.mulf %33, %37 : vector<128x9xf32>
    %39 = vector.extract_strided_slice %5 {offsets = [0, 27], sizes = [128, 9], strides = [1, 1]} : vector<128x256xf32> to vector<128x9xf32>
    %cst_11 = arith.constant dense<0xFF800000> : vector<128xf32>
    %40 = vector.multi_reduction <maximumf>, %39, %cst_11 [1] : vector<128x9xf32> to vector<128xf32>
    %41 = vector.shape_cast %40 : vector<128xf32> to vector<128x1xf32>
    %42 = vector.broadcast %41 : vector<128x1xf32> to vector<128x9xf32>
    %43 = arith.subf %39, %42 : vector<128x9xf32>
    %44 = math.exp %43 : vector<128x9xf32>
    %cst_12 = arith.constant dense<0.000000e+00> : vector<128xf32>
    %45 = vector.multi_reduction <add>, %44, %cst_12 [1] : vector<128x9xf32> to vector<128xf32>
    %46 = vector.shape_cast %45 : vector<128xf32> to vector<128x1xf32>
    %47 = tpu.reciprocal %46 {approx = true} : vector<128x1xf32> -> vector<128x1xf32>
    %48 = vector.broadcast %47 : vector<128x1xf32> to vector<128x9xf32>
    %49 = arith.mulf %44, %48 : vector<128x9xf32>
    %50 = vector.extract_strided_slice %5 {offsets = [0, 36], sizes = [128, 9], strides = [1, 1]} : vector<128x256xf32> to vector<128x9xf32>
    %cst_13 = arith.constant dense<0xFF800000> : vector<128xf32>
    %51 = vector.multi_reduction <maximumf>, %50, %cst_13 [1] : vector<128x9xf32> to vector<128xf32>
    %52 = vector.shape_cast %51 : vector<128xf32> to vector<128x1xf32>
    %53 = vector.broadcast %52 : vector<128x1xf32> to vector<128x9xf32>
    %54 = arith.subf %50, %53 : vector<128x9xf32>
    %55 = math.exp %54 : vector<128x9xf32>
    %cst_14 = arith.constant dense<0.000000e+00> : vector<128xf32>
    %56 = vector.multi_reduction <add>, %55, %cst_14 [1] : vector<128x9xf32> to vector<128xf32>
    %57 = vector.shape_cast %56 : vector<128xf32> to vector<128x1xf32>
    %58 = tpu.reciprocal %57 {approx = true} : vector<128x1xf32> -> vector<128x1xf32>
    %59 = vector.broadcast %58 : vector<128x1xf32> to vector<128x9xf32>
    %60 = arith.mulf %55, %59 : vector<128x9xf32>
    %61 = vector.extract_strided_slice %5 {offsets = [0, 45], sizes = [128, 9], strides = [1, 1]} : vector<128x256xf32> to vector<128x9xf32>
    %cst_15 = arith.constant dense<0xFF800000> : vector<128xf32>
    %62 = vector.multi_reduction <maximumf>, %61, %cst_15 [1] : vector<128x9xf32> to vector<128xf32>
    %63 = vector.shape_cast %62 : vector<128xf32> to vector<128x1xf32>
    %64 = vector.broadcast %63 : vector<128x1xf32> to vector<128x9xf32>
    %65 = arith.subf %61, %64 : vector<128x9xf32>
    %66 = math.exp %65 : vector<128x9xf32>
    %cst_16 = arith.constant dense<0.000000e+00> : vector<128xf32>
    %67 = vector.multi_reduction <add>, %66, %cst_16 [1] : vector<128x9xf32> to vector<128xf32>
    %68 = vector.shape_cast %67 : vector<128xf32> to vector<128x1xf32>
    %69 = tpu.reciprocal %68 {approx = true} : vector<128x1xf32> -> vector<128x1xf32>
    %70 = vector.broadcast %69 : vector<128x1xf32> to vector<128x9xf32>
    %71 = arith.mulf %66, %70 : vector<128x9xf32>
    %72 = vector.extract_strided_slice %5 {offsets = [0, 54], sizes = [128, 9], strides = [1, 1]} : vector<128x256xf32> to vector<128x9xf32>
    %cst_17 = arith.constant dense<0xFF800000> : vector<128xf32>
    %73 = vector.multi_reduction <maximumf>, %72, %cst_17 [1] : vector<128x9xf32> to vector<128xf32>
    %74 = vector.shape_cast %73 : vector<128xf32> to vector<128x1xf32>
    %75 = vector.broadcast %74 : vector<128x1xf32> to vector<128x9xf32>
    %76 = arith.subf %72, %75 : vector<128x9xf32>
    %77 = math.exp %76 : vector<128x9xf32>
    %cst_18 = arith.constant dense<0.000000e+00> : vector<128xf32>
    %78 = vector.multi_reduction <add>, %77, %cst_18 [1] : vector<128x9xf32> to vector<128xf32>
    %79 = vector.shape_cast %78 : vector<128xf32> to vector<128x1xf32>
    %80 = tpu.reciprocal %79 {approx = true} : vector<128x1xf32> -> vector<128x1xf32>
    %81 = vector.broadcast %80 : vector<128x1xf32> to vector<128x9xf32>
    %82 = arith.mulf %77, %81 : vector<128x9xf32>
    %83 = vector.extract_strided_slice %5 {offsets = [0, 63], sizes = [128, 9], strides = [1, 1]} : vector<128x256xf32> to vector<128x9xf32>
    %cst_19 = arith.constant dense<0xFF800000> : vector<128xf32>
    %84 = vector.multi_reduction <maximumf>, %83, %cst_19 [1] : vector<128x9xf32> to vector<128xf32>
    %85 = vector.shape_cast %84 : vector<128xf32> to vector<128x1xf32>
    %86 = vector.broadcast %85 : vector<128x1xf32> to vector<128x9xf32>
    %87 = arith.subf %83, %86 : vector<128x9xf32>
    %88 = math.exp %87 : vector<128x9xf32>
    %cst_20 = arith.constant dense<0.000000e+00> : vector<128xf32>
    %89 = vector.multi_reduction <add>, %88, %cst_20 [1] : vector<128x9xf32> to vector<128xf32>
    %90 = vector.shape_cast %89 : vector<128xf32> to vector<128x1xf32>
    %91 = tpu.reciprocal %90 {approx = true} : vector<128x1xf32> -> vector<128x1xf32>
    %92 = vector.broadcast %91 : vector<128x1xf32> to vector<128x9xf32>
    %93 = arith.mulf %88, %92 : vector<128x9xf32>
    %94 = vector.extract_strided_slice %5 {offsets = [0, 72], sizes = [128, 184], strides = [1, 1]} : vector<128x256xf32> to vector<128x184xf32>
    %95 = tpu.concatenate %16, %27, %38, %49, %60, %71, %82, %93, %94 in 1 : vector<128x9xf32>, vector<128x9xf32>, vector<128x9xf32>, vector<128x9xf32>, vector<128x9xf32>, vector<128x9xf32>, vector<128x9xf32>, vector<128x9xf32>, vector<128x184xf32> -> vector<128x256xf32>
    %c0_21 = arith.constant 0 : index
    %c0_22 = arith.constant 0 : index
    %96 = vector.load %arg4[%c0_21, %c0_22] : memref<128x256xf32, #tpu.memory_space<vmem>>, vector<128x256xf32>
    tpu.vector_store %arg4[%c0_21, %c0_22], %95 {strides = array<i32>} : memref<128x256xf32, #tpu.memory_space<vmem>>, vector<128x256xf32>,
    return
  }
  func.func @transform_0(%arg0: i32) -> (i32, i32) {
    %c0_i32 = arith.constant 0 : i32
    %c0_i32_0 = arith.constant 0 : i32
    return %arg0, %c0_i32 : i32, i32
  }
  func.func @transform_1(%arg0: i32) -> (i32, i32) {
    %c0_i32 = arith.constant 0 : i32
    %c0_i32_0 = arith.constant 0 : i32
    %c0_i32_1 = arith.constant 0 : i32
    return %c0_i32, %c0_i32_0 : i32, i32
  }
  func.func @transform_2(%arg0: i32) -> (i32, i32) {
    %c0_i32 = arith.constant 0 : i32
    %c0_i32_0 = arith.constant 0 : i32
    %c0_i32_1 = arith.constant 0 : i32
    return %c0_i32, %c0_i32_0 : i32, i32
  }
  func.func @transform_3(%arg0: i32) -> (i32, i32) {
    %c0_i32 = arith.constant 0 : i32
    %c0_i32_0 = arith.constant 0 : i32
    return %arg0, %c0_i32 : i32, i32
  }
}

module attributes {stable_mosaic.version = 11 : i64} {
  func.func @_linear_kernel(%arg0: i32, %arg1: memref<128x64xbf16, #tpu.memory_space<vmem>>, %arg2: memref<64x64xbf16, #tpu.memory_space<vmem>>, %arg3: memref<1x64xf32, #tpu.memory_space<vmem>>, %arg4: memref<128x64xf32, #tpu.memory_space<vmem>>) attributes {dimension_semantics = [#tpu.dimension_semantics<parallel>], iteration_bounds = array<i64: 1>, scalar_prefetch = 0 : i64, scratch_operands = 0 : i64, tpu.core_type = #tpu.core_type<tc>, window_params = [{transform_indices = @transform_0, window_bounds = array<i64: 128, 64>}, {pipeline_mode = #tpu.pipeline_mode<synchronous>, transform_indices = @transform_1, window_bounds = array<i64: 64, 64>}, {pipeline_mode = #tpu.pipeline_mode<synchronous>, transform_indices = @transform_2, window_bounds = array<i64: 1, 64>}, {transform_indices = @transform_3, window_bounds = array<i64: 128, 64>}]} {
    %c0 = arith.constant 0 : index
    %c0_0 = arith.constant 0 : index
    %0 = vector.load %arg1[%c0, %c0_0] : memref<128x64xbf16, #tpu.memory_space<vmem>>, vector<128x64xbf16>
    %c0_1 = arith.constant 0 : index
    %c0_2 = arith.constant 0 : index
    %1 = vector.load %arg2[%c0_1, %c0_2] : memref<64x64xbf16, #tpu.memory_space<vmem>>, vector<64x64xbf16>
    %cst = arith.constant dense<0.000000e+00> : vector<128x64xf32>
    %2 = tpu.matmul %0, %1, %cst {dimension_numbers = #tpu.dot_dimension_numbers<[1], [0], [0], [1], [0, 0, 1, 1], [], []>} : vector<128x64xbf16>, vector<64x64xbf16>, vector<128x64xf32> -> vector<128x64xf32>
    %c0_3 = arith.constant 0 : index
    %c0_4 = arith.constant 0 : index
    %3 = vector.load %arg3[%c0_3, %c0_4] : memref<1x64xf32, #tpu.memory_space<vmem>>, vector<1x64xf32>
    %4 = vector.broadcast %3 : vector<1x64xf32> to vector<128x64xf32>
    %5 = arith.addf %2, %4 : vector<128x64xf32>
    %c0_5 = arith.constant 0 : index
    %c0_6 = arith.constant 0 : index
    %6 = vector.load %arg4[%c0_5, %c0_6] : memref<128x64xf32, #tpu.memory_space<vmem>>, vector<128x64xf32>
    tpu.vector_store %arg4[%c0_5, %c0_6], %5 {strides = array<i32>} : memref<128x64xf32, #tpu.memory_space<vmem>>, vector<128x64xf32>,
    return
  }
  func.func @transform_0(%arg0: i32) -> (i32, i32) {
    %c0_i32 = arith.constant 0 : i32
    %c0_i32_0 = arith.constant 0 : i32
    return %arg0, %c0_i32 : i32, i32
  }
  func.func @transform_1(%arg0: i32) -> (i32, i32) {
    %c0_i32 = arith.constant 0 : i32
    %c0_i32_0 = arith.constant 0 : i32
    %c0_i32_1 = arith.constant 0 : i32
    return %c0_i32, %c0_i32_0 : i32, i32
  }
  func.func @transform_2(%arg0: i32) -> (i32, i32) {
    %c0_i32 = arith.constant 0 : i32
    %c0_i32_0 = arith.constant 0 : i32
    %c0_i32_1 = arith.constant 0 : i32
    return %c0_i32, %c0_i32_0 : i32, i32
  }
  func.func @transform_3(%arg0: i32) -> (i32, i32) {
    %c0_i32 = arith.constant 0 : i32
    %c0_i32_0 = arith.constant 0 : i32
    return %arg0, %c0_i32 : i32, i32
  }
}

module attributes {stable_mosaic.version = 11 : i64} {
  func.func @_outproj_norm_kernel(%arg0: i32, %arg1: memref<128x64xbf16, #tpu.memory_space<vmem>>, %arg2: memref<128x64xf32, #tpu.memory_space<vmem>>, %arg3: memref<64x64xbf16, #tpu.memory_space<vmem>>, %arg4: memref<1x64xf32, #tpu.memory_space<vmem>>, %arg5: memref<128x128xf32, #tpu.memory_space<vmem>>) attributes {dimension_semantics = [#tpu.dimension_semantics<parallel>], iteration_bounds = array<i64: 1>, scalar_prefetch = 0 : i64, scratch_operands = 0 : i64, tpu.core_type = #tpu.core_type<tc>, window_params = [{transform_indices = @transform_0, window_bounds = array<i64: 128, 64>}, {transform_indices = @transform_1, window_bounds = array<i64: 128, 64>}, {pipeline_mode = #tpu.pipeline_mode<synchronous>, transform_indices = @transform_2, window_bounds = array<i64: 64, 64>}, {pipeline_mode = #tpu.pipeline_mode<synchronous>, transform_indices = @transform_3, window_bounds = array<i64: 1, 64>}, {transform_indices = @transform_4, window_bounds = array<i64: 128, 128>}]} {
    %c0 = arith.constant 0 : index
    %c0_0 = arith.constant 0 : index
    %0 = vector.load %arg1[%c0, %c0_0] : memref<128x64xbf16, #tpu.memory_space<vmem>>, vector<128x64xbf16>
    %c0_1 = arith.constant 0 : index
    %c0_2 = arith.constant 0 : index
    %1 = vector.load %arg3[%c0_1, %c0_2] : memref<64x64xbf16, #tpu.memory_space<vmem>>, vector<64x64xbf16>
    %cst = arith.constant dense<0.000000e+00> : vector<128x64xf32>
    %2 = tpu.matmul %0, %1, %cst {dimension_numbers = #tpu.dot_dimension_numbers<[1], [0], [0], [1], [0, 0, 1, 1], [], []>} : vector<128x64xbf16>, vector<64x64xbf16>, vector<128x64xf32> -> vector<128x64xf32>
    %c0_3 = arith.constant 0 : index
    %c0_4 = arith.constant 0 : index
    %3 = vector.load %arg4[%c0_3, %c0_4] : memref<1x64xf32, #tpu.memory_space<vmem>>, vector<1x64xf32>
    %4 = vector.broadcast %3 : vector<1x64xf32> to vector<128x64xf32>
    %5 = arith.addf %2, %4 : vector<128x64xf32>
    %c0_5 = arith.constant 0 : index
    %c0_6 = arith.constant 0 : index
    %6 = vector.load %arg2[%c0_5, %c0_6] : memref<128x64xf32, #tpu.memory_space<vmem>>, vector<128x64xf32>
    %7 = arith.mulf %6, %6 : vector<128x64xf32>
    %cst_7 = arith.constant dense<0.000000e+00> : vector<128xf32>
    %8 = vector.multi_reduction <add>, %7, %cst_7 [1] : vector<128x64xf32> to vector<128xf32>
    %9 = vector.shape_cast %8 : vector<128xf32> to vector<128x1xf32>
    %cst_8 = arith.constant 1.000000e-24 : f32
    %10 = vector.broadcast %cst_8 : f32 to vector<128x1xf32>
    %11 = arith.maximumf %9, %10 : vector<128x1xf32>
    %12 = math.rsqrt %11 : vector<128x1xf32>
    %13 = arith.mulf %5, %5 : vector<128x64xf32>
    %cst_9 = arith.constant dense<0.000000e+00> : vector<128xf32>
    %14 = vector.multi_reduction <add>, %13, %cst_9 [1] : vector<128x64xf32> to vector<128xf32>
    %15 = vector.shape_cast %14 : vector<128xf32> to vector<128x1xf32>
    %cst_10 = arith.constant 1.000000e-24 : f32
    %16 = vector.broadcast %cst_10 : f32 to vector<128x1xf32>
    %17 = arith.maximumf %15, %16 : vector<128x1xf32>
    %18 = math.rsqrt %17 : vector<128x1xf32>
    %19 = vector.broadcast %12 : vector<128x1xf32> to vector<128x64xf32>
    %20 = arith.mulf %6, %19 : vector<128x64xf32>
    %21 = vector.broadcast %18 : vector<128x1xf32> to vector<128x64xf32>
    %22 = arith.mulf %5, %21 : vector<128x64xf32>
    %cst_11 = arith.constant 5.000000e-01 : f32
    %23 = vector.broadcast %cst_11 : f32 to vector<128x64xf32>
    %24 = arith.mulf %23, %22 : vector<128x64xf32>
    %25 = arith.addf %20, %24 : vector<128x64xf32>
    %26 = tpu.concatenate %5, %25 in 1 : vector<128x64xf32>, vector<128x64xf32> -> vector<128x128xf32>
    %c0_12 = arith.constant 0 : index
    %c0_13 = arith.constant 0 : index
    %27 = vector.load %arg5[%c0_12, %c0_13] : memref<128x128xf32, #tpu.memory_space<vmem>>, vector<128x128xf32>
    tpu.vector_store %arg5[%c0_12, %c0_13], %26 {strides = array<i32>} : memref<128x128xf32, #tpu.memory_space<vmem>>, vector<128x128xf32>,
    return
  }
  func.func @transform_0(%arg0: i32) -> (i32, i32) {
    %c0_i32 = arith.constant 0 : i32
    %c0_i32_0 = arith.constant 0 : i32
    return %arg0, %c0_i32 : i32, i32
  }
  func.func @transform_1(%arg0: i32) -> (i32, i32) {
    %c0_i32 = arith.constant 0 : i32
    %c0_i32_0 = arith.constant 0 : i32
    return %arg0, %c0_i32 : i32, i32
  }
  func.func @transform_2(%arg0: i32) -> (i32, i32) {
    %c0_i32 = arith.constant 0 : i32
    %c0_i32_0 = arith.constant 0 : i32
    %c0_i32_1 = arith.constant 0 : i32
    return %c0_i32, %c0_i32_0 : i32, i32
  }
  func.func @transform_3(%arg0: i32) -> (i32, i32) {
    %c0_i32 = arith.constant 0 : i32
    %c0_i32_0 = arith.constant 0 : i32
    %c0_i32_1 = arith.constant 0 : i32
    return %c0_i32, %c0_i32_0 : i32, i32
  }
  func.func @transform_4(%arg0: i32) -> (i32, i32) {
    %c0_i32 = arith.constant 0 : i32
    %c0_i32_0 = arith.constant 0 : i32
    return %arg0, %c0_i32 : i32, i32
  }
}

</mosaic_0001>

<bundles_post_ra>
// kernel: detr_forward.4
= control target key start
LH: loop header
LB: loop body
LE: loop exit
PB: predicated region body
PF: predicated region fallthrough
CT: control target
= control target key end

     0   :  { %vm263_vm0 = vcmask 523264   ;;  %s516_s1 = inlined_call_operand.vmem [shape: bf16[128,64], index: 1, kind: input, shape index: {}]   ;;  %s517_s0 = inlined_call_operand.vmem [shape: bf16[128,128], index: 0, kind: input, shape index: {}]   ;;  %s518_s2 = inlined_call_operand.vmem [shape: f32[1,64], index: 2, kind: input, shape index: {}]   ;;  %s519_s3 = inlined_call_operand.vmem [shape: f32[128,64], index: 3, kind: output, shape index: {}]  }
   0x1   :  { %v365_v0 = vld [vmem:[%s516_s1 + $0x38] sm:$0xff]   ;;  %v366_v1 = vld [vmem:[%s516_s1 + $0x30] sm:$0xff]   ;;  %v367_v2 = vld [vmem:[%s516_s1 + $0x28] sm:$0xff]  }
   0x2   :  { %317 = vmatprep.subr.bf16.mxu0 %v365_v0  ;;  %349 = vmatprep.subr.bf16.mxu1 %v365_v0  ;;  %v368_v3 = vld [vmem:[%s516_s1 + $0x20] sm:$0xff]   ;;  %v369_v6 = vld [vmem:[%s516_s1 + $0x18] sm:$0xff]   ;;  %v370_v7 = vld [vmem:[%s516_s1 + $0x10] sm:$0xff]  }
   0x3   :  { %318 = vmatpush3.bf16.msra.mxu0 %v365_v0  ;;  %357 = vmatpush3.bf16.msra.mxu1 %v365_v0  ;;  %v373_v4 = vld [vmem:[%s517_s0] sm:$0xff]   ;;  %v371_v8 = vld [vmem:[%s516_s1 + $0x8] sm:$0xff]   ;;  %v377_v12 = vld [vmem:[%s517_s0 + $0x10] sm:$0xff]  }
   0x4   :  { %319 = vmatprep.subr.bf16.mxu0 %v366_v1  ;;  %350 = vmatprep.subr.bf16.mxu1 %v366_v1  ;;  %v374_v5 = vld [vmem:[%s517_s0 + $0x20] sm:$0xff]   ;;  %v375_v10 = vld [vmem:[%s517_s0 + $0x8] sm:$0xff]   ;;  %v378_v13 = vld [vmem:[%s517_s0 + $0x30] sm:$0xff]  }
   0x5   :  { %333 = vmatprep.mubr.bf16.mxu0 %v373_v4  ;;  %341 = vmatprep.mubr.bf16.mxu1 %v374_v5  ;;  %v372_v9 = vld [vmem:[%s516_s1] sm:$0xff]   ;;  %v376_v11 = vld [vmem:[%s517_s0 + $0x28] sm:$0xff]   ;;  %v379_v14 = vld [vmem:[%s517_s0 + $0x18] sm:$0xff]  }
   0x6   :  { %v380_v15 = vld [vmem:[%s517_s0 + $0x38] sm:$0xff]   ;;  %v284_v16 = vld [vmem:[%s518_s2] ss:$0 sm:$0xff] }
   0x7   :  { %320 = vmatpush3.bf16.msra.mxu0 %v366_v1  ;;  %358 = vmatpush3.bf16.msra.mxu1 %v366_v1 }
   0x8   :  { %321 = vmatprep.subr.bf16.mxu0 %v367_v2  ;;  %351 = vmatprep.subr.bf16.mxu1 %v367_v2 }
   0xb   :  { %322 = vmatpush3.bf16.msra.mxu0 %v367_v2  ;;  %359 = vmatpush3.bf16.msra.mxu1 %v367_v2 }
   0xc   :  { %323 = vmatprep.subr.bf16.mxu0 %v368_v3  ;;  %352 = vmatprep.subr.bf16.mxu1 %v368_v3 }
   0xf   :  { %324 = vmatpush3.bf16.msra.mxu0 %v368_v3  ;;  %360 = vmatpush3.bf16.msra.mxu1 %v368_v3 }
  0x10   :  { %325 = vmatprep.subr.bf16.mxu0 %v369_v6  ;;  %353 = vmatprep.subr.bf16.mxu1 %v369_v6 }
  0x13   :  { %326 = vmatpush3.bf16.msra.mxu0 %v369_v6  ;;  %361 = vmatpush3.bf16.msra.mxu1 %v369_v6 }
  0x14   :  { %327 = vmatprep.subr.bf16.mxu0 %v370_v7  ;;  %354 = vmatprep.subr.bf16.mxu1 %v370_v7 }
  0x17   :  { %328 = vmatpush3.bf16.msra.mxu0 %v370_v7  ;;  %362 = vmatpush3.bf16.msra.mxu1 %v370_v7 }
  0x18   :  { %329 = vmatprep.subr.bf16.mxu0 %v371_v8  ;;  %355 = vmatprep.subr.bf16.mxu1 %v371_v8 }
  0x1b   :  { %330 = vmatpush3.bf16.msra.mxu0 %v371_v8  ;;  %363 = vmatpush3.bf16.msra.mxu1 %v371_v8 }
  0x1c   :  { %331 = vmatprep.subr.bf16.mxu0 %v372_v9  ;;  %356 = vmatprep.subr.bf16.mxu1 %v372_v9 }
  0x1f   :  { %332 = vmatpush3.bf16.msra.mxu0 %v372_v9  ;;  %364 = vmatpush3.bf16.msra.mxu1 %v372_v9 }
  0x22   :  { %334 = vmatmul.mubr.bf16.vlgmr.msra.gmra.mxu0 %v375_v10  ;;  %342 = vmatmul.mubr.bf16.vlgmr.msra.gmra.mxu1 %v376_v11 }
  0x23   :  { %337 = vmatprep.mubr.bf16.mxu0 %v377_v12  ;;  %345 = vmatprep.mubr.bf16.mxu1 %v378_v13 }
  0x2a   :  { %338 = vmatmul.mubr.bf16.gmra.mxu0 %v379_v14  ;;  %346 = vmatmul.mubr.bf16.gmra.mxu1 %v380_v15 }
  0xe2   :  { %v335_v17 = vpop.f32.mrf.mxu0  ;;  %v343_v18 = vpop.f32.mrf.mxu1 }
  0xe3   :  { %v193_v19 = vadd.f32 %v335_v17, %v284_v16  ;;  %v225_v20 = vadd.f32 %v343_v18, %v284_v16 }
  0xe4   :  { %v184_v21 = vpop.f32.mrf.mxu0  ;;  %v216_v22 = vpop.f32.mrf.mxu1 }
  0xe5   :  { %v249_v23 = vmax.f32 %v193_v19, 0.0  ;;  %v257_v24 = vmax.f32 %v225_v20, 0.0  ;;  %v185_v25 = vadd.f32 %v284_v16, %v184_v21  ;;  %v217_v26 = vadd.f32 %v284_v16, %v216_v22 }
  0xe6   :  { %v336_v27 = vpop.f32.mrf.mxu0  ;;  %v344_v28 = vpop.f32.mrf.mxu1 }
  0xe7   :  { %266 = vst.msk [vmem:[%s519_s3 + $0x10] sm:$0xff] %vm263_vm0, %v249_v23  ;;  %274 = vst.msk [vmem:[%s519_s3 + $0x50] sm:$0xff] %vm263_vm0, %v257_v24  ;;  %v247_v29 = vmax.f32 %v185_v25, 0.0  ;;  %v255_v30 = vmax.f32 %v217_v26, 0.0  ;;  %v196_v31 = vadd.f32 %v336_v27, %v284_v16  ;;  %v228_v32 = vadd.f32 %v344_v28, %v284_v16 }
  0xe8   :  { %v187_v33 = vpop.f32.mrf.mxu0  ;;  %v219_v34 = vpop.f32.mrf.mxu1 }
  0xe9   :  { %264 = vst.msk [vmem:[%s519_s3] sm:$0xff] %vm263_vm0, %v247_v29  ;;  %272 = vst.msk [vmem:[%s519_s3 + $0x40] sm:$0xff] %vm263_vm0, %v255_v30  ;;  %v250_v35 = vmax.f32 %v196_v31, 0.0  ;;  %v258_v36 = vmax.f32 %v228_v32, 0.0  ;;  %v188_v37 = vadd.f32 %v284_v16, %v187_v33  ;;  %v220_v38 = vadd.f32 %v284_v16, %v219_v34 }
  0xea   :  { %v339_v39 = vpop.f32.mrf.mxu0  ;;  %v347_v40 = vpop.f32.mrf.mxu1 }
  0xeb   :  { %267 = vst.msk [vmem:[%s519_s3 + $0x18] sm:$0xff] %vm263_vm0, %v250_v35  ;;  %275 = vst.msk [vmem:[%s519_s3 + $0x58] sm:$0xff] %vm263_vm0, %v258_v36  ;;  %v248_v41 = vmax.f32 %v188_v37, 0.0  ;;  %v256_v42 = vmax.f32 %v220_v38, 0.0  ;;  %v209_v43 = vadd.f32 %v339_v39, %v284_v16  ;;  %v241_v44 = vadd.f32 %v347_v40, %v284_v16 }
  0xec   :  { %v200_v45 = vpop.f32.mrf.mxu0  ;;  %v232_v46 = vpop.f32.mrf.mxu1 }
  0xed   :  { %265 = vst.msk [vmem:[%s519_s3 + $0x8] sm:$0xff] %vm263_vm0, %v248_v41  ;;  %273 = vst.msk [vmem:[%s519_s3 + $0x48] sm:$0xff] %vm263_vm0, %v256_v42  ;;  %v253_v47 = vmax.f32 %v209_v43, 0.0  ;;  %v261_v48 = vmax.f32 %v241_v44, 0.0  ;;  %v201_v49 = vadd.f32 %v284_v16, %v200_v45  ;;  %v233_v50 = vadd.f32 %v284_v16, %v232_v46 }
  0xee   :  { %v340_v51 = vpop.f32.mrf.mxu0  ;;  %v348_v52 = vpop.f32.mrf.mxu1 }
  0xef   :  { %270 = vst.msk [vmem:[%s519_s3 + $0x30] sm:$0xff] %vm263_vm0, %v253_v47  ;;  %278 = vst.msk [vmem:[%s519_s3 + $0x70] sm:$0xff] %vm263_vm0, %v261_v48  ;;  %v251_v53 = vmax.f32 %v201_v49, 0.0  ;;  %v259_v54 = vmax.f32 %v233_v50, 0.0  ;;  %v212_v55 = vadd.f32 %v340_v51, %v284_v16  ;;  %v244_v56 = vadd.f32 %v348_v52, %v284_v16 }
  0xf0   :  { %v203_v57 = vpop.f32.mrf.mxu0  ;;  %v235_v58 = vpop.f32.mrf.mxu1 }
  0xf1   :  { %268 = vst.msk [vmem:[%s519_s3 + $0x20] sm:$0xff] %vm263_vm0, %v251_v53  ;;  %276 = vst.msk [vmem:[%s519_s3 + $0x60] sm:$0xff] %vm263_vm0, %v259_v54  ;;  %v254_v59 = vmax.f32 %v212_v55, 0.0  ;;  %v262_v60 = vmax.f32 %v244_v56, 0.0  ;;  %v204_v61 = vadd.f32 %v284_v16, %v203_v57  ;;  %v236_v62 = vadd.f32 %v284_v16, %v235_v58 }
  0xf3   :  { %271 = vst.msk [vmem:[%s519_s3 + $0x38] sm:$0xff] %vm263_vm0, %v254_v59  ;;  %279 = vst.msk [vmem:[%s519_s3 + $0x78] sm:$0xff] %vm263_vm0, %v262_v60  ;;  %v252_v63 = vmax.f32 %v204_v61, 0.0  ;;  %v260_v0 = vmax.f32 %v236_v62, 0.0 }
  0xf5   :  { %269 = vst.msk [vmem:[%s519_s3 + $0x28] sm:$0xff] %vm263_vm0, %v252_v63  ;;  %277 = vst.msk [vmem:[%s519_s3 + $0x68] sm:$0xff] %vm263_vm0, %v260_v0 }

// kernel: detr_forward.6
= control target key start
LH: loop header
LB: loop body
LE: loop exit
PB: predicated region body
PF: predicated region fallthrough
CT: control target
= control target key end

     0   :  { %v2876_v1 = vmov 0   ;;  %vm131_vm0 = vcmask 523264   ;;  %v41_v17 = vlaneseq  ;;  %vm269_vm1 = vcmask 72704   ;;  %s2877_s18 = smov 119   ;;  %s2878_s19 = smov 110   ;;  %s5274_s1 = inlined_call_operand.vmem [shape: bf16[64,256], index: 1, kind: input, shape index: {}]   ;;  %s5275_s0 = inlined_call_operand.vmem [shape: bf16[128,64], index: 0, kind: input, shape index: {}]   ;;  %s5276_s2 = inlined_call_operand.vmem [shape: f32[1,256], index: 2, kind: input, shape index: {}]   ;;  %s5277_s3 = inlined_call_operand.vmem [shape: f32[128,256], index: 3, kind: output, shape index: {}]  }
   0x1   :  { %v2344_v0 = vld [vmem:[%s5274_s1 + $0x34] ss:$8 sps:$4 sm:$0xff]   ;;  %188 = vmatprep.mubr.bf16.mxu0 %v2876_v1  ;;  %228 = vmatprep.mubr.bf16.mxu1 %v2876_v1  ;;  %v2346_v2 = vld [vmem:[%s5274_s1 + $0x30] ss:$8 sps:$4 sm:$0xff]   ;;  %v2347_v3 = vld [vmem:[%s5274_s1 + $0x24] ss:$8 sps:$4 sm:$0xff]  }
   0x2   :  { %164 = vmatprep.subr.bf16.mxu0 %v2344_v0  ;;  %2328 = vmatprep.subr.bf16.mxu1 %v2344_v0  ;;  %v2349_v4 = vld [vmem:[%s5274_s1 + $0x20] ss:$8 sps:$4 sm:$0xff]   ;;  %v2350_v5 = vld [vmem:[%s5274_s1 + $0x14] ss:$8 sps:$4 sm:$0xff]   ;;  %v2352_v6 = vld [vmem:[%s5274_s1 + $0x10] ss:$8 sps:$4 sm:$0xff]  }
   0x3   :  { %165 = vmatpush1.bf16.msra.mxu0 %v2346_v2  ;;  %2332 = vmatpush1.bf16.msra.mxu1 %v2346_v2  ;;  %v2353_v7 = vld [vmem:[%s5274_s1 + $0x4] ss:$8 sps:$4 sm:$0xff]   ;;  %v2355_v8 = vld [vmem:[%s5274_s1] ss:$8 sps:$4 sm:$0xff]   ;;  %v2360_v13 = vld [vmem:[%s5275_s0 + $0x10] sm:$0xff]   ;;  %v42_v18 = vshrl.u32 %v41_v17, 7 }
   0x4   :  { %166 = vmatprep.subr.bf16.mxu0 %v2347_v3  ;;  %2329 = vmatprep.subr.bf16.mxu1 %v2347_v3  ;;  %v2356_v9 = vld [vmem:[%s5275_s0] sm:$0xff]   ;;  %v2358_v11 = vld [vmem:[%s5275_s0 + $0x28] sm:$0xff]   ;;  %v2361_v14 = vld [vmem:[%s5275_s0 + $0x30] sm:$0xff]   ;;  %vm446_vm2 = vcmask 146504   ;;  %vm687_vm3 = vcmask 220304   ;;  %vm928_vm4 = vcmask 294104  }
   0x5   :  { %v2357_v10 = vld [vmem:[%s5275_s0 + $0x20] sm:$0xff]   ;;  %v2359_v12 = vld [vmem:[%s5275_s0 + $0x8] sm:$0xff]   ;;  %v2362_v15 = vld [vmem:[%s5275_s0 + $0x18] sm:$0xff]   ;;  %v43_v19 = vsub.s32 0, %v42_v18  ;;  %v47_v21 = vsub.s32 1, %v42_v18  ;;  %vm1169_vm5 = vcmask 367904  }
   0x6   :  { %v2363_v16 = vld [vmem:[%s5275_s0 + $0x38] sm:$0xff]   ;;  %v39_v20 = vld [vmem:[%s5276_s2] sm:$0x3]  ;;  %s2879_s20 = smov 101   ;;  %s2880_s21 = smov 92   ;;  %vm1410_vm6 = vcmask 441704  }
   0x7   :  { %167 = vmatpush1.bf16.msra.mxu0 %v2349_v4  ;;  %2333 = vmatpush1.bf16.msra.mxu1 %v2349_v4  ;;  %v2963_v22 = vrot.slane %v39_v20, %v43_v19  ;;  %v2965_v23 = vrot.slane %v39_v20, %v47_v21  ;;  %s2881_s22 = smov 83   ;;  %vm1651_vm7 = vcmask 515504   ;;  %vm1892_vm8 = vcmask 589304   ;;  %s2882_s23 = smov 74  }
   0x8   :  { %168 = vmatprep.subr.bf16.mxu0 %v2350_v5  ;;  %2330 = vmatprep.subr.bf16.mxu1 %v2350_v5  ;;  %s2883_s24 = smov 65   ;;  %vm2149_vm9 = vcmask 146432   ;;  %vm2166_vm10 = vcmask 220160   ;;  %vm2183_vm11 = vcmask 293888   ;;  %vm2200_vm12 = vcmask 367616  }
   0x9   :  { %vm2217_vm13 = vcmask 441344   ;;  %vm2234_vm14 = vcmask 515072   ;;  %vm2251_vm15 = vcmask 588800  }
   0xb   :  { %169 = vmatpush1.bf16.msra.mxu0 %v2352_v6  ;;  %2334 = vmatpush1.bf16.msra.mxu1 %v2352_v6 }
   0xc   :  { %170 = vmatprep.subr.bf16.mxu0 %v2353_v7  ;;  %2331 = vmatprep.subr.bf16.mxu1 %v2353_v7 }
   0xf   :  { %171 = vmatpush1.bf16.msra.mxu0 %v2355_v8  ;;  %2335 = vmatpush1.bf16.msra.mxu1 %v2355_v8 }
  0x12   :  { %2320 = vmatmul.mubr.msk.bf16.vlgmr.msra.gmra.mxu0 %vm131_vm0, %v2356_v9  ;;  %2324 = vmatmul.mubr.msk.bf16.vlgmr.msra.gmra.mxu1 %vm131_vm0, %v2357_v10 }
  0x13   :  { %238 = vmatprep.mubr.bf16.mxu1 %v2876_v1  ;;  %198 = vmatprep.mubr.bf16.mxu0 %v2876_v1 }
  0x1a   :  { %2325 = vmatmul.mubr.msk.bf16.gmra.mxu1 %vm131_vm0, %v2358_v11  ;;  %2321 = vmatmul.mubr.msk.bf16.gmra.mxu0 %vm131_vm0, %v2359_v12 }
  0x1b   :  { %208 = vmatprep.mubr.bf16.mxu0 %v2876_v1  ;;  %248 = vmatprep.mubr.bf16.mxu1 %v2876_v1 }
  0x22   :  { %2322 = vmatmul.mubr.msk.bf16.gmra.mxu0 %vm131_vm0, %v2360_v13  ;;  %2326 = vmatmul.mubr.msk.bf16.gmra.mxu1 %vm131_vm0, %v2361_v14 }
  0x23   :  { %218 = vmatprep.mubr.bf16.mxu0 %v2876_v1  ;;  %258 = vmatprep.mubr.bf16.mxu1 %v2876_v1 }
  0x2a   :  { %2323 = vmatmul.mubr.msk.bf16.gmra.mxu0 %vm131_vm0, %v2362_v15  ;;  %2327 = vmatmul.mubr.msk.bf16.gmra.mxu1 %vm131_vm0, %v2363_v16 }
  0xd2   :  { %v190_v24 = vpop.f32.mrf.mxu0  ;;  %v230_v25 = vpop.f32.mrf.mxu1 }
  0xd3   :  { %v2968_v26 = vadd.f32 %v190_v24, %v2963_v22  ;;  %v2971_v27 = vadd.f32 %v230_v25, %v2963_v22 }
  0xd4   :  { %v192_v28 = vpop.f32.mrf.mxu0  ;;  %v232_v29 = vpop.f32.mrf.mxu1 }
  0xd5   :  { %5422 = vst [vmem:[#allocation2_spill] sm:$0xff] %v2968_v26  ;;  %5423 = vst [vmem:[#allocation3_spill] sm:$0xff] %v2971_v27  ;;  %v193_v30 = vadd.f32 %v192_v28, %v2965_v23  ;;  %v233_v31 = vadd.f32 %v232_v29, %v2965_v23  ;;  %v270_v32 = vsel %vm269_vm1, %v2968_v26, -inf  ;;  %v294_v36 = vsel %vm269_vm1, %v2971_v27, -inf }
  0xd6   :  { %v194_v33 = vpop.f32.mrf.mxu0  ;;  %v234_v34 = vpop.f32.mrf.mxu1  ;;  %271 = vmax.xlane.f32.xlu0 %v270_v32  ;;  %v447_v48 = vsel %vm446_vm2, %v2968_v26, -inf  ;;  %v471_v56 = vsel %vm446_vm2, %v2971_v27, -inf  ;;  %v688_v2 = vsel %vm687_vm3, %v2968_v26, -inf  ;;  %v712_v12 = vsel %vm687_vm3, %v2971_v27, -inf }
  0xd7   :  { %2269 = vst [vmem:[%s5277_s3 + $0x8] sm:$0xff] %v193_v30  ;;  %2285 = vst [vmem:[%s5277_s3 + $0x88] sm:$0xff] %v233_v31  ;;  %v2984_v35 = vadd.f32 %v234_v34, %v2963_v22  ;;  %v2989_v39 = vadd.f32 %v194_v33, %v2963_v22  ;;  %v929_v24 = vsel %vm928_vm4, %v2968_v26, -inf }
  0xd8   :  { %v196_v37 = vpop.f32.mrf.mxu0  ;;  %v236_v38 = vpop.f32.mrf.mxu1 }
  0xd9   :  { %5424 = vst [vmem:[#allocation4_spill] sm:$0xff] %v2984_v35  ;;  %5425 = vst [vmem:[#allocation5_spill] sm:$0xff] %v2989_v39  ;;  %v197_v40 = vadd.f32 %v196_v37, %v2965_v23  ;;  %v237_v41 = vadd.f32 %v236_v38, %v2965_v23  ;;  %v297_v42 = vsel %vm269_vm1, %v2984_v35, -inf  ;;  %v450_v47 = vsel %vm446_vm2, %v2989_v39, -inf }
  0xda   :  { %298 = vmax.xlane.f32.xlu1 %v297_v42  ;;  %295 = vmax.xlane.f32.xlu0 %v294_v36  ;;  %v2995_v43 = vpop.f32.mrf.mxu1  ;;  %v2997_v44 = vpop.f32.mrf.mxu0  ;;  %v474_v55 = vsel %vm446_vm2, %v2984_v35, -inf  ;;  %v691_v1 = vsel %vm687_vm3, %v2989_v39, -inf  ;;  %v715_v11 = vsel %vm687_vm3, %v2984_v35, -inf  ;;  %v932_v21 = vsel %vm928_vm4, %v2989_v39, -inf }
  0xdb   :  { %2271 = vst [vmem:[%s5277_s3 + $0x18] sm:$0xff] %v197_v40  ;;  %2287 = vst [vmem:[%s5277_s3 + $0x98] sm:$0xff] %v237_v41  ;;  %v956_v36 = vsel %vm928_vm4, %v2984_v35, -inf  ;;  %v953_v37 = vsel %vm928_vm4, %v2971_v27, -inf  ;;  %v1173_v41 = vsel %vm1169_vm5, %v2989_v39, -inf  ;;  %v1170_v42 = vsel %vm1169_vm5, %v2968_v26, -inf }
  0xdc   :  { %v242_v45 = vpop.f32.mrf.mxu1  ;;  %v202_v46 = vpop.f32.mrf.mxu0 }
  0xdd   :  { %v243_v49 = vadd.f32 %v242_v45, %v2965_v23  ;;  %v203_v50 = vadd.f32 %v202_v46, %v2965_v23  ;;  %v1197_v45 = vsel %vm1169_vm5, %v2984_v35, -inf  ;;  %v1194_v46 = vsel %vm1169_vm5, %v2971_v27, -inf }
  0xde   :  { %451 = vmax.xlane.f32.xlu1 %v450_v47  ;;  %448 = vmax.xlane.f32.xlu0 %v447_v48  ;;  %v3011_v51 = vpop.f32.mrf.mxu1  ;;  %v3013_v52 = vpop.f32.mrf.mxu0  ;;  %v3119_v47 = vadd.f32 %v2995_v43, %v2963_v22 }
  0xdf   :  { %2289 = vst [vmem:[%s5277_s3 + $0xa8] sm:$0xff] %v243_v49  ;;  %2273 = vst [vmem:[%s5277_s3 + $0x28] sm:$0xff] %v203_v50  ;;  %v3123_v48 = vadd.f32 %v3013_v52, %v2963_v22  ;;  %v273_v49 = vsel %vm269_vm1, %v2989_v39, -inf  ;;  %v3135_v43 = vadd.f32 %v3011_v51, %v2963_v22 }
  0xe0   :  { %v246_v53 = vpop.f32.mrf.mxu1  ;;  %v206_v54 = vpop.f32.mrf.mxu0  ;;  %5435 = vst [vmem:[#allocation15_spill] sm:$0xff] %v3119_v47 }
  0xe1   :  { %v247_v57 = vadd.f32 %v246_v53, %v2965_v23  ;;  %v207_v58 = vadd.f32 %v206_v54, %v2965_v23  ;;  %5436 = vst [vmem:[#allocation16_spill] sm:$0xff] %v3123_v48  ;;  %v279_v50 = vsel %vm269_vm1, %v3123_v48, -inf  ;;  %v300_v53 = vsel %vm269_vm1, %v3119_v47, -inf  ;;  %5437 = vst [vmem:[#allocation17_spill] sm:$0xff] %v3135_v43 }
  0xe2   :  { %475 = vmax.xlane.f32.xlu1 %v474_v55  ;;  %472 = vmax.xlane.f32.xlu0 %v471_v56  ;;  %v210_v59 = vpop.f32.mrf.mxu0  ;;  %v250_v60 = vpop.f32.mrf.mxu1  ;;  %v303_v54 = vsel %vm269_vm1, %v3135_v43, -inf  ;;  %v456_v55 = vsel %vm446_vm2, %v3123_v48, -inf  ;;  %v477_v56 = vsel %vm446_vm2, %v3119_v47, -inf }
  0xe3   :  { %2291 = vst [vmem:[%s5277_s3 + $0xb8] sm:$0xff] %v247_v57  ;;  %2275 = vst [vmem:[%s5277_s3 + $0x38] sm:$0xff] %v207_v58  ;;  %v3034_v61 = vadd.f32 %v210_v59, %v2963_v22  ;;  %v3037_v62 = vadd.f32 %v250_v60, %v2963_v22  ;;  %v697_v57 = vsel %vm687_vm3, %v3123_v48, -inf  ;;  %v718_v58 = vsel %vm687_vm3, %v3119_v47, -inf }
  0xe4   :  { %v212_v63 = vpop.f32.mrf.mxu0  ;;  %v252_v0 = vpop.f32.mrf.mxu1  ;;  %v721_v59 = vsel %vm687_vm3, %v3135_v43, -inf }
  0xe5   :  { %5426 = vst [vmem:[#allocation6_spill] sm:$0xff] %v3034_v61  ;;  %5427 = vst [vmem:[#allocation7_spill] sm:$0xff] %v3037_v62  ;;  %v213_v3 = vadd.f32 %v212_v63, %v2965_v23  ;;  %v253_v4 = vadd.f32 %v252_v0, %v2965_v23  ;;  %v938_v63 = vsel %vm928_vm4, %v3123_v48, -inf  ;;  %v959_v0 = vsel %vm928_vm4, %v3119_v47, -inf }
  0xe6   :  { %692 = vmax.xlane.f32.xlu1 %v691_v1  ;;  %689 = vmax.xlane.f32.xlu0 %v688_v2  ;;  %v214_v5 = vpop.f32.mrf.mxu0  ;;  %v254_v6 = vpop.f32.mrf.mxu1  ;;  %v962_v1 = vsel %vm928_vm4, %v3135_v43, -inf }
  0xe7   :  { %2277 = vst [vmem:[%s5277_s3 + $0x48] sm:$0xff] %v213_v3  ;;  %v3049_v7 = vadd.f32 %v214_v5, %v2963_v22  ;;  %2293 = vst [vmem:[%s5277_s3 + $0xc8] sm:$0xff] %v253_v4  ;;  %v3055_v8 = vadd.f32 %v254_v6, %v2963_v22  ;;  %v1179_v3 = vsel %vm1169_vm5, %v3123_v48, -inf  ;;  %v1200_v4 = vsel %vm1169_vm5, %v3119_v47, -inf }
  0xe8   :  { %v216_v9 = vpop.f32.mrf.mxu0  ;;  %v256_v10 = vpop.f32.mrf.mxu1  ;;  %v282_v5 = vsel %vm269_vm1, %v3034_v61, -inf  ;;  %v1203_v6 = vsel %vm1169_vm5, %v3135_v43, -inf }
  0xe9   :  { %5428 = vst [vmem:[#allocation8_spill] sm:$0xff] %v3049_v7  ;;  %5429 = vst [vmem:[#allocation9_spill] sm:$0xff] %v3055_v8  ;;  %v217_v13 = vadd.f32 %v216_v9, %v2965_v23  ;;  %v257_v14 = vadd.f32 %v256_v10, %v2965_v23  ;;  %v306_v9 = vsel %vm269_vm1, %v3037_v62, -inf  ;;  %v285_v10 = vsel %vm269_vm1, %v3049_v7, -inf }
  0xea   :  { %716 = vmax.xlane.f32.xlu1 %v715_v11  ;;  %713 = vmax.xlane.f32.xlu0 %v712_v12  ;;  %v220_v15 = vpop.f32.mrf.mxu0  ;;  %v260_v16 = vpop.f32.mrf.mxu1  ;;  %v309_v11 = vsel %vm269_vm1, %v3055_v8, -inf  ;;  %v459_v12 = vsel %vm446_vm2, %v3034_v61, -inf }
  0xeb   :  { %2279 = vst [vmem:[%s5277_s3 + $0x58] sm:$0xff] %v217_v13  ;;  %2295 = vst [vmem:[%s5277_s3 + $0xd8] sm:$0xff] %v257_v14  ;;  %v3070_v17 = vadd.f32 %v220_v15, %v2963_v22  ;;  %v3073_v18 = vadd.f32 %v260_v16, %v2963_v22  ;;  %v462_v13 = vsel %vm446_vm2, %v3049_v7, -inf  ;;  %v483_v14 = vsel %vm446_vm2, %v3037_v62, -inf }
  0xec   :  { %v222_v19 = vpop.f32.mrf.mxu0  ;;  %v262_v20 = vpop.f32.mrf.mxu1  ;;  %v486_v15 = vsel %vm446_vm2, %v3055_v8, -inf  ;;  %v700_v16 = vsel %vm687_vm3, %v3034_v61, -inf }
  0xed   :  { %5430 = vst [vmem:[#allocation10_spill] sm:$0xff] %v3070_v17  ;;  %5431 = vst [vmem:[#allocation11_spill] sm:$0xff] %v3073_v18  ;;  %v223_v25 = vadd.f32 %v222_v19, %v2965_v23  ;;  %v263_v28 = vadd.f32 %v262_v20, %v2965_v23  ;;  %v703_v19 = vsel %vm687_vm3, %v3049_v7, -inf  ;;  %v724_v20 = vsel %vm687_vm3, %v3037_v62, -inf }
  0xee   :  { %933 = vmax.xlane.f32.xlu1 %v932_v21  ;;  %930 = vmax.xlane.f32.xlu0 %v929_v24  ;;  %v224_v29 = vpop.f32.mrf.mxu0  ;;  %v264_v30 = vpop.f32.mrf.mxu1  ;;  %v727_v21 = vsel %vm687_vm3, %v3055_v8, -inf  ;;  %v941_v24 = vsel %vm928_vm4, %v3034_v61, -inf }
  0xef   :  { %2281 = vst [vmem:[%s5277_s3 + $0x68] sm:$0xff] %v223_v25  ;;  %v3085_v31 = vadd.f32 %v224_v29, %v2963_v22  ;;  %2297 = vst [vmem:[%s5277_s3 + $0xe8] sm:$0xff] %v263_v28  ;;  %v3091_v32 = vadd.f32 %v264_v30, %v2963_v22  ;;  %v944_v25 = vsel %vm928_vm4, %v3049_v7, -inf  ;;  %v965_v28 = vsel %vm928_vm4, %v3037_v62, -inf }
  0xf0   :  { %v226_v33 = vpop.f32.mrf.mxu0  ;;  %v266_v34 = vpop.f32.mrf.mxu1  ;;  %v968_v29 = vsel %vm928_vm4, %v3055_v8, -inf  ;;  %v1182_v30 = vsel %vm1169_vm5, %v3034_v61, -inf }
  0xf1   :  { %5432 = vst [vmem:[#allocation12_spill] sm:$0xff] %v3085_v31  ;;  %5433 = vst [vmem:[#allocation13_spill] sm:$0xff] %v3091_v32  ;;  %v227_v38 = vadd.f32 %v226_v33, %v2965_v23  ;;  %v267_v40 = vadd.f32 %v266_v34, %v2965_v23  ;;  %v3111_v23 = vadd.f32 %v2997_v44, %v2963_v22  ;;  %v480_v22 = vsel %vm446_vm2, %v3135_v43, -inf }
  0xf2   :  { %957 = vmax.xlane.f32.xlu1 %v956_v36  ;;  %954 = vmax.xlane.f32.xlu0 %v953_v37  ;;  %v1185_v33 = vsel %vm1169_vm5, %v3049_v7, -inf  ;;  %v1206_v34 = vsel %vm1169_vm5, %v3037_v62, -inf  ;;  %v288_v36 = vsel %vm269_vm1, %v3070_v17, -inf  ;;  %v1209_v37 = vsel %vm1169_vm5, %v3055_v8, -inf }
  0xf3   :  { %2283 = vst [vmem:[%s5277_s3 + $0x78] sm:$0xff] %v227_v38  ;;  %2299 = vst [vmem:[%s5277_s3 + $0xf8] sm:$0xff] %v267_v40  ;;  %v276_v44 = vsel %vm269_vm1, %v3111_v23, -inf  ;;  %v453_v52 = vsel %vm446_vm2, %v3111_v23, -inf  ;;  %v694_v51 = vsel %vm687_vm3, %v3111_v23, -inf  ;;  %v935_v60 = vsel %vm928_vm4, %v3111_v23, -inf }
  0xf4   :  { %5434 = vst [vmem:[#allocation14_spill] sm:$0xff] %v3111_v23  ;;  %v1176_v2 = vsel %vm1169_vm5, %v3111_v23, -inf  ;;  %v312_v38 = vsel %vm269_vm1, %v3073_v18, -inf  ;;  %v291_v40 = vsel %vm269_vm1, %v3085_v31, -inf }
  0xf6   :  { %1174 = vmax.xlane.f32.xlu1 %v1173_v41  ;;  %1171 = vmax.xlane.f32.xlu0 %v1170_v42  ;;  %v315_v41 = vsel %vm269_vm1, %v3091_v32, -inf  ;;  %v465_v42 = vsel %vm446_vm2, %v3070_v17, -inf }
  0xfa   :  { %1198 = vmax.xlane.f32.xlu1 %v1197_v45  ;;  %1195 = vmax.xlane.f32.xlu0 %v1194_v46  ;;  %v468_v45 = vsel %vm446_vm2, %v3085_v31, -inf  ;;  %v489_v46 = vsel %vm446_vm2, %v3073_v18, -inf }
  0xfe   :  { %277 = vmax.xlane.f32.xlu1 %v276_v44  ;;  %274 = vmax.xlane.f32.xlu0 %v273_v49  ;;  %v492_v44 = vsel %vm446_vm2, %v3091_v32, -inf  ;;  %v706_v49 = vsel %vm687_vm3, %v3070_v17, -inf }
 0x102   :  { %280 = vmax.xlane.f32.xlu1 %v279_v50  ;;  %301 = vmax.xlane.f32.xlu0 %v300_v53  ;;  %v709_v53 = vsel %vm687_vm3, %v3085_v31, -inf }
 0x106   :  { %304 = vmax.xlane.f32.xlu1 %v303_v54  ;;  %454 = vmax.xlane.f32.xlu0 %v453_v52  ;;  %v730_v52 = vsel %vm687_vm3, %v3073_v18, -inf }
 0x10a   :  { %457 = vmax.xlane.f32.xlu1 %v456_v55  ;;  %478 = vmax.xlane.f32.xlu0 %v477_v56  ;;  %v733_v56 = vsel %vm687_vm3, %v3091_v32, -inf }
 0x10e   :  { %481 = vmax.xlane.f32.xlu1 %v480_v22  ;;  %695 = vmax.xlane.f32.xlu0 %v694_v51  ;;  %v947_v22 = vsel %vm928_vm4, %v3070_v17, -inf }
 0x112   :  { %698 = vmax.xlane.f32.xlu1 %v697_v57  ;;  %719 = vmax.xlane.f32.xlu0 %v718_v58  ;;  %v950_v58 = vsel %vm928_vm4, %v3085_v31, -inf }
 0x116   :  { %722 = vmax.xlane.f32.xlu1 %v721_v59  ;;  %936 = vmax.xlane.f32.xlu0 %v935_v60  ;;  %v971_v59 = vsel %vm928_vm4, %v3073_v18, -inf }
 0x11a   :  { %939 = vmax.xlane.f32.xlu1 %v938_v63  ;;  %960 = vmax.xlane.f32.xlu0 %v959_v0 }
 0x11e   :  { %963 = vmax.xlane.f32.xlu1 %v962_v1  ;;  %1177 = vmax.xlane.f32.xlu0 %v1176_v2  ;;  %v974_v1 = vsel %vm928_vm4, %v3091_v32, -inf  ;;  %v1188_v2 = vsel %vm1169_vm5, %v3070_v17, -inf }
 0x122   :  { %1180 = vmax.xlane.f32.xlu1 %v1179_v3  ;;  %1201 = vmax.xlane.f32.xlu0 %v1200_v4 }
 0x126   :  { %1204 = vmax.xlane.f32.xlu1 %v1203_v6  ;;  %283 = vmax.xlane.f32.xlu0 %v282_v5 }
 0x12a   :  { %286 = vmax.xlane.f32.xlu1 %v285_v10  ;;  %307 = vmax.xlane.f32.xlu0 %v306_v9  ;;  %v1191_v10 = vsel %vm1169_vm5, %v3085_v31, -inf }
 0x12e   :  { %310 = vmax.xlane.f32.xlu1 %v309_v11  ;;  %460 = vmax.xlane.f32.xlu0 %v459_v12 }
 0x132   :  { %463 = vmax.xlane.f32.xlu1 %v462_v13  ;;  %484 = vmax.xlane.f32.xlu0 %v483_v14 }
 0x136   :  { %487 = vmax.xlane.f32.xlu1 %v486_v15  ;;  %701 = vmax.xlane.f32.xlu0 %v700_v16 }
 0x13a   :  { %704 = vmax.xlane.f32.xlu1 %v703_v19  ;;  %725 = vmax.xlane.f32.xlu0 %v724_v20 }
 0x13e   :  { %728 = vmax.xlane.f32.xlu1 %v727_v21  ;;  %942 = vmax.xlane.f32.xlu0 %v941_v24 }
 0x142   :  { %945 = vmax.xlane.f32.xlu1 %v944_v25  ;;  %966 = vmax.xlane.f32.xlu0 %v965_v28 }
 0x146   :  { %969 = vmax.xlane.f32.xlu1 %v968_v29  ;;  %1183 = vmax.xlane.f32.xlu0 %v1182_v30 }
 0x14a   :  { %1186 = vmax.xlane.f32.xlu1 %v1185_v33  ;;  %1207 = vmax.xlane.f32.xlu0 %v1206_v34 }
 0x14e   :  { %1210 = vmax.xlane.f32.xlu1 %v1209_v37  ;;  %289 = vmax.xlane.f32.xlu0 %v288_v36 }
 0x152   :  { %292 = vmax.xlane.f32.xlu1 %v291_v40  ;;  %313 = vmax.xlane.f32.xlu0 %v312_v38 }
 0x156   :  { %316 = vmax.xlane.f32.xlu1 %v315_v41  ;;  %466 = vmax.xlane.f32.xlu0 %v465_v42 }
 0x15a   :  { %469 = vmax.xlane.f32.xlu1 %v468_v45  ;;  %490 = vmax.xlane.f32.xlu0 %v489_v46 }
 0x15e   :  { %493 = vmax.xlane.f32.xlu1 %v492_v44  ;;  %707 = vmax.xlane.f32.xlu0 %v706_v49 }
 0x15f   :  { %v3229_v50 = vpop.xlane.xlu0 %271 }
 0x162   :  { %710 = vmax.xlane.f32.xlu1 %v709_v53  ;;  %731 = vmax.xlane.f32.xlu0 %v730_v52 }
 0x163   :  { %v3235_v54 = vpop.xlane.xlu1 %298  ;;  %v3237_v55 = vpop.xlane.xlu0 %295 }
 0x166   :  { %734 = vmax.xlane.f32.xlu1 %v733_v56  ;;  %948 = vmax.xlane.f32.xlu0 %v947_v22 }
 0x167   :  { %v452_v51 = vpop.xlane.xlu1 %451  ;;  %v449_v57 = vpop.xlane.xlu0 %448 }
 0x168   :  { %v496_v0 = vsub.f32 %v2989_v39, %v452_v51  ;;  %v495_v3 = vsub.f32 %v2968_v26, %v449_v57 }
 0x16a   :  { %951 = vmax.xlane.f32.xlu1 %v950_v58  ;;  %972 = vmax.xlane.f32.xlu0 %v971_v59  ;;  %v513_v6 = vmul.f32 1.442695, %v496_v0  ;;  %v511_v11 = vmul.f32 1.442695, %v495_v3 }
 0x16b   :  { %v476_v60 = vpop.xlane.xlu1 %475  ;;  %v473_v63 = vpop.xlane.xlu0 %472 }
 0x16c   :  { %v504_v9 = vsub.f32 %v2984_v35, %v476_v60  ;;  %v503_v12 = vsub.f32 %v2971_v27, %v473_v63  ;;  %2364 = vpow2.f32 %v513_v6 }
 0x16d   :  { %2366 = vpow2.f32 %v511_v11  ;;  %v326_v11 = vsub.f32 %v2971_v27, %v3237_v55 }
 0x16e   :  { %975 = vmax.xlane.f32.xlu1 %v974_v1  ;;  %1189 = vmax.xlane.f32.xlu0 %v1188_v2  ;;  %v529_v15 = vmul.f32 1.442695, %v504_v9  ;;  %v527_v19 = vmul.f32 1.442695, %v503_v12  ;;  %v318_v9 = vsub.f32 %v2968_v26, %v3229_v50 }
 0x16f   :  { %v693_v4 = vpop.xlane.xlu1 %692  ;;  %v690_v5 = vpop.xlane.xlu0 %689 }
 0x170   :  { %v737_v16 = vsub.f32 %v2989_v39, %v693_v4  ;;  %v736_v20 = vsub.f32 %v2968_v26, %v690_v5  ;;  %2368 = vpow2.f32 %v529_v15  ;;  %v334_v12 = vmul.f32 1.442695, %v318_v9 }
 0x171   :  { %2370 = vpow2.f32 %v527_v19  ;;  %v350_v15 = vmul.f32 1.442695, %v326_v11 }
 0x172   :  { %1192 = vmax.xlane.f32.xlu1 %v1191_v10  ;;  %v754_v24 = vmul.f32 1.442695, %v737_v16  ;;  %v752_v29 = vmul.f32 1.442695, %v736_v20  ;;  %v327_v16 = vsub.f32 %v2984_v35, %v3235_v54 }
 0x173   :  { %v717_v13 = vpop.xlane.xlu1 %716  ;;  %v714_v14 = vpop.xlane.xlu0 %713 }
 0x174   :  { %v745_v25 = vsub.f32 %v2984_v35, %v717_v13  ;;  %v744_v30 = vsub.f32 %v2971_v27, %v714_v14  ;;  %2372 = vpow2.f32 %v754_v24  ;;  %v352_v50 = vmul.f32 1.442695, %v327_v16 }
 0x175   :  { %2374 = vpow2.f32 %v752_v29 }
 0x176   :  { %v770_v33 = vmul.f32 1.442695, %v745_v25  ;;  %v768_v36 = vmul.f32 1.442695, %v744_v30 }
 0x177   :  { %v934_v21 = vpop.xlane.xlu1 %933  ;;  %v931_v28 = vpop.xlane.xlu0 %930 }
 0x178   :  { %v978_v34 = vsub.f32 %v2989_v39, %v934_v21  ;;  %v977_v37 = vsub.f32 %v2968_v26, %v931_v28  ;;  %2376 = vpow2.f32 %v770_v33 }
 0x179   :  { %v3264_v45 = vpop.eup %2364  ;;  %2378 = vpow2.f32 %v768_v36 }
 0x17a   :  { %v995_v41 = vmul.f32 1.442695, %v978_v34  ;;  %5438 = vst [vmem:[#allocation18_spill] sm:$0xff] %v3264_v45  ;;  %v993_v46 = vmul.f32 1.442695, %v977_v37  ;;  %v3267_v49 = vpop.eup %2366 }
 0x17b   :  { %v958_v38 = vpop.xlane.xlu1 %957  ;;  %v955_v40 = vpop.xlane.xlu0 %954  ;;  %5439 = vst [vmem:[#allocation19_spill] sm:$0xff] %v3267_v49 }
 0x17c   :  { %v986_v42 = vsub.f32 %v2984_v35, %v958_v38  ;;  %v985_v44 = vsub.f32 %v2971_v27, %v955_v40  ;;  %2380 = vpow2.f32 %v995_v41 }
 0x17d   :  { %v3273_v52 = vpop.eup %2368  ;;  %2382 = vpow2.f32 %v993_v46 }
 0x17e   :  { %v1011_v53 = vmul.f32 1.442695, %v986_v42  ;;  %5440 = vst [vmem:[#allocation20_spill] sm:$0xff] %v3273_v52  ;;  %v1009_v56 = vmul.f32 1.442695, %v985_v44  ;;  %v3275_v22 = vpop.eup %2370 }
 0x17f   :  { %5441 = vst [vmem:[#allocation21_spill] sm:$0xff] %v3275_v22  ;;  %v3283_v57 = vpop.xlane.xlu0 %1171  ;;  %v3317_v5 = vpop.xlane.xlu1 %1174 }
 0x180   :  { %2384 = vpow2.f32 %v1011_v53 }
 0x181   :  { %v3281_v51 = vpop.eup %2372  ;;  %2386 = vpow2.f32 %v1009_v56 }
 0x182   :  { %5442 = vst [vmem:[#allocation22_spill] sm:$0xff] %v3281_v51  ;;  %v3285_v58 = vpop.eup %2374  ;;  %2388 = vpow2.f32 %v334_v12 }
 0x183   :  { %561 = vrot.lane.b32.xlu1 %v3264_v45, %s2877_s18  ;;  %5443 = vst [vmem:[#allocation23_spill] sm:$0xff] %v3285_v58  ;;  %v3297_v63 = vpop.xlane.xlu0 %1195  ;;  %v3323_v10 = vpop.xlane.xlu1 %1198  ;;  %2390 = vpow2.f32 %v350_v15 }
 0x184   :  { %559 = vrot.lane.b32.xlu0 %v3267_v49, %s2877_s18 }
 0x185   :  { %v3291_v59 = vpop.eup %2376 }
 0x186   :  { %5444 = vst [vmem:[#allocation24_spill] sm:$0xff] %v3291_v59  ;;  %v3293_v60 = vpop.eup %2378 }
 0x187   :  { %577 = vrot.lane.b32.xlu1 %v3273_v52, %s2877_s18  ;;  %5445 = vst [vmem:[#allocation25_spill] sm:$0xff] %v3293_v60  ;;  %v275_v3 = vpop.xlane.xlu0 %274  ;;  %v3330_v19 = vpop.xlane.xlu1 %277 }
 0x188   :  { %575 = vrot.lane.b32.xlu0 %v3275_v22, %s2877_s18  ;;  %v319_v13 = vsub.f32 %v2989_v39, %v275_v3 }
 0x189   :  { %v3301_v0 = vpop.eup %2380 }
 0x18a   :  { %5446 = vst [vmem:[#allocation26_spill] sm:$0xff] %v3301_v0  ;;  %v3303_v1 = vpop.eup %2382  ;;  %v336_v20 = vmul.f32 1.442695, %v319_v13 }
 0x18b   :  { %802 = vrot.lane.b32.xlu1 %v3281_v51, %s2878_s19  ;;  %5447 = vst [vmem:[#allocation27_spill] sm:$0xff] %v3303_v1  ;;  %v3319_v6 = vpop.xlane.xlu0 %301  ;;  %v3332_v24 = vpop.xlane.xlu1 %280 }
 0x18c   :  { %800 = vrot.lane.b32.xlu0 %v3285_v58, %s2878_s19  ;;  %2392 = vpow2.f32 %v336_v20 }
 0x18d   :  { %v3309_v2 = vpop.eup %2384  ;;  %2394 = vpow2.f32 %v352_v50 }
 0x18e   :  { %5448 = vst [vmem:[#allocation28_spill] sm:$0xff] %v3309_v2  ;;  %v3311_v4 = vpop.eup %2386 }
 0x18f   :  { %818 = vrot.lane.b32.xlu1 %v3291_v59, %s2878_s19  ;;  %5449 = vst [vmem:[#allocation29_spill] sm:$0xff] %v3311_v4  ;;  %v455_v14 = vpop.xlane.xlu0 %454  ;;  %v3334_v25 = vpop.xlane.xlu1 %304 }
 0x190   :  { %816 = vrot.lane.b32.xlu0 %v3293_v60, %s2878_s19  ;;  %v3336_v28 = vpop.eup %2388  ;;  %v497_v36 = vsub.f32 %v3111_v23, %v455_v14 }
 0x191   :  { %5450 = vst [vmem:[#allocation30_spill] sm:$0xff] %v3336_v28  ;;  %v3338_v30 = vpop.eup %2390  ;;  %v366_v54 = vsel %vm269_vm1, %v3336_v28, 0.0 }
 0x192   :  { %5451 = vst [vmem:[#allocation31_spill] sm:$0xff] %v3338_v30  ;;  %v390_v38 = vsel %vm269_vm1, %v3338_v30, 0.0  ;;  %v515_v46 = vmul.f32 1.442695, %v497_v36 }
 0x193   :  { %1043 = vrot.lane.b32.xlu1 %v3301_v0, %s2879_s20  ;;  %v479_v21 = vpop.xlane.xlu0 %478  ;;  %v458_v34 = vpop.xlane.xlu1 %457 }
 0x194   :  { %1041 = vrot.lane.b32.xlu0 %v3303_v1, %s2879_s20  ;;  %v505_v42 = vsub.f32 %v3119_v47, %v479_v21  ;;  %2396 = vpow2.f32 %v515_v46  ;;  %v498_v20 = vsub.f32 %v3123_v48, %v458_v34 }
 0x196   :  { %v531_v3 = vmul.f32 1.442695, %v505_v42 }
 0x197   :  { %1059 = vrot.lane.b32.xlu1 %v3309_v2, %s2879_s20  ;;  %v696_v55 = vpop.xlane.xlu0 %695  ;;  %v482_v44 = vpop.xlane.xlu1 %481  ;;  %v329_v2 = vsub.f32 %v3135_v43, %v3334_v25 }
 0x198   :  { %1057 = vrot.lane.b32.xlu0 %v3311_v4, %s2879_s20  ;;  %v738_v53 = vsub.f32 %v3111_v23, %v696_v55  ;;  %2398 = vpow2.f32 %v531_v3  ;;  %v517_v55 = vmul.f32 1.442695, %v498_v20 }
 0x199   :  { %v3342_v33 = vpop.eup %2392  ;;  %v356_v59 = vmul.f32 1.442695, %v329_v2 }
 0x19a   :  { %5452 = vst [vmem:[#allocation32_spill] sm:$0xff] %v3342_v33  ;;  %v369_v40 = vsel %vm269_vm1, %v3342_v33, 0.0  ;;  %v3349_v41 = vpop.eup %2394  ;;  %v756_v12 = vmul.f32 1.442695, %v738_v53 }
 0x19b   :  { %v720_v29 = vpop.xlane.xlu0 %719  ;;  %5453 = vst [vmem:[#allocation33_spill] sm:$0xff] %v3349_v41  ;;  %v393_v56 = vsel %vm269_vm1, %v3349_v41, 0.0  ;;  %v699_v16 = vpop.xlane.xlu1 %698 }
 0x19c   :  { %v746_v9 = vsub.f32 %v3119_v47, %v720_v29  ;;  %2400 = vpow2.f32 %v756_v12  ;;  %v506_v29 = vsub.f32 %v3135_v43, %v482_v44 }
 0x19e   :  { %v772_v14 = vmul.f32 1.442695, %v746_v9  ;;  %v533_v36 = vmul.f32 1.442695, %v506_v29  ;;  %v320_v29 = vsub.f32 %v3111_v23, %v3330_v19 }
 0x19f   :  { %v937_v37 = vpop.xlane.xlu0 %936 }
 0x1a0   :  { %v979_v13 = vsub.f32 %v3111_v23, %v937_v37  ;;  %2402 = vpow2.f32 %v772_v14  ;;  %v739_v37 = vsub.f32 %v3123_v48, %v699_v16 }
 0x1a2   :  { %v997_v21 = vmul.f32 1.442695, %v979_v13  ;;  %v758_v34 = vmul.f32 1.442695, %v739_v37  ;;  %v338_v37 = vmul.f32 1.442695, %v320_v29 }
 0x1a3   :  { %v961_v11 = vpop.xlane.xlu0 %960 }
 0x1a4   :  { %v987_v15 = vsub.f32 %v3119_v47, %v961_v11  ;;  %2404 = vpow2.f32 %v997_v21 }
 0x1a6   :  { %v1013_v50 = vmul.f32 1.442695, %v987_v15 }
 0x1a7   :  { %v3381_v12 = vpop.xlane.xlu0 %1177 }
 0x1a8   :  { %2406 = vpow2.f32 %v1013_v50 }
 0x1a9   :  { %2408 = vpow2.f32 %v517_v55 }
 0x1aa   :  { %2410 = vpow2.f32 %v533_v36 }
 0x1ab   :  { %2412 = vpow2.f32 %v758_v34  ;;  %v3396_v21 = vpop.xlane.xlu0 %1201 }
 0x1af   :  { %v3410_v34 = vpop.xlane.xlu0 %283 }
 0x1b7   :  { %367 = vadd.xlane.f32.xlu0 %v366_v54  ;;  %v723_v54 = vpop.xlane.xlu1 %722 }
 0x1b8   :  { %v747_v46 = vsub.f32 %v3135_v43, %v723_v54 }
 0x1bb   :  { %391 = vadd.xlane.f32.xlu0 %v390_v38  ;;  %370 = vadd.xlane.f32.xlu1 %v369_v40  ;;  %v3361_v38 = vpop.eup %2396  ;;  %v940_v42 = vpop.xlane.xlu1 %939 }
 0x1bc   :  { %5454 = vst [vmem:[#allocation34_spill] sm:$0xff] %v3361_v38  ;;  %v3363_v40 = vpop.eup %2398  ;;  %v980_v3 = vsub.f32 %v3123_v48, %v940_v42  ;;  %v328_v42 = vsub.f32 %v3119_v47, %v3319_v6 }
 0x1bd   :  { %5455 = vst [vmem:[#allocation35_spill] sm:$0xff] %v3363_v40  ;;  %v3370_v44 = vpop.eup %2400 }
 0x1be   :  { %5456 = vst [vmem:[#allocation36_spill] sm:$0xff] %v3370_v44  ;;  %v3372_v53 = vpop.eup %2402  ;;  %v999_v14 = vmul.f32 1.442695, %v980_v3  ;;  %v354_v19 = vmul.f32 1.442695, %v328_v42  ;;  %v3420_v3 = vpop.xlane.xlu0 %307 }
 0x1bf   :  { %394 = vadd.xlane.f32.xlu1 %v393_v56  ;;  %5457 = vst [vmem:[#allocation37_spill] sm:$0xff] %v3372_v53  ;;  %v774_v56 = vmul.f32 1.442695, %v747_v46  ;;  %v964_v9 = vpop.xlane.xlu1 %963  ;;  %v3379_v11 = vpop.eup %2404 }
 0x1c0   :  { %5458 = vst [vmem:[#allocation38_spill] sm:$0xff] %v3379_v11  ;;  %v3383_v13 = vpop.eup %2406  ;;  %v988_v15 = vsub.f32 %v3135_v43, %v964_v9 }
 0x1c1   :  { %5459 = vst [vmem:[#allocation39_spill] sm:$0xff] %v3383_v13  ;;  %2414 = vpow2.f32 %v774_v56  ;;  %v3390_v16 = vpop.eup %2408 }
 0x1c2   :  { %5460 = vst [vmem:[#allocation40_spill] sm:$0xff] %v3390_v16  ;;  %2416 = vpow2.f32 %v999_v14  ;;  %v1015_v50 = vmul.f32 1.442695, %v988_v15  ;;  %v3398_v55 = vpop.eup %2410  ;;  %v461_v15 = vpop.xlane.xlu0 %460 }
 0x1c3   :  { %v3392_v20 = vpop.xlane.xlu1 %1180  ;;  %5461 = vst [vmem:[#allocation41_spill] sm:$0xff] %v3398_v55  ;;  %v3406_v36 = vpop.eup %2412 }
 0x1c4   :  { %2418 = vpow2.f32 %v1015_v50  ;;  %5462 = vst [vmem:[#allocation42_spill] sm:$0xff] %v3406_v36 }
 0x1c5   :  { %2420 = vpow2.f32 %v338_v37 }
 0x1c6   :  { %2422 = vpow2.f32 %v354_v19  ;;  %v485_v37 = vpop.xlane.xlu0 %484 }
 0x1c7   :  { %v3404_v54 = vpop.xlane.xlu1 %1204  ;;  %v507_v0 = vsub.f32 %v3037_v62, %v485_v37 }
 0x1cb   :  { %v3416_v56 = vpop.xlane.xlu1 %286 }
 0x1ce   :  { %v3414_v46 = vpop.eup %2414 }
 0x1cf   :  { %5463 = vst [vmem:[#allocation43_spill] sm:$0xff] %v3414_v46  ;;  %v3422_v9 = vpop.eup %2416  ;;  %v3426_v6 = vpop.xlane.xlu1 %310 }
 0x1d0   :  { %563 = vrot.lane.b32.xlu1 %v3361_v38, %s2877_s18  ;;  %5464 = vst [vmem:[#allocation44_spill] sm:$0xff] %v3422_v9  ;;  %v331_v38 = vsub.f32 %v3055_v8, %v3426_v6 }
 0x1d1   :  { %579 = vrot.lane.b32.xlu0 %v3363_v40, %s2877_s18  ;;  %v3428_v14 = vpop.eup %2418 }
 0x1d2   :  { %5465 = vst [vmem:[#allocation45_spill] sm:$0xff] %v3428_v14  ;;  %v3432_v50 = vpop.eup %2420 }
 0x1d3   :  { %5466 = vst [vmem:[#allocation46_spill] sm:$0xff] %v3432_v50  ;;  %v464_v29 = vpop.xlane.xlu1 %463  ;;  %v372_v42 = vsel %vm269_vm1, %v3432_v50, 0.0 }
 0x1d4   :  { %804 = vrot.lane.b32.xlu1 %v3370_v44, %s2878_s19 }
 0x1d5   :  { %820 = vrot.lane.b32.xlu0 %v3372_v53, %s2878_s19 }
 0x1d7   :  { %v488_v19 = vpop.xlane.xlu1 %487 }
 0x1d8   :  { %1045 = vrot.lane.b32.xlu1 %v3379_v11, %s2879_s20 }
 0x1d9   :  { %1061 = vrot.lane.b32.xlu0 %v3383_v13, %s2879_s20 }
 0x1db   :  { %v705_v11 = vpop.xlane.xlu1 %704 }
 0x1dc   :  { %565 = vrot.lane.b32.xlu1 %v3390_v16, %s2877_s18 }
 0x1df   :  { %v729_v51 = vpop.xlane.xlu1 %728 }
 0x1e0   :  { %581 = vrot.lane.b32.xlu1 %v3398_v55, %s2877_s18 }
 0x1e4   :  { %806 = vrot.lane.b32.xlu1 %v3406_v36, %s2878_s19  ;;  %v702_v36 = vpop.xlane.xlu0 %701 }
 0x1e5   :  { %v740_v53 = vsub.f32 %v3034_v61, %v702_v36 }
 0x1e8   :  { %822 = vrot.lane.b32.xlu1 %v3414_v46, %s2878_s19  ;;  %v3436_v46 = vpop.eup %2422 }
 0x1e9   :  { %5467 = vst [vmem:[#allocation47_spill] sm:$0xff] %v3436_v46  ;;  %v396_v55 = vsel %vm269_vm1, %v3436_v46, 0.0 }
 0x1ec   :  { %1047 = vrot.lane.b32.xlu1 %v3422_v9, %s2879_s20  ;;  %v321_v9 = vsub.f32 %v3123_v48, %v3332_v24  ;;  %v535_v24 = vmul.f32 1.442695, %v507_v0 }
 0x1ee   :  { %v340_v16 = vmul.f32 1.442695, %v321_v9 }
 0x1f0   :  { %1063 = vrot.lane.b32.xlu1 %v3428_v14, %s2879_s20  ;;  %v499_v14 = vsub.f32 %v3034_v61, %v461_v15  ;;  %2424 = vpow2.f32 %v340_v16  ;;  %v946_v15 = vpop.xlane.xlu1 %945 }
 0x1f2   :  { %v519_v13 = vmul.f32 1.442695, %v499_v14 }
 0x1f4   :  { %2426 = vpow2.f32 %v519_v13 }
 0x1f5   :  { %2428 = vpow2.f32 %v356_v59  ;;  %v970_v59 = vpop.xlane.xlu1 %969 }
 0x1f6   :  { %2430 = vpow2.f32 %v535_v24 }
 0x1f8   :  { %373 = vadd.xlane.f32.xlu0 %v372_v42  ;;  %v726_v42 = vpop.xlane.xlu0 %725 }
 0x1f9   :  { %v748_v9 = vsub.f32 %v3037_v62, %v726_v42 }
 0x1fb   :  { %v776_v25 = vmul.f32 1.442695, %v748_v9 }
 0x1fc   :  { %397 = vadd.xlane.f32.xlu0 %v396_v55  ;;  %v943_v44 = vpop.xlane.xlu0 %942  ;;  %v760_v55 = vmul.f32 1.442695, %v740_v53  ;;  %v500_v53 = vsub.f32 %v3049_v7, %v464_v29  ;;  %v3468_v29 = vpop.xlane.xlu1 %1186 }
 0x1fd   :  { %v981_v14 = vsub.f32 %v3034_v61, %v943_v44  ;;  %v3449_v52 = vpop.eup %2424 }
 0x1fe   :  { %2432 = vpow2.f32 %v760_v55  ;;  %5468 = vst [vmem:[#allocation48_spill] sm:$0xff] %v3449_v52  ;;  %v375_v16 = vsel %vm269_vm1, %v3449_v52, 0.0  ;;  %v521_v24 = vmul.f32 1.442695, %v500_v53  ;;  %v508_v55 = vsub.f32 %v3055_v8, %v488_v19 }
 0x1ff   :  { %2434 = vpow2.f32 %v776_v25  ;;  %v1001_v2 = vmul.f32 1.442695, %v981_v14  ;;  %v749_v53 = vsub.f32 %v3055_v8, %v729_v51 }
 0x200   :  { %v967_v37 = vpop.xlane.xlu0 %966  ;;  %v537_v14 = vmul.f32 1.442695, %v508_v55 }
 0x201   :  { %v989_v0 = vsub.f32 %v3037_v62, %v967_v37  ;;  %v3452_v13 = vpop.eup %2426  ;;  %2436 = vpow2.f32 %v1001_v2  ;;  %v741_v37 = vsub.f32 %v3049_v7, %v705_v11  ;;  %v982_v11 = vsub.f32 %v3049_v7, %v946_v15 }
 0x202   :  { %5469 = vst [vmem:[#allocation49_spill] sm:$0xff] %v3452_v13  ;;  %v3459_v44 = vpop.eup %2428 }
 0x203   :  { %5470 = vst [vmem:[#allocation50_spill] sm:$0xff] %v3459_v44  ;;  %v1017_v36 = vmul.f32 1.442695, %v989_v0  ;;  %v3461_v42 = vpop.eup %2430  ;;  %v399_v9 = vsel %vm269_vm1, %v3459_v44, 0.0  ;;  %v3477_v0 = vpop.xlane.xlu1 %1210  ;;  %v762_v19 = vmul.f32 1.442695, %v741_v37 }
 0x204   :  { %5471 = vst [vmem:[#allocation51_spill] sm:$0xff] %v3461_v42  ;;  %v1003_v51 = vmul.f32 1.442695, %v982_v11  ;;  %v330_v11 = vsub.f32 %v3037_v62, %v3420_v3 }
 0x205   :  { %2438 = vpow2.f32 %v1017_v36  ;;  %v778_v36 = vmul.f32 1.442695, %v749_v53 }
 0x206   :  { %2440 = vpow2.f32 %v521_v24  ;;  %v3487_v24 = vpop.xlane.xlu0 %1183 }
 0x207   :  { %2442 = vpow2.f32 %v537_v14  ;;  %v3489_v55 = vpop.xlane.xlu1 %292  ;;  %v990_v14 = vsub.f32 %v3055_v8, %v970_v59 }
 0x208   :  { %2444 = vpow2.f32 %v762_v19 }
 0x209   :  { %2446 = vpow2.f32 %v778_v36  ;;  %v1019_v53 = vmul.f32 1.442695, %v990_v14 }
 0x20a   :  { %v3500_v19 = vpop.xlane.xlu0 %1207  ;;  %2448 = vpow2.f32 %v1003_v51 }
 0x20b   :  { %v3470_v25 = vpop.eup %2432  ;;  %v3502_v15 = vpop.xlane.xlu1 %316  ;;  %2450 = vpow2.f32 %v1019_v53 }
 0x20c   :  { %5472 = vst [vmem:[#allocation52_spill] sm:$0xff] %v3470_v25  ;;  %v3475_v2 = vpop.eup %2434  ;;  %v333_v46 = vsub.f32 %v3091_v32, %v3502_v15 }
 0x20d   :  { %5473 = vst [vmem:[#allocation53_spill] sm:$0xff] %v3475_v2 }
 0x212   :  { %567 = vrot.lane.b32.xlu0 %v3452_v13, %s2877_s18 }
 0x214   :  { %376 = vadd.xlane.f32.xlu1 %v375_v16  ;;  %v3482_v16 = vpop.eup %2436 }
 0x215   :  { %5474 = vst [vmem:[#allocation54_spill] sm:$0xff] %v3482_v16 }
 0x216   :  { %583 = vrot.lane.b32.xlu0 %v3461_v42, %s2877_s18 }
 0x218   :  { %400 = vadd.xlane.f32.xlu1 %v399_v9  ;;  %v3491_v9 = vpop.eup %2438 }
 0x219   :  { %5475 = vst [vmem:[#allocation55_spill] sm:$0xff] %v3491_v9  ;;  %v3496_v37 = vpop.eup %2440 }
 0x21a   :  { %808 = vrot.lane.b32.xlu0 %v3470_v25, %s2878_s19  ;;  %5476 = vst [vmem:[#allocation56_spill] sm:$0xff] %v3496_v37  ;;  %v3516_v25 = vpop.xlane.xlu1 %469 }
 0x21e   :  { %824 = vrot.lane.b32.xlu0 %v3475_v2, %s2878_s19  ;;  %v3514_v2 = vpop.xlane.xlu0 %289 }
 0x222   :  { %1049 = vrot.lane.b32.xlu0 %v3482_v16, %s2879_s20  ;;  %v3504_v16 = vpop.eup %2442  ;;  %v3524_v14 = vpop.xlane.xlu0 %313 }
 0x223   :  { %5477 = vst [vmem:[#allocation57_spill] sm:$0xff] %v3504_v16  ;;  %v3510_v59 = vpop.eup %2444 }
 0x224   :  { %5478 = vst [vmem:[#allocation58_spill] sm:$0xff] %v3510_v59  ;;  %v3520_v51 = vpop.eup %2446 }
 0x225   :  { %5479 = vst [vmem:[#allocation59_spill] sm:$0xff] %v3520_v51  ;;  %v3528_v53 = vpop.eup %2448 }
 0x226   :  { %1065 = vrot.lane.b32.xlu0 %v3491_v9, %s2879_s20  ;;  %v322_v9 = vsub.f32 %v3034_v61, %v3410_v34  ;;  %v358_v34 = vmul.f32 1.442695, %v330_v11  ;;  %5480 = vst [vmem:[#allocation60_spill] sm:$0xff] %v3528_v53  ;;  %v3532_v3 = vpop.eup %2450 }
 0x227   :  { %5481 = vst [vmem:[#allocation61_spill] sm:$0xff] %v3532_v3 }
 0x228   :  { %v342_v36 = vmul.f32 1.442695, %v322_v9  ;;  %v3526_v9 = vpop.xlane.xlu1 %493 }
 0x229   :  { %569 = vrot.lane.b32.xlu1 %v3496_v37, %s2877_s18 }
 0x22a   :  { %2452 = vpow2.f32 %v342_v36 }
 0x22b   :  { %2454 = vpow2.f32 %v358_v34 }
 0x22d   :  { %585 = vrot.lane.b32.xlu1 %v3504_v16, %s2877_s18  ;;  %v3534_v16 = vpop.xlane.xlu1 %710 }
 0x231   :  { %810 = vrot.lane.b32.xlu1 %v3510_v59, %s2878_s19  ;;  %v467_v59 = vpop.xlane.xlu0 %466 }
 0x232   :  { %v501_v40 = vsub.f32 %v3070_v17, %v467_v59 }
 0x234   :  { %v523_v4 = vmul.f32 1.442695, %v501_v40 }
 0x235   :  { %826 = vrot.lane.b32.xlu1 %v3520_v51, %s2878_s19  ;;  %v491_v11 = vpop.xlane.xlu0 %490  ;;  %v3540_v51 = vpop.xlane.xlu1 %734 }
 0x236   :  { %v509_v1 = vsub.f32 %v3073_v18, %v491_v11 }
 0x237   :  { %v3538_v36 = vpop.eup %2452 }
 0x238   :  { %5482 = vst [vmem:[#allocation62_spill] sm:$0xff] %v3538_v36  ;;  %v378_v42 = vsel %vm269_vm1, %v3538_v36, 0.0  ;;  %v3544_v34 = vpop.eup %2454  ;;  %v539_v58 = vmul.f32 1.442695, %v509_v1  ;;  %v325_v36 = vsub.f32 %v3085_v31, %v3489_v55 }
 0x239   :  { %1051 = vrot.lane.b32.xlu1 %v3528_v53, %s2879_s20  ;;  %5483 = vst [vmem:[#allocation63_spill] sm:$0xff] %v3544_v34  ;;  %v323_v53 = vsub.f32 %v3049_v7, %v3416_v56  ;;  %v708_v37 = vpop.xlane.xlu0 %707  ;;  %v3548_v13 = vpop.xlane.xlu1 %951  ;;  %v360_v56 = vmul.f32 1.442695, %v331_v38 }
 0x23a   :  { %v742_v22 = vsub.f32 %v3070_v17, %v708_v37 }
 0x23b   :  { %v344_v45 = vmul.f32 1.442695, %v323_v53 }
 0x23c   :  { %v764_v53 = vmul.f32 1.442695, %v742_v22  ;;  %v502_v22 = vsub.f32 %v3085_v31, %v3516_v25  ;;  %v510_v25 = vsub.f32 %v3091_v32, %v3526_v9 }
 0x23d   :  { %1067 = vrot.lane.b32.xlu1 %v3532_v3, %s2879_s20  ;;  %v402_v3 = vsel %vm269_vm1, %v3544_v34, 0.0  ;;  %v3556_v60 = vpop.xlane.xlu1 %975  ;;  %2456 = vpow2.f32 %v344_v45 }
 0x23e   :  { %2458 = vpow2.f32 %v523_v4 }
 0x23f   :  { %2460 = vpow2.f32 %v360_v56 }
 0x240   :  { %2462 = vpow2.f32 %v539_v58 }
 0x241   :  { %v3559_v59 = vpop.xlane.xlu1 %1192  ;;  %2464 = vpow2.f32 %v764_v53 }
 0x245   :  { %379 = vadd.xlane.f32.xlu0 %v378_v42  ;;  %v732_v42 = vpop.xlane.xlu0 %731  ;;  %v3563_v49 = vpop.permute.xlu1 %561 }
 0x246   :  { %v750_v6 = vsub.f32 %v3073_v18, %v732_v42 }
 0x248   :  { %v780_v40 = vmul.f32 1.442695, %v750_v6  ;;  %v525_v6 = vmul.f32 1.442695, %v502_v22 }
 0x249   :  { %403 = vadd.xlane.f32.xlu0 %v402_v3  ;;  %v949_v34 = vpop.xlane.xlu0 %948  ;;  %v3574_v58 = vpop.permute.xlu1 %577 }
 0x24a   :  { %v983_v3 = vsub.f32 %v3070_v17, %v949_v34  ;;  %v3565_v45 = vpop.eup %2456  ;;  %2466 = vpow2.f32 %v780_v40 }
 0x24b   :  { %5484 = vst [vmem:[#allocation64_spill] sm:$0xff] %v3565_v45  ;;  %v3568_v38 = vpop.eup %2458  ;;  %v381_v37 = vsel %vm269_vm1, %v3565_v45, 0.0 }
 0x24c   :  { %v1005_v1 = vmul.f32 1.442695, %v983_v3  ;;  %5485 = vst [vmem:[#allocation65_spill] sm:$0xff] %v3568_v38  ;;  %v3578_v34 = vpop.eup %2460 }
 0x24d   :  { %v973_v11 = vpop.xlane.xlu0 %972  ;;  %5486 = vst [vmem:[#allocation66_spill] sm:$0xff] %v3578_v34  ;;  %v3580_v56 = vpop.eup %2462  ;;  %v405_v40 = vsel %vm269_vm1, %v3578_v34, 0.0 }
 0x24e   :  { %v991_v4 = vsub.f32 %v3073_v18, %v973_v11  ;;  %2468 = vpow2.f32 %v1005_v1  ;;  %5487 = vst [vmem:[#allocation67_spill] sm:$0xff] %v3580_v56  ;;  %v3590_v3 = vpop.eup %2464  ;;  %v3592_v11 = vpop.permute.xlu1 %802  ;;  %v541_v1 = vmul.f32 1.442695, %v510_v25  ;;  %v984_v25 = vsub.f32 %v3085_v31, %v3548_v13 }
 0x24f   :  { %5488 = vst [vmem:[#allocation68_spill] sm:$0xff] %v3590_v3 }
 0x250   :  { %v1021_v42 = vmul.f32 1.442695, %v991_v4  ;;  %v743_v4 = vsub.f32 %v3085_v31, %v3534_v16 }
 0x251   :  { %v3582_v53 = vpop.xlane.xlu0 %1189 }
 0x252   :  { %2470 = vpow2.f32 %v1021_v42  ;;  %v766_v9 = vmul.f32 1.442695, %v743_v4  ;;  %v751_v42 = vsub.f32 %v3091_v32, %v3540_v51  ;;  %v1007_v51 = vmul.f32 1.442695, %v984_v25 }
 0x253   :  { %2472 = vpow2.f32 %v525_v6  ;;  %v992_v4 = vsub.f32 %v3091_v32, %v3556_v60 }
 0x254   :  { %2474 = vpow2.f32 %v541_v1  ;;  %v782_v16 = vmul.f32 1.442695, %v751_v42 }
 0x255   :  { %v560_v22 = vpop.permute.xlu0 %559  ;;  %2476 = vpow2.f32 %v766_v9  ;;  %v1023_v13 = vmul.f32 1.442695, %v992_v4 }
 0x256   :  { %2478 = vpow2.f32 %v782_v16  ;;  %v607_v50 = vsel %vm269_vm1, %v560_v22, 0.0 }
 0x257   :  { %2480 = vpow2.f32 %v1007_v51  ;;  %v332_v51 = vsub.f32 %v3073_v18, %v3524_v14 }
 0x258   :  { %2482 = vpow2.f32 %v1023_v13 }
 0x259   :  { %v576_v6 = vpop.permute.xlu0 %575 }
 0x25a   :  { %v631_v30 = vsel %vm269_vm1, %v576_v6, 0.0 }
 0x25f   :  { %571 = vrot.lane.b32.xlu0 %v3568_v38, %s2877_s18 }
 0x261   :  { %382 = vadd.xlane.f32.xlu1 %v381_v37  ;;  %v3598_v37 = vpop.eup %2466 }
 0x262   :  { %5489 = vst [vmem:[#allocation69_spill] sm:$0xff] %v3598_v37 }
 0x263   :  { %587 = vrot.lane.b32.xlu0 %v3580_v56, %s2877_s18  ;;  %v3606_v56 = vpop.eup %2468 }
 0x264   :  { %5490 = vst [vmem:[#allocation70_spill] sm:$0xff] %v3606_v56 }
 0x265   :  { %406 = vadd.xlane.f32.xlu1 %v405_v40  ;;  %v3604_v40 = vpop.permute.xlu1 %818 }
 0x267   :  { %812 = vrot.lane.b32.xlu0 %v3590_v3, %s2878_s19  ;;  %v3612_v3 = vpop.eup %2470 }
 0x268   :  { %5491 = vst [vmem:[#allocation71_spill] sm:$0xff] %v3612_v3  ;;  %v3620_v38 = vpop.eup %2472 }
 0x269   :  { %v3614_v1 = vpop.permute.xlu1 %1043  ;;  %5492 = vst [vmem:[#allocation72_spill] sm:$0xff] %v3620_v38  ;;  %v3626_v42 = vpop.eup %2474 }
 0x26a   :  { %5493 = vst [vmem:[#allocation73_spill] sm:$0xff] %v3626_v42  ;;  %v3634_v25 = vpop.eup %2476 }
 0x26b   :  { %828 = vrot.lane.b32.xlu0 %v3598_v37, %s2878_s19  ;;  %v801_v37 = vpop.permute.xlu0 %800  ;;  %5494 = vst [vmem:[#allocation74_spill] sm:$0xff] %v3634_v25 }
 0x26d   :  { %v3624_v9 = vpop.permute.xlu1 %1059 }
 0x26f   :  { %1053 = vrot.lane.b32.xlu0 %v3606_v56, %s2879_s20  ;;  %v817_v16 = vpop.permute.xlu0 %816 }
 0x271   :  { %v3632_v60 = vpop.xlane.xlu1 %370 }
 0x273   :  { %1069 = vrot.lane.b32.xlu0 %v3612_v3, %s2879_s20  ;;  %v324_v3 = vsub.f32 %v3070_v17, %v3514_v2  ;;  %v1042_v4 = vpop.permute.xlu0 %1041  ;;  %v362_v2 = vmul.f32 1.442695, %v332_v51 }
 0x275   :  { %v346_v56 = vmul.f32 1.442695, %v324_v3  ;;  %v3642_v34 = vpop.xlane.xlu1 %394 }
 0x276   :  { %573 = vrot.lane.b32.xlu1 %v3620_v38, %s2877_s18  ;;  %v3640_v38 = vpop.eup %2478 }
 0x277   :  { %5495 = vst [vmem:[#allocation75_spill] sm:$0xff] %v3640_v38  ;;  %2484 = vpow2.f32 %v346_v56  ;;  %v3646_v13 = vpop.eup %2480  ;;  %v1058_v3 = vpop.permute.xlu0 %1057 }
 0x278   :  { %5496 = vst [vmem:[#allocation76_spill] sm:$0xff] %v3646_v13  ;;  %2486 = vpow2.f32 %v362_v2 }
 0x279   :  { %v564_v14 = vpop.permute.xlu1 %563 }
 0x27a   :  { %589 = vrot.lane.b32.xlu1 %v3626_v42, %s2877_s18  ;;  %v3650_v42 = vpop.eup %2482 }
 0x27b   :  { %5497 = vst [vmem:[#allocation77_spill] sm:$0xff] %v3650_v42 }
 0x27d   :  { %v805_v51 = vpop.permute.xlu1 %804 }
 0x27e   :  { %814 = vrot.lane.b32.xlu1 %v3634_v25, %s2878_s19  ;;  %v3652_v25 = vpop.xlane.xlu0 %367 }
 0x282   :  { %830 = vrot.lane.b32.xlu1 %v3640_v38, %s2878_s19  ;;  %v3658_v45 = vpop.xlane.xlu0 %391 }
 0x284   :  { %v3656_v56 = vpop.eup %2484 }
 0x285   :  { %5498 = vst [vmem:[#allocation78_spill] sm:$0xff] %v3656_v56  ;;  %v384_v2 = vsel %vm269_vm1, %v3656_v56, 0.0  ;;  %v3662_v38 = vpop.eup %2486 }
 0x286   :  { %1055 = vrot.lane.b32.xlu1 %v3646_v13, %s2879_s20  ;;  %5499 = vst [vmem:[#allocation79_spill] sm:$0xff] %v3662_v38  ;;  %v1046_v13 = vpop.permute.xlu1 %1045  ;;  %v408_v44 = vsel %vm269_vm1, %v3662_v38, 0.0  ;;  %v580_v52 = vpop.permute.xlu0 %579  ;;  %v848_v38 = vsel %vm269_vm1, %v801_v37, 0.0  ;;  %v1113_v37 = vsel %vm269_vm1, %v1058_v3, 0.0 }
 0x28a   :  { %1071 = vrot.lane.b32.xlu1 %v3650_v42, %s2879_s20  ;;  %v348_v42 = vmul.f32 1.442695, %v325_v36  ;;  %v566_v41 = vpop.permute.xlu1 %565  ;;  %v821_v56 = vpop.permute.xlu0 %820 }
 0x28c   :  { %2488 = vpow2.f32 %v348_v42 }
 0x28e   :  { %v582_v55 = vpop.permute.xlu1 %581  ;;  %v1062_v33 = vpop.permute.xlu0 %1061 }
 0x292   :  { %385 = vadd.xlane.f32.xlu0 %v384_v2  ;;  %v364_v2 = vmul.f32 1.442695, %v333_v46  ;;  %v807_v36 = vpop.permute.xlu1 %806  ;;  %v3674_v15 = vpop.xlane.xlu0 %373 }
 0x294   :  { %2490 = vpow2.f32 %v364_v2 }
 0x296   :  { %409 = vadd.xlane.f32.xlu0 %v408_v44  ;;  %v872_v44 = vsel %vm269_vm1, %v817_v16, 0.0  ;;  %v823_v46 = vpop.permute.xlu1 %822  ;;  %v3679_v6 = vpop.xlane.xlu0 %397  ;;  %v613_v16 = vsel %vm269_vm1, %v564_v14, 0.0 }
 0x299   :  { %v3677_v22 = vpop.eup %2488 }
 0x29a   :  { %608 = vadd.xlane.f32.xlu0 %v607_v50  ;;  %v1089_v50 = vsel %vm269_vm1, %v1042_v4, 0.0  ;;  %5500 = vst [vmem:[#allocation80_spill] sm:$0xff] %v3677_v22  ;;  %v1048_v4 = vpop.permute.xlu1 %1047  ;;  %v568_v2 = vpop.permute.xlu0 %567 }
 0x29e   :  { %632 = vadd.xlane.f32.xlu0 %v631_v30  ;;  %v387_v30 = vsel %vm269_vm1, %v3677_v22, 0.0  ;;  %v1064_v3 = vpop.permute.xlu1 %1063  ;;  %v584_v22 = vpop.permute.xlu0 %583 }
 0x2a2   :  { %849 = vadd.xlane.f32.xlu0 %v848_v38  ;;  %v3684_v38 = vpop.eup %2490  ;;  %v3695_v14 = vpop.xlane.xlu1 %376 }
 0x2a3   :  { %5501 = vst [vmem:[#allocation81_spill] sm:$0xff] %v3684_v38  ;;  %v411_v42 = vsel %vm269_vm1, %v3684_v38, 0.0 }
 0x2a6   :  { %873 = vadd.xlane.f32.xlu0 %v872_v44  ;;  %v610_v44 = vsel %vm269_vm1, %v3563_v49, 0.0  ;;  %v878_v49 = vsel %vm269_vm1, %v821_v56, 0.0 }
 0x2aa   :  { %1090 = vadd.xlane.f32.xlu0 %v1089_v50  ;;  %v637_v50 = vsel %vm269_vm1, %v580_v52, 0.0  ;;  %v875_v52 = vsel %vm269_vm1, %v3604_v40, 0.0  ;;  %v616_v40 = vsel %vm269_vm1, %v566_v41, 0.0  ;;  %v1122_v41 = vsel %vm269_vm1, %v1064_v3, 0.0 }
 0x2ae   :  { %388 = vadd.xlane.f32.xlu1 %v387_v30  ;;  %1114 = vadd.xlane.f32.xlu0 %v1113_v37  ;;  %v634_v30 = vsel %vm269_vm1, %v3574_v58, 0.0  ;;  %v854_v37 = vsel %vm269_vm1, %v805_v51, 0.0  ;;  %v3703_v58 = vpop.xlane.xlu1 %400 }
 0x2b2   :  { %412 = vadd.xlane.f32.xlu1 %v411_v42  ;;  %614 = vadd.xlane.f32.xlu0 %v613_v16  ;;  %v851_v42 = vsel %vm269_vm1, %v3592_v11, 0.0  ;;  %v809_v16 = vpop.permute.xlu0 %808  ;;  %v1119_v11 = vsel %vm269_vm1, %v1062_v33, 0.0  ;;  %v570_v56 = vpop.permute.xlu1 %569  ;;  %v881_v33 = vsel %vm269_vm1, %v823_v46, 0.0 }
 0x2b6   :  { %611 = vadd.xlane.f32.xlu1 %v610_v44  ;;  %638 = vadd.xlane.f32.xlu0 %v637_v50  ;;  %v1095_v44 = vsel %vm269_vm1, %v1046_v13, 0.0  ;;  %v825_v51 = vpop.permute.xlu0 %824  ;;  %v1092_v50 = vsel %vm269_vm1, %v3614_v1, 0.0  ;;  %v640_v13 = vsel %vm269_vm1, %v582_v55, 0.0  ;;  %v622_v55 = vsel %vm269_vm1, %v570_v56, 0.0 }
 0x2ba   :  { %635 = vadd.xlane.f32.xlu1 %v634_v30  ;;  %855 = vadd.xlane.f32.xlu0 %v854_v37  ;;  %v1116_v30 = vsel %vm269_vm1, %v3624_v9, 0.0  ;;  %v1050_v37 = vpop.permute.xlu0 %1049 }
 0x2bb   :  { %v1101_v56 = vsel %vm269_vm1, %v1050_v37, 0.0  ;;  %v1215_v37 = vsel %vm1169_vm5, %v3091_v32, -inf }
 0x2be   :  { %852 = vadd.xlane.f32.xlu1 %v851_v42  ;;  %879 = vadd.xlane.f32.xlu0 %v878_v49  ;;  %v857_v42 = vsel %vm269_vm1, %v807_v36, 0.0  ;;  %v586_v49 = vpop.permute.xlu1 %585  ;;  %v1066_v1 = vpop.permute.xlu0 %1065  ;;  %v643_v36 = vsel %vm269_vm1, %v584_v22, 0.0 }
 0x2bf   :  { %v646_v46 = vsel %vm269_vm1, %v586_v49, 0.0  ;;  %v1125_v49 = vsel %vm269_vm1, %v1066_v1, 0.0 }
 0x2c2   :  { %876 = vadd.xlane.f32.xlu1 %v875_v52  ;;  %1096 = vadd.xlane.f32.xlu0 %v1095_v44  ;;  %v1098_v52 = vsel %vm269_vm1, %v1048_v4, 0.0  ;;  %v811_v9 = vpop.permute.xlu1 %810  ;;  %v860_v4 = vsel %vm269_vm1, %v809_v16, 0.0 }
 0x2c6   :  { %1093 = vadd.xlane.f32.xlu1 %v1092_v50  ;;  %1120 = vadd.xlane.f32.xlu0 %v1119_v11  ;;  %v619_v50 = vsel %vm269_vm1, %v568_v2, 0.0  ;;  %v827_v11 = vpop.permute.xlu1 %826  ;;  %v863_v2 = vsel %vm269_vm1, %v811_v9, 0.0 }
 0x2c7   :  { %v887_v22 = vsel %vm269_vm1, %v827_v11, 0.0 }
 0x2ca   :  { %1117 = vadd.xlane.f32.xlu1 %v1116_v30  ;;  %617 = vadd.xlane.f32.xlu0 %v616_v40  ;;  %v1052_v3 = vpop.permute.xlu1 %1051 }
 0x2cb   :  { %v1104_v16 = vsel %vm269_vm1, %v1052_v3, 0.0 }
 0x2ce   :  { %641 = vadd.xlane.f32.xlu1 %v640_v13  ;;  %858 = vadd.xlane.f32.xlu0 %v857_v42  ;;  %v3715_v44 = vpop.xlane.xlu0 %379  ;;  %v884_v13 = vsel %vm269_vm1, %v825_v51, 0.0  ;;  %v1068_v42 = vpop.permute.xlu1 %1067 }
 0x2cf   :  { %v1128_v51 = vsel %vm269_vm1, %v1068_v42, 0.0 }
 0x2d2   :  { %882 = vadd.xlane.f32.xlu1 %v881_v33  ;;  %1099 = vadd.xlane.f32.xlu0 %v1098_v52  ;;  %v3721_v30 = vpop.xlane.xlu0 %403 }
 0x2d6   :  { %1123 = vadd.xlane.f32.xlu1 %v1122_v41  ;;  %620 = vadd.xlane.f32.xlu0 %v619_v50  ;;  %v572_v40 = vpop.permute.xlu0 %571 }
 0x2d7   :  { %v625_v41 = vsel %vm269_vm1, %v572_v40, 0.0 }
 0x2da   :  { %623 = vadd.xlane.f32.xlu1 %v622_v55  ;;  %644 = vadd.xlane.f32.xlu0 %v643_v36  ;;  %v588_v33 = vpop.permute.xlu0 %587 }
 0x2db   :  { %v649_v55 = vsel %vm269_vm1, %v588_v33, 0.0 }
 0x2de   :  { %647 = vadd.xlane.f32.xlu1 %v646_v46  ;;  %861 = vadd.xlane.f32.xlu0 %v860_v4  ;;  %v813_v9 = vpop.permute.xlu0 %812 }
 0x2df   :  { %v866_v46 = vsel %vm269_vm1, %v813_v9, 0.0 }
 0x2e2   :  { %864 = vadd.xlane.f32.xlu1 %v863_v2  ;;  %885 = vadd.xlane.f32.xlu0 %v884_v13  ;;  %v829_v36 = vpop.permute.xlu0 %828 }
 0x2e3   :  { %v890_v2 = vsel %vm269_vm1, %v829_v36, 0.0 }
 0x2e6   :  { %888 = vadd.xlane.f32.xlu1 %v887_v22  ;;  %1102 = vadd.xlane.f32.xlu0 %v1101_v56  ;;  %v1054_v3 = vpop.permute.xlu0 %1053 }
 0x2e7   :  { %v1107_v56 = vsel %vm269_vm1, %v1054_v3, 0.0 }
 0x2ea   :  { %1105 = vadd.xlane.f32.xlu1 %v1104_v16  ;;  %v3731_v52 = vpop.xlane.xlu1 %382  ;;  %1126 = vadd.xlane.f32.xlu0 %v1125_v49  ;;  %v1070_v42 = vpop.permute.xlu0 %1069 }
 0x2eb   :  { %v1131_v49 = vsel %vm269_vm1, %v1070_v42, 0.0 }
 0x2ee   :  { %1129 = vadd.xlane.f32.xlu1 %v1128_v51  ;;  %v3735_v50 = vpop.xlane.xlu1 %406  ;;  %626 = vadd.xlane.f32.xlu0 %v625_v41  ;;  %v1219_v51 = vsub.f32 %v2989_v39, %v3317_v5  ;;  %v1222_v5 = vsub.f32 %v3034_v61, %v3487_v24 }
 0x2f2   :  { %1216 = vmax.xlane.f32.xlu1 %v1215_v37  ;;  %v574_v1 = vpop.permute.xlu1 %573  ;;  %650 = vadd.xlane.f32.xlu0 %v649_v55  ;;  %v1212_v37 = vsel %vm1169_vm5, %v3073_v18, -inf  ;;  %v1218_v55 = vsub.f32 %v2968_v26, %v3283_v57  ;;  %v1242_v57 = vmul.f32 1.442695, %v1222_v5 }
 0x2f3   :  { %v628_v11 = vsel %vm269_vm1, %v574_v1, 0.0  ;;  %v1236_v1 = vmul.f32 1.442695, %v1219_v51 }
 0x2f5   :  { %2492 = vpow2.f32 %v1236_v1 }
 0x2f6   :  { %629 = vadd.xlane.f32.xlu1 %v628_v11  ;;  %v590_v4 = vpop.permute.xlu1 %589  ;;  %867 = vadd.xlane.f32.xlu0 %v866_v46  ;;  %v1220_v11 = vsub.f32 %v3111_v23, %v3381_v12  ;;  %v1223_v12 = vsub.f32 %v3049_v7, %v3468_v29 }
 0x2f7   :  { %v652_v40 = vsel %vm269_vm1, %v590_v4, 0.0  ;;  %v1234_v4 = vmul.f32 1.442695, %v1218_v55 }
 0x2f8   :  { %v1238_v3 = vmul.f32 1.442695, %v1220_v11 }
 0x2f9   :  { %2494 = vpow2.f32 %v1234_v4 }
 0x2fa   :  { %653 = vadd.xlane.f32.xlu1 %v652_v40  ;;  %v815_v13 = vpop.permute.xlu1 %814  ;;  %891 = vadd.xlane.f32.xlu0 %v890_v2  ;;  %v1221_v40 = vsub.f32 %v3123_v48, %v3392_v20  ;;  %v1224_v2 = vsub.f32 %v3070_v17, %v3582_v53  ;;  %2496 = vpow2.f32 %v1238_v3  ;;  %v1225_v20 = vsub.f32 %v3085_v31, %v3559_v59 }
 0x2fb   :  { %v869_v22 = vsel %vm269_vm1, %v815_v13, 0.0  ;;  %2498 = vpow2.f32 %v1242_v57  ;;  %v1227_v53 = vsub.f32 %v2984_v35, %v3323_v10  ;;  %v1229_v59 = vsub.f32 %v3135_v43, %v3404_v54 }
 0x2fc   :  { %v1240_v13 = vmul.f32 1.442695, %v1221_v40  ;;  %v1246_v24 = vmul.f32 1.442695, %v1224_v2  ;;  %v1248_v29 = vmul.f32 1.442695, %v1225_v20  ;;  %v1231_v54 = vsub.f32 %v3055_v8, %v3477_v0 }
 0x2fd   :  { %v1252_v10 = vmul.f32 1.442695, %v1227_v53  ;;  %v1256_v55 = vmul.f32 1.442695, %v1229_v59 }
 0x2fe   :  { %870 = vadd.xlane.f32.xlu1 %v869_v22  ;;  %v831_v33 = vpop.permute.xlu1 %830  ;;  %1108 = vadd.xlane.f32.xlu0 %v1107_v56  ;;  %v1226_v22 = vsub.f32 %v2971_v27, %v3297_v63  ;;  %2500 = vpow2.f32 %v1240_v13  ;;  %v1244_v56 = vmul.f32 1.442695, %v1223_v12 }
 0x2ff   :  { %v893_v16 = vsel %vm269_vm1, %v831_v33, 0.0  ;;  %v1228_v33 = vsub.f32 %v3119_v47, %v3396_v21  ;;  %2502 = vpow2.f32 %v1246_v24 }
 0x300   :  { %v1250_v42 = vmul.f32 1.442695, %v1226_v22  ;;  %2504 = vpow2.f32 %v1244_v56 }
 0x301   :  { %v1254_v63 = vmul.f32 1.442695, %v1228_v33 }
 0x302   :  { %894 = vadd.xlane.f32.xlu1 %v893_v16  ;;  %v1056_v9 = vpop.permute.xlu1 %1055  ;;  %1132 = vadd.xlane.f32.xlu0 %v1131_v49  ;;  %v3774_v16 = vpop.eup %2492  ;;  %2506 = vpow2.f32 %v1250_v42  ;;  %v1230_v49 = vsub.f32 %v3037_v62, %v3500_v19 }
 0x303   :  { %v1110_v41 = vsel %vm269_vm1, %v1056_v9, 0.0  ;;  %5502 = vst [vmem:[#allocation82_spill] sm:$0xff] %v3774_v16  ;;  %2508 = vpow2.f32 %v1248_v29 }
 0x304   :  { %2510 = vpow2.f32 %v1254_v63  ;;  %v1258_v19 = vmul.f32 1.442695, %v1230_v49 }
 0x305   :  { %2512 = vpow2.f32 %v1252_v10 }
 0x306   :  { %1111 = vadd.xlane.f32.xlu1 %v1110_v41  ;;  %v1072_v36 = vpop.permute.xlu1 %1071  ;;  %1213 = vmax.xlane.f32.xlu0 %v1212_v37  ;;  %v3778_v9 = vpop.eup %2494  ;;  %2514 = vpow2.f32 %v1258_v19 }
 0x307   :  { %v1134_v46 = vsel %vm269_vm1, %v1072_v36, 0.0  ;;  %5503 = vst [vmem:[#allocation83_spill] sm:$0xff] %v3778_v9  ;;  %v3788_v51 = vpop.eup %2496  ;;  %2516 = vpow2.f32 %v1256_v55 }
 0x308   :  { %5504 = vst [vmem:[#allocation84_spill] sm:$0xff] %v3788_v51  ;;  %v3790_v41 = vpop.eup %2498 }
 0x309   :  { %5505 = vst [vmem:[#allocation85_spill] sm:$0xff] %v3790_v41 }
 0x30a   :  { %1135 = vadd.xlane.f32.xlu1 %v1134_v46  ;;  %v1260_v46 = vmul.f32 1.442695, %v1231_v54 }
 0x30b   :  { %v3800_v36 = vpop.eup %2500 }
 0x30c   :  { %5506 = vst [vmem:[#allocation86_spill] sm:$0xff] %v3800_v36  ;;  %v3802_v1 = vpop.eup %2502  ;;  %2518 = vpow2.f32 %v1260_v46 }
 0x30d   :  { %5507 = vst [vmem:[#allocation87_spill] sm:$0xff] %v3802_v1  ;;  %v3810_v4 = vpop.eup %2504 }
 0x30e   :  { %5508 = vst [vmem:[#allocation88_spill] sm:$0xff] %v3810_v4 }
 0x30f   :  { %v3812_v5 = vpop.eup %2506 }
 0x310   :  { %5509 = vst [vmem:[#allocation89_spill] sm:$0xff] %v3812_v5  ;;  %v3820_v3 = vpop.eup %2508 }
 0x311   :  { %5510 = vst [vmem:[#allocation90_spill] sm:$0xff] %v3820_v3  ;;  %v3822_v40 = vpop.eup %2510 }
 0x312   :  { %5511 = vst [vmem:[#allocation91_spill] sm:$0xff] %v3822_v40  ;;  %v3830_v2 = vpop.eup %2512 }
 0x313   :  { %5512 = vst [vmem:[#allocation92_spill] sm:$0xff] %v3830_v2  ;;  %v3832_v13 = vpop.eup %2514 }
 0x314   :  { %5513 = vst [vmem:[#allocation93_spill] sm:$0xff] %v3832_v13  ;;  %v3840_v22 = vpop.eup %2516 }
 0x315   :  { %5514 = vst [vmem:[#allocation94_spill] sm:$0xff] %v3840_v22 }
 0x319   :  { %v3846_v56 = vpop.eup %2518 }
 0x31a   :  { %5515 = vst [vmem:[#allocation95_spill] sm:$0xff] %v3846_v56 }
 0x31b   :  { %1284 = vrot.lane.b32.xlu1 %v3774_v16, %s2880_s21  ;;  %v3782_v21 = vpop.xlane.xlu0 %385 }
 0x31c   :  { %1282 = vrot.lane.b32.xlu0 %v3778_v9, %s2880_s21 }
 0x31f   :  { %1286 = vrot.lane.b32.xlu1 %v3788_v51, %s2880_s21  ;;  %v3794_v37 = vpop.xlane.xlu0 %409 }
 0x320   :  { %1290 = vrot.lane.b32.xlu0 %v3790_v41, %s2880_s21 }
 0x323   :  { %1288 = vrot.lane.b32.xlu1 %v3800_v36, %s2880_s21  ;;  %v3806_v11 = vpop.xlane.xlu0 %608 }
 0x324   :  { %1294 = vrot.lane.b32.xlu0 %v3802_v1, %s2880_s21 }
 0x327   :  { %1292 = vrot.lane.b32.xlu1 %v3810_v4, %s2880_s21  ;;  %v3816_v0 = vpop.xlane.xlu0 %632 }
 0x328   :  { %1298 = vrot.lane.b32.xlu0 %v3812_v5, %s2880_s21 }
 0x32b   :  { %1296 = vrot.lane.b32.xlu1 %v3820_v3, %s2880_s21  ;;  %v3826_v57 = vpop.xlane.xlu0 %849 }
 0x32c   :  { %1302 = vrot.lane.b32.xlu0 %v3822_v40, %s2880_s21 }
 0x32f   :  { %1300 = vrot.lane.b32.xlu1 %v3830_v2, %s2880_s21  ;;  %v3836_v12 = vpop.xlane.xlu0 %873 }
 0x330   :  { %1306 = vrot.lane.b32.xlu0 %v3832_v13, %s2880_s21 }
 0x333   :  { %1304 = vrot.lane.b32.xlu1 %v3840_v22, %s2880_s21  ;;  %v3844_v24 = vpop.xlane.xlu0 %1090 }
 0x337   :  { %v3848_v20 = vpop.xlane.xlu1 %388  ;;  %1308 = vrot.lane.b32.xlu1 %v3846_v56, %s2880_s21  ;;  %v3852_v42 = vpop.xlane.xlu0 %1114 }
 0x33b   :  { %v3854_v33 = vpop.xlane.xlu1 %412  ;;  %v3856_v53 = vpop.xlane.xlu0 %614 }
 0x33f   :  { %v3858_v29 = vpop.xlane.xlu1 %611  ;;  %v3860_v63 = vpop.xlane.xlu0 %638 }
 0x343   :  { %v3862_v49 = vpop.xlane.xlu1 %635  ;;  %v3864_v10 = vpop.xlane.xlu0 %855 }
 0x347   :  { %v3866_v59 = vpop.xlane.xlu1 %852  ;;  %v3868_v19 = vpop.xlane.xlu0 %879 }
 0x34b   :  { %v3870_v55 = vpop.xlane.xlu1 %876  ;;  %v3872_v54 = vpop.xlane.xlu0 %1096 }
 0x34f   :  { %v3874_v46 = vpop.xlane.xlu1 %1093  ;;  %v3876_v13 = vpop.xlane.xlu0 %1120 }
 0x350   :  { %5516 = vst [vmem:[#allocation96_spill] sm:$0xff] %v3874_v46  ;;  %5517 = vst [vmem:[#allocation97_spill] sm:$0xff] %v3876_v13 }
 0x353   :  { %v3878_v40 = vpop.xlane.xlu1 %1117  ;;  %v3880_v5 = vpop.xlane.xlu0 %617 }
 0x354   :  { %5518 = vst [vmem:[#allocation98_spill] sm:$0xff] %v3878_v40  ;;  %5519 = vst [vmem:[#allocation99_spill] sm:$0xff] %v3880_v5 }
 0x357   :  { %v3882_v1 = vpop.xlane.xlu1 %641  ;;  %v3884_v41 = vpop.xlane.xlu0 %858 }
 0x358   :  { %5520 = vst [vmem:[#allocation100_spill] sm:$0xff] %v3882_v1  ;;  %5521 = vst [vmem:[#allocation101_spill] sm:$0xff] %v3884_v41 }
 0x35b   :  { %v3886_v36 = vpop.xlane.xlu1 %882  ;;  %v3888_v56 = vpop.xlane.xlu0 %1099 }
 0x35c   :  { %5522 = vst [vmem:[#allocation102_spill] sm:$0xff] %v3886_v36  ;;  %5523 = vst [vmem:[#allocation103_spill] sm:$0xff] %v3888_v56 }
 0x35f   :  { %v3890_v51 = vpop.xlane.xlu1 %1123  ;;  %v3892_v22 = vpop.xlane.xlu0 %620 }
 0x360   :  { %5524 = vst [vmem:[#allocation104_spill] sm:$0xff] %v3890_v51  ;;  %5525 = vst [vmem:[#allocation105_spill] sm:$0xff] %v3892_v22 }
 0x363   :  { %v3894_v9 = vpop.xlane.xlu1 %623  ;;  %v3896_v2 = vpop.xlane.xlu0 %644 }
 0x364   :  { %5526 = vst [vmem:[#allocation106_spill] sm:$0xff] %v3894_v9  ;;  %5527 = vst [vmem:[#allocation107_spill] sm:$0xff] %v3896_v2 }
 0x367   :  { %v3898_v3 = vpop.xlane.xlu1 %647  ;;  %v3900_v4 = vpop.xlane.xlu0 %861 }
 0x368   :  { %5528 = vst [vmem:[#allocation108_spill] sm:$0xff] %v3898_v3  ;;  %5529 = vst [vmem:[#allocation109_spill] sm:$0xff] %v3900_v4 }
 0x36b   :  { %v3902_v16 = vpop.xlane.xlu1 %864  ;;  %v3904_v38 = vpop.xlane.xlu0 %885 }
 0x36c   :  { %5530 = vst [vmem:[#allocation110_spill] sm:$0xff] %v3902_v16  ;;  %5531 = vst [vmem:[#allocation111_spill] sm:$0xff] %v3904_v38 }
 0x36f   :  { %v3906_v28 = vpop.xlane.xlu1 %888  ;;  %v3908_v36 = vpop.xlane.xlu0 %1102 }
 0x370   :  { %5532 = vst [vmem:[#allocation112_spill] sm:$0xff] %v3906_v28  ;;  %5533 = vst [vmem:[#allocation113_spill] sm:$0xff] %v3908_v36 }
 0x373   :  { %v3910_v56 = vpop.xlane.xlu1 %1105  ;;  %v3912_v51 = vpop.xlane.xlu0 %1126 }
 0x374   :  { %5534 = vst [vmem:[#allocation114_spill] sm:$0xff] %v3910_v56  ;;  %5535 = vst [vmem:[#allocation115_spill] sm:$0xff] %v3912_v51 }
 0x377   :  { %v3914_v22 = vpop.xlane.xlu1 %1129  ;;  %v3916_v9 = vpop.xlane.xlu0 %626 }
 0x378   :  { %5536 = vst [vmem:[#allocation116_spill] sm:$0xff] %v3914_v22  ;;  %5537 = vst [vmem:[#allocation117_spill] sm:$0xff] %v3916_v9 }
 0x37b   :  { %v1217_v2 = vpop.xlane.xlu1 %1216  ;;  %v3918_v3 = vpop.xlane.xlu0 %650 }
 0x37c   :  { %5538 = vst [vmem:[#allocation118_spill] sm:$0xff] %v3918_v3  ;;  %v1233_v4 = vsub.f32 %v3091_v32, %v1217_v2 }
 0x37e   :  { %v1264_v16 = vmul.f32 1.442695, %v1233_v4 }
 0x37f   :  { %v3921_v41 = vpop.xlane.xlu1 %629  ;;  %v3923_v38 = vpop.xlane.xlu0 %867 }
 0x380   :  { %5539 = vst [vmem:[#allocation119_spill] sm:$0xff] %v3921_v41  ;;  %5540 = vst [vmem:[#allocation120_spill] sm:$0xff] %v3923_v38  ;;  %2520 = vpow2.f32 %v1264_v16 }
 0x383   :  { %v3925_v36 = vpop.xlane.xlu1 %653  ;;  %v3927_v56 = vpop.xlane.xlu0 %891 }
 0x384   :  { %5541 = vst [vmem:[#allocation121_spill] sm:$0xff] %v3925_v36  ;;  %5542 = vst [vmem:[#allocation122_spill] sm:$0xff] %v3927_v56 }
 0x387   :  { %v3929_v51 = vpop.xlane.xlu1 %870  ;;  %v3931_v22 = vpop.xlane.xlu0 %1108 }
 0x388   :  { %5543 = vst [vmem:[#allocation123_spill] sm:$0xff] %v3929_v51  ;;  %5544 = vst [vmem:[#allocation124_spill] sm:$0xff] %v3931_v22 }
 0x38b   :  { %v3933_v9 = vpop.xlane.xlu1 %894  ;;  %v3935_v28 = vpop.xlane.xlu0 %1132 }
 0x38c   :  { %5545 = vst [vmem:[#allocation125_spill] sm:$0xff] %v3933_v9  ;;  %5546 = vst [vmem:[#allocation126_spill] sm:$0xff] %v3935_v28 }
 0x38d   :  { %v3937_v3 = vpop.eup %2520 }
 0x38e   :  { %5547 = vst [vmem:[#allocation127_spill] sm:$0xff] %v3937_v3  ;;  %1312 = vrot.lane.b32.xlu1 %v3937_v3, %s2880_s21 }
 0x38f   :  { %v3941_v4 = vpop.xlane.xlu1 %1111  ;;  %v1214_v16 = vpop.xlane.xlu0 %1213 }
 0x390   :  { %5548 = vst [vmem:[#allocation128_spill] sm:$0xff] %v3941_v4  ;;  %v1232_v2 = vsub.f32 %v3073_v18, %v1214_v16 }
 0x392   :  { %v1262_v36 = vmul.f32 1.442695, %v1232_v2 }
 0x393   :  { %v3944_v56 = vpop.xlane.xlu1 %1135 }
 0x394   :  { %5549 = vst [vmem:[#allocation129_spill] sm:$0xff] %v3944_v56  ;;  %2522 = vpow2.f32 %v1262_v36  ;;  %v1283_v36 = vpop.permute.xlu0 %1282 }
 0x397   :  { %v1285_v51 = vpop.permute.xlu1 %1284 }
 0x398   :  { %v1333_v3 = vsel %vm269_vm1, %v1285_v51, 0.0  ;;  %v1291_v5 = vpop.permute.xlu0 %1290 }
 0x39b   :  { %v1287_v22 = vpop.permute.xlu1 %1286 }
 0x39f   :  { %v1289_v28 = vpop.permute.xlu1 %1288 }
 0x3a1   :  { %v3946_v38 = vpop.eup %2522 }
 0x3a2   :  { %5550 = vst [vmem:[#allocation130_spill] sm:$0xff] %v3946_v38  ;;  %1310 = vrot.lane.b32.xlu0 %v3946_v38, %s2880_s21  ;;  %v1330_v38 = vsel %vm269_vm1, %v1283_v36, 0.0 }
 0x3a3   :  { %v1293_v9 = vpop.permute.xlu1 %1292 }
 0x3a4   :  { %v1345_v4 = vsel %vm269_vm1, %v1293_v9, 0.0  ;;  %v1336_v9 = vsel %vm269_vm1, %v1287_v22, 0.0 }
 0x3a7   :  { %v1297_v41 = vpop.permute.xlu1 %1296 }
 0x3a8   :  { %v1351_v2 = vsel %vm269_vm1, %v1297_v41, 0.0  ;;  %v1295_v41 = vpop.permute.xlu0 %1294 }
 0x3ab   :  { %v1301_v16 = vpop.permute.xlu1 %1300 }
 0x3ac   :  { %v1357_v1 = vsel %vm269_vm1, %v1301_v16, 0.0  ;;  %v1299_v16 = vpop.permute.xlu0 %1298 }
 0x3af   :  { %v1305_v56 = vpop.permute.xlu1 %1304 }
 0x3b0   :  { %v1363_v40 = vsel %vm269_vm1, %v1305_v56, 0.0  ;;  %v1303_v56 = vpop.permute.xlu0 %1302 }
 0x3b1   :  { %v1360_v22 = vsel %vm269_vm1, %v1303_v56, 0.0  ;;  %v1411_v56 = vsel %vm1410_vm6, %v2968_v26, -inf }
 0x3b2   :  { %1334 = vadd.xlane.f32.xlu1 %v1333_v3 }
 0x3b3   :  { %v1309_v51 = vpop.permute.xlu1 %1308 }
 0x3b4   :  { %v1369_v3 = vsel %vm269_vm1, %v1309_v51, 0.0 }
 0x3b6   :  { %1346 = vadd.xlane.f32.xlu1 %v1345_v4  ;;  %v1339_v4 = vsel %vm269_vm1, %v1289_v28, 0.0 }
 0x3ba   :  { %1352 = vadd.xlane.f32.xlu1 %v1351_v2  ;;  %v1307_v2 = vpop.permute.xlu0 %1306 }
 0x3bb   :  { %v1366_v36 = vsel %vm269_vm1, %v1307_v2, 0.0  ;;  %v1456_v2 = vsel %vm1410_vm6, %v3091_v32, -inf }
 0x3be   :  { %1358 = vadd.xlane.f32.xlu1 %v1357_v1  ;;  %v1342_v1 = vsel %vm269_vm1, %v1291_v5, 0.0  ;;  %v1414_v5 = vsel %vm1410_vm6, %v2989_v39, -inf }
 0x3c1   :  { %1331 = vadd.xlane.f32.xlu0 %v1330_v38  ;;  %v1348_v38 = vsel %vm269_vm1, %v1295_v41, 0.0  ;;  %v1432_v41 = vsel %vm1410_vm6, %v3085_v31, -inf }
 0x3c2   :  { %1364 = vadd.xlane.f32.xlu1 %v1363_v40  ;;  %v1354_v40 = vsel %vm269_vm1, %v1299_v16, 0.0 }
 0x3c5   :  { %1337 = vadd.xlane.f32.xlu0 %v1336_v9  ;;  %v1420_v9 = vsel %vm1410_vm6, %v3123_v48, -inf }
 0x3c6   :  { %1370 = vadd.xlane.f32.xlu1 %v1369_v3  ;;  %v1426_v3 = vsel %vm1410_vm6, %v3049_v7, -inf }
 0x3c9   :  { %1340 = vadd.xlane.f32.xlu0 %v1339_v4 }
 0x3cd   :  { %1343 = vadd.xlane.f32.xlu0 %v1342_v1  ;;  %v1438_v1 = vsel %vm1410_vm6, %v2984_v35, -inf }
 0x3d1   :  { %1349 = vadd.xlane.f32.xlu0 %v1348_v38  ;;  %v1444_v38 = vsel %vm1410_vm6, %v3135_v43, -inf }
 0x3d5   :  { %1355 = vadd.xlane.f32.xlu0 %v1354_v40  ;;  %v1450_v40 = vsel %vm1410_vm6, %v3055_v8, -inf }
 0x3d9   :  { %1361 = vadd.xlane.f32.xlu0 %v1360_v22  ;;  %v1417_v22 = vsel %vm1410_vm6, %v3111_v23, -inf }
 0x3dd   :  { %1367 = vadd.xlane.f32.xlu0 %v1366_v36  ;;  %v1423_v36 = vsel %vm1410_vm6, %v3034_v61, -inf }
 0x400   :  { %v1313_v28 = vpop.permute.xlu1 %1312 }
 0x401   :  { %v1375_v51 = vsel %vm269_vm1, %v1313_v28, 0.0  ;;  %v1429_v28 = vsel %vm1410_vm6, %v3070_v17, -inf }
 0x402   :  { %1376 = vadd.xlane.f32.xlu1 %v1375_v51  ;;  %v1435_v51 = vsel %vm1410_vm6, %v2971_v27, -inf }
 0x406   :  { %1415 = vmax.xlane.f32.xlu1 %v1414_v5  ;;  %v1441_v5 = vsel %vm1410_vm6, %v3119_v47, -inf }
 0x40a   :  { %1421 = vmax.xlane.f32.xlu1 %v1420_v9  ;;  %v1447_v9 = vsel %vm1410_vm6, %v3037_v62, -inf }
 0x40e   :  { %1427 = vmax.xlane.f32.xlu1 %v1426_v3  ;;  %v1453_v3 = vsel %vm1410_vm6, %v3073_v18, -inf }
 0x412   :  { %1433 = vmax.xlane.f32.xlu1 %v1432_v41 }
 0x414   :  { %v1311_v4 = vpop.permute.xlu0 %1310 }
 0x415   :  { %v1372_v16 = vsel %vm269_vm1, %v1311_v4, 0.0 }
 0x416   :  { %1439 = vmax.xlane.f32.xlu1 %v1438_v1  ;;  %1373 = vadd.xlane.f32.xlu0 %v1372_v16 }
 0x41a   :  { %1445 = vmax.xlane.f32.xlu1 %v1444_v38  ;;  %1412 = vmax.xlane.f32.xlu0 %v1411_v56 }
 0x41e   :  { %1451 = vmax.xlane.f32.xlu1 %v1450_v40  ;;  %1418 = vmax.xlane.f32.xlu0 %v1417_v22 }
 0x422   :  { %1457 = vmax.xlane.f32.xlu1 %v1456_v2  ;;  %1424 = vmax.xlane.f32.xlu0 %v1423_v36 }
 0x426   :  { %1430 = vmax.xlane.f32.xlu0 %v1429_v28 }
 0x42a   :  { %1436 = vmax.xlane.f32.xlu0 %v1435_v51 }
 0x42e   :  { %1442 = vmax.xlane.f32.xlu0 %v1441_v5 }
 0x432   :  { %1448 = vmax.xlane.f32.xlu0 %v1447_v9 }
 0x436   :  { %1454 = vmax.xlane.f32.xlu0 %v1453_v3 }
 0x43b   :  { %v3998_v41 = vpop.xlane.xlu1 %1334 }
 0x43c   :  { %5551 = vst [vmem:[#allocation131_spill] sm:$0xff] %v3998_v41 }
 0x43f   :  { %v4000_v4 = vpop.xlane.xlu1 %1346 }
 0x440   :  { %5552 = vst [vmem:[#allocation132_spill] sm:$0xff] %v4000_v4 }
 0x443   :  { %v4004_v16 = vpop.xlane.xlu1 %1352 }
 0x444   :  { %5554 = vst [vmem:[#allocation134_spill] sm:$0xff] %v4004_v16 }
 0x447   :  { %v4008_v56 = vpop.xlane.xlu1 %1358 }
 0x448   :  { %5556 = vst [vmem:[#allocation136_spill] sm:$0xff] %v4008_v56 }
 0x44a   :  { %v4002_v1 = vpop.xlane.xlu0 %1331 }
 0x44b   :  { %5553 = vst [vmem:[#allocation133_spill] sm:$0xff] %v4002_v1  ;;  %v4012_v22 = vpop.xlane.xlu1 %1364 }
 0x44c   :  { %5558 = vst [vmem:[#allocation138_spill] sm:$0xff] %v4012_v22 }
 0x44e   :  { %v4006_v38 = vpop.xlane.xlu0 %1337 }
 0x44f   :  { %5555 = vst [vmem:[#allocation135_spill] sm:$0xff] %v4006_v38  ;;  %v4016_v36 = vpop.xlane.xlu1 %1370 }
 0x450   :  { %5560 = vst [vmem:[#allocation140_spill] sm:$0xff] %v4016_v36 }
 0x452   :  { %v4010_v40 = vpop.xlane.xlu0 %1340 }
 0x453   :  { %5557 = vst [vmem:[#allocation137_spill] sm:$0xff] %v4010_v40 }
 0x456   :  { %v4014_v2 = vpop.xlane.xlu0 %1343 }
 0x457   :  { %5559 = vst [vmem:[#allocation139_spill] sm:$0xff] %v4014_v2 }
 0x45a   :  { %v4018_v28 = vpop.xlane.xlu0 %1349 }
 0x45b   :  { %5561 = vst [vmem:[#allocation141_spill] sm:$0xff] %v4018_v28 }
 0x45e   :  { %v4022_v5 = vpop.xlane.xlu0 %1355 }
 0x45f   :  { %5563 = vst [vmem:[#allocation143_spill] sm:$0xff] %v4022_v5 }
 0x462   :  { %v4025_v1 = vpop.xlane.xlu0 %1361 }
 0x463   :  { %5564 = vst [vmem:[#allocation144_spill] sm:$0xff] %v4025_v1 }
 0x466   :  { %v4027_v56 = vpop.xlane.xlu0 %1367 }
 0x467   :  { %5565 = vst [vmem:[#allocation145_spill] sm:$0xff] %v4027_v56 }
 0x48b   :  { %v4020_v51 = vpop.xlane.xlu1 %1376 }
 0x48c   :  { %5562 = vst [vmem:[#allocation142_spill] sm:$0xff] %v4020_v51 }
 0x48f   :  { %v1416_v9 = vpop.xlane.xlu1 %1415 }
 0x490   :  { %v1460_v3 = vsub.f32 %v2989_v39, %v1416_v9 }
 0x492   :  { %v1477_v38 = vmul.f32 1.442695, %v1460_v3 }
 0x493   :  { %v1422_v40 = vpop.xlane.xlu1 %1421 }
 0x494   :  { %2524 = vpow2.f32 %v1477_v38  ;;  %v1462_v1 = vsub.f32 %v3123_v48, %v1422_v40 }
 0x496   :  { %v1481_v16 = vmul.f32 1.442695, %v1462_v1 }
 0x497   :  { %v1428_v2 = vpop.xlane.xlu1 %1427 }
 0x498   :  { %v1464_v13 = vsub.f32 %v3049_v7, %v1428_v2 }
 0x49b   :  { %v1434_v9 = vpop.xlane.xlu1 %1433 }
 0x49c   :  { %v1466_v40 = vsub.f32 %v3085_v31, %v1434_v9 }
 0x49f   :  { %v4029_v22 = vpop.xlane.xlu0 %1373  ;;  %v1440_v4 = vpop.xlane.xlu1 %1439 }
 0x4a0   :  { %5566 = vst [vmem:[#allocation146_spill] sm:$0xff] %v4029_v22  ;;  %v1468_v2 = vsub.f32 %v2984_v35, %v1440_v4 }
 0x4a1   :  { %v4031_v36 = vpop.eup %2524 }
 0x4a2   :  { %5567 = vst [vmem:[#allocation147_spill] sm:$0xff] %v4031_v36  ;;  %1525 = vrot.lane.b32.xlu1 %v4031_v36, %s2881_s22 }
 0x4a3   :  { %v1413_v51 = vpop.xlane.xlu0 %1412 }
 0x4a4   :  { %v1459_v5 = vsub.f32 %v2968_v26, %v1413_v51 }
 0x4a6   :  { %v1475_v3 = vmul.f32 1.442695, %v1459_v5  ;;  %v1485_v5 = vmul.f32 1.442695, %v1464_v13 }
 0x4a7   :  { %v1419_v38 = vpop.xlane.xlu0 %1418 }
 0x4a8   :  { %v1461_v28 = vsub.f32 %v3111_v23, %v1419_v38  ;;  %2526 = vpow2.f32 %v1475_v3  ;;  %v1446_v38 = vpop.xlane.xlu1 %1445 }
 0x4a9   :  { %v1470_v9 = vsub.f32 %v3135_v43, %v1446_v38 }
 0x4aa   :  { %v1479_v56 = vmul.f32 1.442695, %v1461_v28 }
 0x4ab   :  { %v1425_v22 = vpop.xlane.xlu0 %1424 }
 0x4ac   :  { %v1463_v41 = vsub.f32 %v3034_v61, %v1425_v22  ;;  %2528 = vpow2.f32 %v1479_v56  ;;  %v1489_v22 = vmul.f32 1.442695, %v1466_v40 }
 0x4ad   :  { %2530 = vpow2.f32 %v1481_v16 }
 0x4ae   :  { %v1483_v36 = vmul.f32 1.442695, %v1463_v41 }
 0x4af   :  { %v1431_v46 = vpop.xlane.xlu0 %1430 }
 0x4b0   :  { %v1465_v51 = vsub.f32 %v3070_v17, %v1431_v46  ;;  %2532 = vpow2.f32 %v1483_v36  ;;  %v1452_v46 = vpop.xlane.xlu1 %1451  ;;  %v1493_v36 = vmul.f32 1.442695, %v1468_v2 }
 0x4b2   :  { %v1487_v3 = vmul.f32 1.442695, %v1465_v51 }
 0x4b3   :  { %v1437_v28 = vpop.xlane.xlu0 %1436 }
 0x4b4   :  { %2534 = vpow2.f32 %v1487_v3  ;;  %v1467_v1 = vsub.f32 %v2971_v27, %v1437_v28  ;;  %v1497_v28 = vmul.f32 1.442695, %v1470_v9  ;;  %v1458_v2 = vpop.xlane.xlu1 %1457 }
 0x4b5   :  { %2536 = vpow2.f32 %v1485_v5  ;;  %v4044_v56 = vpop.eup %2526 }
 0x4b6   :  { %5568 = vst [vmem:[#allocation148_spill] sm:$0xff] %v4044_v56  ;;  %v1491_v41 = vmul.f32 1.442695, %v1467_v1  ;;  %1523 = vrot.lane.b32.xlu0 %v4044_v56, %s2881_s22  ;;  %v1472_v1 = vsub.f32 %v3055_v8, %v1452_v46  ;;  %v1474_v46 = vsub.f32 %v3091_v32, %v1458_v2 }
 0x4b7   :  { %v1443_v13 = vpop.xlane.xlu0 %1442 }
 0x4b8   :  { %2538 = vpow2.f32 %v1491_v41  ;;  %v1469_v16 = vsub.f32 %v3119_v47, %v1443_v13 }
 0x4b9   :  { %2540 = vpow2.f32 %v1489_v22  ;;  %v4050_v51 = vpop.eup %2528 }
 0x4ba   :  { %5569 = vst [vmem:[#allocation149_spill] sm:$0xff] %v4050_v51  ;;  %v1495_v5 = vmul.f32 1.442695, %v1469_v16  ;;  %1527 = vrot.lane.b32.xlu1 %v4050_v51, %s2881_s22  ;;  %v4055_v3 = vpop.eup %2530 }
 0x4bb   :  { %v1449_v4 = vpop.xlane.xlu0 %1448  ;;  %5570 = vst [vmem:[#allocation150_spill] sm:$0xff] %v4055_v3 }
 0x4bc   :  { %2542 = vpow2.f32 %v1495_v5  ;;  %v1471_v40 = vsub.f32 %v3037_v62, %v1449_v4 }
 0x4bd   :  { %2544 = vpow2.f32 %v1493_v36  ;;  %v4058_v22 = vpop.eup %2532  ;;  %v1501_v36 = vmul.f32 1.442695, %v1472_v1 }
 0x4be   :  { %5571 = vst [vmem:[#allocation151_spill] sm:$0xff] %v4058_v22  ;;  %v1499_v38 = vmul.f32 1.442695, %v1471_v40  ;;  %1529 = vrot.lane.b32.xlu1 %v4055_v3, %s2881_s22  ;;  %1531 = vrot.lane.b32.xlu0 %v4058_v22, %s2881_s22  ;;  %v1505_v40 = vmul.f32 1.442695, %v1474_v46 }
 0x4bf   :  { %v1455_v41 = vpop.xlane.xlu0 %1454 }
 0x4c0   :  { %2546 = vpow2.f32 %v1499_v38  ;;  %v1473_v13 = vsub.f32 %v3073_v18, %v1455_v41 }
 0x4c1   :  { %v4065_v16 = vpop.eup %2534  ;;  %2548 = vpow2.f32 %v1497_v28 }
 0x4c2   :  { %5572 = vst [vmem:[#allocation152_spill] sm:$0xff] %v4065_v16  ;;  %v4068_v9 = vpop.eup %2536  ;;  %v1503_v5 = vmul.f32 1.442695, %v1473_v13  ;;  %1535 = vrot.lane.b32.xlu0 %v4065_v16, %s2881_s22 }
 0x4c3   :  { %5573 = vst [vmem:[#allocation153_spill] sm:$0xff] %v4068_v9  ;;  %1533 = vrot.lane.b32.xlu1 %v4068_v9, %s2881_s22 }
 0x4c4   :  { %2550 = vpow2.f32 %v1503_v5 }
 0x4c5   :  { %v4074_v4 = vpop.eup %2538  ;;  %2552 = vpow2.f32 %v1501_v36 }
 0x4c6   :  { %5574 = vst [vmem:[#allocation154_spill] sm:$0xff] %v4074_v4  ;;  %v4076_v38 = vpop.eup %2540  ;;  %1539 = vrot.lane.b32.xlu0 %v4074_v4, %s2881_s22  ;;  %2554 = vpow2.f32 %v1505_v40 }
 0x4c7   :  { %5575 = vst [vmem:[#allocation155_spill] sm:$0xff] %v4076_v38  ;;  %1537 = vrot.lane.b32.xlu1 %v4076_v38, %s2881_s22 }
 0x4c9   :  { %v4082_v28 = vpop.eup %2542 }
 0x4ca   :  { %5576 = vst [vmem:[#allocation156_spill] sm:$0xff] %v4082_v28  ;;  %v4084_v1 = vpop.eup %2544  ;;  %1543 = vrot.lane.b32.xlu0 %v4082_v28, %s2881_s22 }
 0x4cb   :  { %5577 = vst [vmem:[#allocation157_spill] sm:$0xff] %v4084_v1  ;;  %1541 = vrot.lane.b32.xlu1 %v4084_v1, %s2881_s22 }
 0x4cd   :  { %v4090_v2 = vpop.eup %2546 }
 0x4ce   :  { %5578 = vst [vmem:[#allocation158_spill] sm:$0xff] %v4090_v2  ;;  %v4092_v41 = vpop.eup %2548  ;;  %1547 = vrot.lane.b32.xlu0 %v4090_v2, %s2881_s22 }
 0x4cf   :  { %5579 = vst [vmem:[#allocation159_spill] sm:$0xff] %v4092_v41  ;;  %1545 = vrot.lane.b32.xlu1 %v4092_v41, %s2881_s22 }
 0x4d1   :  { %v4098_v13 = vpop.eup %2550 }
 0x4d2   :  { %5580 = vst [vmem:[#allocation160_spill] sm:$0xff] %v4098_v13  ;;  %v4100_v36 = vpop.eup %2552  ;;  %1551 = vrot.lane.b32.xlu0 %v4098_v13, %s2881_s22 }
 0x4d3   :  { %5581 = vst [vmem:[#allocation161_spill] sm:$0xff] %v4100_v36  ;;  %1549 = vrot.lane.b32.xlu1 %v4100_v36, %s2881_s22  ;;  %v4106_v46 = vpop.eup %2554 }
 0x4d4   :  { %5582 = vst [vmem:[#allocation162_spill] sm:$0xff] %v4106_v46 }
 0x4d7   :  { %1553 = vrot.lane.b32.xlu1 %v4106_v46, %s2881_s22 }
 0x514   :  { %v1526_v5 = vpop.permute.xlu1 %1525 }
 0x515   :  { %v1574_v40 = vsel %vm269_vm1, %v1526_v5, 0.0 }
 0x516   :  { %1575 = vadd.xlane.f32.xlu1 %v1574_v40 }
 0x528   :  { %v1524_v2 = vpop.permute.xlu0 %1523 }
 0x529   :  { %v1571_v28 = vsel %vm269_vm1, %v1524_v2, 0.0 }
 0x52a   :  { %1572 = vadd.xlane.f32.xlu0 %v1571_v28 }
 0x52c   :  { %v1528_v41 = vpop.permute.xlu1 %1527 }
 0x52d   :  { %v1577_v4 = vsel %vm269_vm1, %v1528_v41, 0.0 }
 0x52e   :  { %1578 = vadd.xlane.f32.xlu0 %v1577_v4 }
 0x530   :  { %v1530_v36 = vpop.permute.xlu1 %1529  ;;  %v1532_v1 = vpop.permute.xlu0 %1531 }
 0x531   :  { %v1580_v13 = vsel %vm269_vm1, %v1530_v36, 0.0  ;;  %v1583_v5 = vsel %vm269_vm1, %v1532_v1, 0.0 }
 0x532   :  { %1581 = vadd.xlane.f32.xlu0 %v1580_v13 }
 0x534   :  { %v1536_v38 = vpop.permute.xlu0 %1535 }
 0x535   :  { %v1534_v16 = vpop.permute.xlu1 %1533  ;;  %v1589_v41 = vsel %vm269_vm1, %v1536_v38, 0.0 }
 0x536   :  { %v1586_v46 = vsel %vm269_vm1, %v1534_v16, 0.0  ;;  %1584 = vadd.xlane.f32.xlu0 %v1583_v5 }
 0x537   :  { %1587 = vadd.xlane.f32.xlu1 %v1586_v46 }
 0x538   :  { %v1540_v2 = vpop.permute.xlu0 %1539 }
 0x539   :  { %v1538_v40 = vpop.permute.xlu1 %1537  ;;  %v1595_v36 = vsel %vm269_vm1, %v1540_v2, 0.0 }
 0x53a   :  { %v1592_v28 = vsel %vm269_vm1, %v1538_v40, 0.0  ;;  %1590 = vadd.xlane.f32.xlu0 %v1589_v41 }
 0x53b   :  { %1593 = vadd.xlane.f32.xlu1 %v1592_v28 }
 0x53c   :  { %v1544_v22 = vpop.permute.xlu0 %1543 }
 0x53d   :  { %v1542_v4 = vpop.permute.xlu1 %1541  ;;  %v1601_v5 = vsel %vm269_vm1, %v1544_v22, 0.0  ;;  %v1655_v22 = vsel %vm1651_vm7, %v2989_v39, -inf }
 0x53e   :  { %v1598_v13 = vsel %vm269_vm1, %v1542_v4, 0.0  ;;  %1596 = vadd.xlane.f32.xlu0 %v1595_v36  ;;  %v1652_v36 = vsel %vm1651_vm7, %v2968_v26, -inf }
 0x53f   :  { %1599 = vadd.xlane.f32.xlu1 %v1598_v13 }
 0x540   :  { %v1548_v1 = vpop.permute.xlu0 %1547 }
 0x541   :  { %v1546_v16 = vpop.permute.xlu1 %1545  ;;  %v1607_v28 = vsel %vm269_vm1, %v1548_v1, 0.0  ;;  %v1658_v1 = vsel %vm1651_vm7, %v3111_v23, -inf }
 0x542   :  { %v1604_v46 = vsel %vm269_vm1, %v1546_v16, 0.0  ;;  %1602 = vadd.xlane.f32.xlu0 %v1601_v5  ;;  %v1661_v16 = vsel %vm1651_vm7, %v3123_v48, -inf  ;;  %v1664_v5 = vsel %vm1651_vm7, %v3034_v61, -inf }
 0x543   :  { %1605 = vadd.xlane.f32.xlu1 %v1604_v46  ;;  %v1667_v46 = vsel %vm1651_vm7, %v3049_v7, -inf }
 0x544   :  { %v1552_v41 = vpop.permute.xlu0 %1551 }
 0x545   :  { %v1550_v40 = vpop.permute.xlu1 %1549  ;;  %v1613_v13 = vsel %vm269_vm1, %v1552_v41, 0.0  ;;  %v1676_v41 = vsel %vm1651_vm7, %v2971_v27, -inf }
 0x546   :  { %v1610_v38 = vsel %vm269_vm1, %v1550_v40, 0.0  ;;  %1608 = vadd.xlane.f32.xlu0 %v1607_v28  ;;  %v1673_v40 = vsel %vm1651_vm7, %v3085_v31, -inf  ;;  %v1679_v28 = vsel %vm1651_vm7, %v2984_v35, -inf }
 0x547   :  { %1611 = vadd.xlane.f32.xlu1 %v1610_v38  ;;  %v1670_v38 = vsel %vm1651_vm7, %v3070_v17, -inf }
 0x549   :  { %v1554_v4 = vpop.permute.xlu1 %1553 }
 0x54a   :  { %v1616_v2 = vsel %vm269_vm1, %v1554_v4, 0.0  ;;  %1614 = vadd.xlane.f32.xlu0 %v1613_v13  ;;  %v1685_v4 = vsel %vm1651_vm7, %v3135_v43, -inf  ;;  %v1691_v13 = vsel %vm1651_vm7, %v3055_v8, -inf }
 0x54b   :  { %1617 = vadd.xlane.f32.xlu1 %v1616_v2  ;;  %v1682_v2 = vsel %vm1651_vm7, %v3119_v47, -inf }
 0x54e   :  { %1653 = vmax.xlane.f32.xlu0 %v1652_v36  ;;  %v1697_v36 = vsel %vm1651_vm7, %v3091_v32, -inf }
 0x54f   :  { %1656 = vmax.xlane.f32.xlu1 %v1655_v22  ;;  %v1688_v22 = vsel %vm1651_vm7, %v3037_v62, -inf }
 0x552   :  { %1659 = vmax.xlane.f32.xlu0 %v1658_v1  ;;  %v1896_v1 = vsel %vm1892_vm8, %v2989_v39, -inf }
 0x553   :  { %1662 = vmax.xlane.f32.xlu1 %v1661_v16  ;;  %v1694_v16 = vsel %vm1651_vm7, %v3073_v18, -inf }
 0x556   :  { %1665 = vmax.xlane.f32.xlu0 %v1664_v5  ;;  %v1902_v5 = vsel %vm1892_vm8, %v3123_v48, -inf }
 0x557   :  { %1668 = vmax.xlane.f32.xlu1 %v1667_v46  ;;  %v1893_v46 = vsel %vm1892_vm8, %v2968_v26, -inf }
 0x55a   :  { %1671 = vmax.xlane.f32.xlu0 %v1670_v38  ;;  %v1908_v38 = vsel %vm1892_vm8, %v3049_v7, -inf }
 0x55b   :  { %1674 = vmax.xlane.f32.xlu1 %v1673_v40  ;;  %v1899_v40 = vsel %vm1892_vm8, %v3111_v23, -inf }
 0x55e   :  { %1677 = vmax.xlane.f32.xlu0 %v1676_v41  ;;  %v1914_v41 = vsel %vm1892_vm8, %v3085_v31, -inf }
 0x55f   :  { %1680 = vmax.xlane.f32.xlu1 %v1679_v28  ;;  %v1905_v28 = vsel %vm1892_vm8, %v3034_v61, -inf }
 0x562   :  { %1683 = vmax.xlane.f32.xlu0 %v1682_v2  ;;  %v1920_v2 = vsel %vm1892_vm8, %v2984_v35, -inf }
 0x563   :  { %1686 = vmax.xlane.f32.xlu1 %v1685_v4  ;;  %v1911_v4 = vsel %vm1892_vm8, %v3070_v17, -inf }
 0x566   :  { %1689 = vmax.xlane.f32.xlu0 %v1688_v22  ;;  %v1926_v22 = vsel %vm1892_vm8, %v3135_v43, -inf }
 0x567   :  { %1692 = vmax.xlane.f32.xlu1 %v1691_v13  ;;  %v1917_v13 = vsel %vm1892_vm8, %v2971_v27, -inf }
 0x56a   :  { %1695 = vmax.xlane.f32.xlu0 %v1694_v16  ;;  %v1932_v16 = vsel %vm1892_vm8, %v3055_v8, -inf }
 0x56b   :  { %1698 = vmax.xlane.f32.xlu1 %v1697_v36  ;;  %v1923_v36 = vsel %vm1892_vm8, %v3119_v47, -inf }
 0x56e   :  { %1894 = vmax.xlane.f32.xlu0 %v1893_v46  ;;  %v1938_v46 = vsel %vm1892_vm8, %v3091_v32, -inf }
 0x56f   :  { %1897 = vmax.xlane.f32.xlu1 %v1896_v1  ;;  %v1929_v1 = vsel %vm1892_vm8, %v3037_v62, -inf }
 0x572   :  { %1900 = vmax.xlane.f32.xlu0 %v1899_v40 }
 0x573   :  { %1903 = vmax.xlane.f32.xlu1 %v1902_v5  ;;  %v1935_v5 = vsel %vm1892_vm8, %v3073_v18, -inf }
 0x576   :  { %1906 = vmax.xlane.f32.xlu0 %v1905_v28 }
 0x577   :  { %1909 = vmax.xlane.f32.xlu1 %v1908_v38 }
 0x57a   :  { %1912 = vmax.xlane.f32.xlu0 %v1911_v4 }
 0x57b   :  { %1915 = vmax.xlane.f32.xlu1 %v1914_v41 }
 0x57e   :  { %1918 = vmax.xlane.f32.xlu0 %v1917_v13 }
 0x57f   :  { %1921 = vmax.xlane.f32.xlu1 %v1920_v2 }
 0x582   :  { %1924 = vmax.xlane.f32.xlu0 %v1923_v36 }
 0x583   :  { %1927 = vmax.xlane.f32.xlu1 %v1926_v22 }
 0x586   :  { %1930 = vmax.xlane.f32.xlu0 %v1929_v1 }
 0x587   :  { %1933 = vmax.xlane.f32.xlu1 %v1932_v16 }
 0x58a   :  { %1936 = vmax.xlane.f32.xlu0 %v1935_v5 }
 0x58b   :  { %1939 = vmax.xlane.f32.xlu1 %v1938_v46 }
 0x59f   :  { %v4194_v28 = vpop.xlane.xlu1 %1575 }
 0x5b3   :  { %v4190_v40 = vpop.xlane.xlu0 %1572 }
 0x5b4   :  { %5583 = vst [vmem:[#allocation163_spill] sm:$0xff] %v4190_v40 }
 0x5b7   :  { %v4192_v38 = vpop.xlane.xlu0 %1578 }
 0x5b8   :  { %5584 = vst [vmem:[#allocation164_spill] sm:$0xff] %v4192_v38 }
 0x5bb   :  { %v4196_v41 = vpop.xlane.xlu0 %1581 }
 0x5bc   :  { %5585 = vst [vmem:[#allocation165_spill] sm:$0xff] %v4196_v41 }
 0x5bf   :  { %v4200_v2 = vpop.xlane.xlu0 %1584 }
 0x5c0   :  { %v4198_v4 = vpop.xlane.xlu1 %1587  ;;  %5587 = vst [vmem:[#allocation167_spill] sm:$0xff] %v4200_v2 }
 0x5c1   :  { %5586 = vst [vmem:[#allocation166_spill] sm:$0xff] %v4198_v4 }
 0x5c3   :  { %v4204_v22 = vpop.xlane.xlu0 %1590 }
 0x5c4   :  { %v4202_v13 = vpop.xlane.xlu1 %1593  ;;  %5589 = vst [vmem:[#allocation169_spill] sm:$0xff] %v4204_v22 }
 0x5c5   :  { %5588 = vst [vmem:[#allocation168_spill] sm:$0xff] %v4202_v13 }
 0x5c7   :  { %v4208_v16 = vpop.xlane.xlu0 %1596 }
 0x5c8   :  { %v4206_v36 = vpop.xlane.xlu1 %1599  ;;  %5591 = vst [vmem:[#allocation171_spill] sm:$0xff] %v4208_v16 }
 0x5c9   :  { %5590 = vst [vmem:[#allocation170_spill] sm:$0xff] %v4206_v36 }
 0x5cb   :  { %v4212_v46 = vpop.xlane.xlu0 %1602 }
 0x5cc   :  { %v4210_v1 = vpop.xlane.xlu1 %1605  ;;  %5593 = vst [vmem:[#allocation173_spill] sm:$0xff] %v4212_v46 }
 0x5cd   :  { %5592 = vst [vmem:[#allocation172_spill] sm:$0xff] %v4210_v1 }
 0x5cf   :  { %v4216_v9 = vpop.xlane.xlu0 %1608 }
 0x5d0   :  { %v4214_v5 = vpop.xlane.xlu1 %1611  ;;  %5595 = vst [vmem:[#allocation175_spill] sm:$0xff] %v4216_v9 }
 0x5d1   :  { %5594 = vst [vmem:[#allocation174_spill] sm:$0xff] %v4214_v5 }
 0x5d3   :  { %v4220_v51 = vpop.xlane.xlu0 %1614 }
 0x5d4   :  { %v4218_v3 = vpop.xlane.xlu1 %1617  ;;  %5597 = vst [vmem:[#allocation177_spill] sm:$0xff] %v4220_v51 }
 0x5d5   :  { %5596 = vst [vmem:[#allocation176_spill] sm:$0xff] %v4218_v3 }
 0x5d7   :  { %v1654_v13 = vpop.xlane.xlu0 %1653 }
 0x5d8   :  { %v1657_v56 = vpop.xlane.xlu1 %1656  ;;  %v1700_v36 = vsub.f32 %v2968_v26, %v1654_v13 }
 0x5d9   :  { %v1701_v22 = vsub.f32 %v2989_v39, %v1657_v56 }
 0x5da   :  { %v1716_v16 = vmul.f32 1.442695, %v1700_v36 }
 0x5db   :  { %v1718_v2 = vmul.f32 1.442695, %v1701_v22  ;;  %v1660_v1 = vpop.xlane.xlu0 %1659 }
 0x5dc   :  { %v1663_v4 = vpop.xlane.xlu1 %1662  ;;  %v1702_v5 = vsub.f32 %v3111_v23, %v1660_v1 }
 0x5dd   :  { %2556 = vpow2.f32 %v1718_v2  ;;  %v1703_v46 = vsub.f32 %v3123_v48, %v1663_v4 }
 0x5de   :  { %2558 = vpow2.f32 %v1716_v16  ;;  %v1720_v9 = vmul.f32 1.442695, %v1702_v5 }
 0x5df   :  { %v1666_v41 = vpop.xlane.xlu0 %1665  ;;  %v1722_v51 = vmul.f32 1.442695, %v1703_v46 }
 0x5e0   :  { %v1669_v3 = vpop.xlane.xlu1 %1668  ;;  %v1704_v56 = vsub.f32 %v3034_v61, %v1666_v41  ;;  %2560 = vpow2.f32 %v1720_v9 }
 0x5e1   :  { %v1705_v38 = vsub.f32 %v3049_v7, %v1669_v3  ;;  %2562 = vpow2.f32 %v1722_v51 }
 0x5e2   :  { %v1724_v13 = vmul.f32 1.442695, %v1704_v56 }
 0x5e3   :  { %v1672_v36 = vpop.xlane.xlu0 %1671  ;;  %v1726_v40 = vmul.f32 1.442695, %v1705_v38 }
 0x5e4   :  { %v1675_v22 = vpop.xlane.xlu1 %1674  ;;  %v1706_v4 = vsub.f32 %v3070_v17, %v1672_v36  ;;  %2564 = vpow2.f32 %v1724_v13 }
 0x5e5   :  { %v1707_v2 = vsub.f32 %v3085_v31, %v1675_v22  ;;  %2566 = vpow2.f32 %v1726_v40 }
 0x5e6   :  { %v1728_v16 = vmul.f32 1.442695, %v1706_v4 }
 0x5e7   :  { %v1678_v5 = vpop.xlane.xlu0 %1677  ;;  %v1730_v46 = vmul.f32 1.442695, %v1707_v2 }
 0x5e8   :  { %v1681_v1 = vpop.xlane.xlu1 %1680  ;;  %v1708_v41 = vsub.f32 %v2971_v27, %v1678_v5  ;;  %2568 = vpow2.f32 %v1728_v16 }
 0x5e9   :  { %v1709_v3 = vsub.f32 %v2984_v35, %v1681_v1  ;;  %2570 = vpow2.f32 %v1730_v46 }
 0x5ea   :  { %v4232_v9 = vpop.eup %2556  ;;  %v1732_v51 = vmul.f32 1.442695, %v1708_v41 }
 0x5eb   :  { %5598 = vst [vmem:[#allocation178_spill] sm:$0xff] %v4232_v9  ;;  %v4234_v56 = vpop.eup %2558  ;;  %1766 = vrot.lane.b32.xlu1 %v4232_v9, %s2882_s23  ;;  %v1684_v40 = vpop.xlane.xlu0 %1683  ;;  %v1734_v13 = vmul.f32 1.442695, %v1709_v3  ;;  %v5670_v9 = vld [vmem:[#allocation46_spill] sm:$0xff] }
 0x5ec   :  { %5599 = vst [vmem:[#allocation179_spill] sm:$0xff] %v4234_v56  ;;  %1764 = vrot.lane.b32.xlu0 %v4234_v56, %s2882_s23  ;;  %v1687_v38 = vpop.xlane.xlu1 %1686  ;;  %v1710_v36 = vsub.f32 %v3119_v47, %v1684_v40  ;;  %2572 = vpow2.f32 %v1732_v51  ;;  %v5669_v56 = vld [vmem:[#allocation33_spill] sm:$0xff] }
 0x5ed   :  { %v1711_v22 = vsub.f32 %v3135_v43, %v1687_v38  ;;  %v4242_v2 = vpop.eup %2560  ;;  %2574 = vpow2.f32 %v1734_v13 }
 0x5ee   :  { %5600 = vst [vmem:[#allocation180_spill] sm:$0xff] %v4242_v2  ;;  %v1736_v4 = vmul.f32 1.442695, %v1710_v36  ;;  %v4248_v3 = vpop.eup %2562 }
 0x5ef   :  { %1768 = vrot.lane.b32.xlu1 %v4242_v2, %s2882_s23  ;;  %v1690_v1 = vpop.xlane.xlu0 %1689  ;;  %v1738_v5 = vmul.f32 1.442695, %v1711_v22  ;;  %5601 = vst [vmem:[#allocation181_spill] sm:$0xff] %v4248_v3 }
 0x5f0   :  { %v1693_v16 = vpop.xlane.xlu1 %1692  ;;  %v1712_v46 = vsub.f32 %v3037_v62, %v1690_v1  ;;  %2576 = vpow2.f32 %v1736_v4 }
 0x5f1   :  { %v1713_v41 = vsub.f32 %v3055_v8, %v1693_v16  ;;  %v4250_v38 = vpop.eup %2564  ;;  %2578 = vpow2.f32 %v1738_v5 }
 0x5f2   :  { %5602 = vst [vmem:[#allocation182_spill] sm:$0xff] %v4250_v38  ;;  %v1740_v51 = vmul.f32 1.442695, %v1712_v46  ;;  %1772 = vrot.lane.b32.xlu0 %v4250_v38, %s2882_s23  ;;  %v4258_v1 = vpop.eup %2566 }
 0x5f3   :  { %1770 = vrot.lane.b32.xlu1 %v4248_v3, %s2882_s23  ;;  %v1696_v36 = vpop.xlane.xlu0 %1695  ;;  %v1742_v13 = vmul.f32 1.442695, %v1713_v41  ;;  %5603 = vst [vmem:[#allocation183_spill] sm:$0xff] %v4258_v1 }
 0x5f4   :  { %v1699_v40 = vpop.xlane.xlu1 %1698  ;;  %v1714_v16 = vsub.f32 %v3073_v18, %v1696_v36  ;;  %2580 = vpow2.f32 %v1740_v51 }
 0x5f5   :  { %v1715_v22 = vsub.f32 %v3091_v32, %v1699_v40  ;;  %v4260_v4 = vpop.eup %2568  ;;  %2582 = vpow2.f32 %v1742_v13 }
 0x5f6   :  { %5604 = vst [vmem:[#allocation184_spill] sm:$0xff] %v4260_v4  ;;  %v1744_v46 = vmul.f32 1.442695, %v1714_v16  ;;  %1776 = vrot.lane.b32.xlu0 %v4260_v4, %s2882_s23  ;;  %v4268_v36 = vpop.eup %2570 }
 0x5f7   :  { %1774 = vrot.lane.b32.xlu1 %v4258_v1, %s2882_s23  ;;  %v1895_v2 = vpop.xlane.xlu0 %1894  ;;  %v1746_v5 = vmul.f32 1.442695, %v1715_v22  ;;  %5605 = vst [vmem:[#allocation185_spill] sm:$0xff] %v4268_v36 }
 0x5f8   :  { %v1898_v38 = vpop.xlane.xlu1 %1897  ;;  %v1941_v40 = vsub.f32 %v2968_v26, %v1895_v2  ;;  %2584 = vpow2.f32 %v1744_v46  ;;  %v5663_v26 = vld [vmem:[#allocation30_spill] sm:$0xff] }
 0x5f9   :  { %v1942_v41 = vsub.f32 %v2989_v39, %v1898_v38  ;;  %v4270_v51 = vpop.eup %2572  ;;  %2586 = vpow2.f32 %v1746_v5  ;;  %v5664_v39 = vld [vmem:[#allocation32_spill] sm:$0xff] }
 0x5fa   :  { %5606 = vst [vmem:[#allocation186_spill] sm:$0xff] %v4270_v51  ;;  %v1957_v16 = vmul.f32 1.442695, %v1941_v40  ;;  %1780 = vrot.lane.b32.xlu0 %v4270_v51, %s2882_s23  ;;  %v4278_v22 = vpop.eup %2574 }
 0x5fb   :  { %1778 = vrot.lane.b32.xlu1 %v4268_v36, %s2882_s23  ;;  %v1901_v1 = vpop.xlane.xlu0 %1900  ;;  %v1959_v13 = vmul.f32 1.442695, %v1942_v41  ;;  %5607 = vst [vmem:[#allocation187_spill] sm:$0xff] %v4278_v22 }
 0x5fc   :  { %v1904_v4 = vpop.xlane.xlu1 %1903  ;;  %v1943_v2 = vsub.f32 %v3111_v23, %v1901_v1  ;;  %2588 = vpow2.f32 %v1957_v16  ;;  %v5658_v23 = vld [vmem:[#allocation124_spill] sm:$0xff] }
 0x5fd   :  { %v1944_v38 = vsub.f32 %v3123_v48, %v1904_v4  ;;  %v4280_v46 = vpop.eup %2576  ;;  %2590 = vpow2.f32 %v1959_v13  ;;  %v5659_v48 = vld [vmem:[#allocation125_spill] sm:$0xff] }
 0x5fe   :  { %5608 = vst [vmem:[#allocation188_spill] sm:$0xff] %v4280_v46  ;;  %v1961_v40 = vmul.f32 1.442695, %v1943_v2  ;;  %1784 = vrot.lane.b32.xlu0 %v4280_v46, %s2882_s23  ;;  %v4288_v41 = vpop.eup %2578 }
 0x5ff   :  { %1782 = vrot.lane.b32.xlu1 %v4278_v22, %s2882_s23  ;;  %v1907_v36 = vpop.xlane.xlu0 %1906  ;;  %v1963_v5 = vmul.f32 1.442695, %v1944_v38  ;;  %5609 = vst [vmem:[#allocation189_spill] sm:$0xff] %v4288_v41 }
 0x600   :  { %v1910_v51 = vpop.xlane.xlu1 %1909  ;;  %v1945_v1 = vsub.f32 %v3034_v61, %v1907_v36  ;;  %2592 = vpow2.f32 %v1961_v40  ;;  %v5654_v61 = vld [vmem:[#allocation120_spill] sm:$0xff] }
 0x601   :  { %v1946_v4 = vsub.f32 %v3049_v7, %v1910_v51  ;;  %v4290_v16 = vpop.eup %2580  ;;  %2594 = vpow2.f32 %v1963_v5  ;;  %v5655_v7 = vld [vmem:[#allocation121_spill] sm:$0xff] }
 0x602   :  { %5610 = vst [vmem:[#allocation190_spill] sm:$0xff] %v4290_v16  ;;  %v1965_v2 = vmul.f32 1.442695, %v1945_v1  ;;  %1788 = vrot.lane.b32.xlu0 %v4290_v16, %s2882_s23  ;;  %v4298_v38 = vpop.eup %2582 }
 0x603   :  { %1786 = vrot.lane.b32.xlu1 %v4288_v41, %s2882_s23  ;;  %v1913_v22 = vpop.xlane.xlu0 %1912  ;;  %v1967_v13 = vmul.f32 1.442695, %v1946_v4  ;;  %5611 = vst [vmem:[#allocation191_spill] sm:$0xff] %v4298_v38 }
 0x604   :  { %v1916_v46 = vpop.xlane.xlu1 %1915  ;;  %v1947_v36 = vsub.f32 %v3070_v17, %v1913_v22  ;;  %2596 = vpow2.f32 %v1965_v2  ;;  %v5650_v17 = vld [vmem:[#allocation116_spill] sm:$0xff] }
 0x605   :  { %v1948_v51 = vsub.f32 %v3085_v31, %v1916_v46  ;;  %v4300_v40 = vpop.eup %2584  ;;  %2598 = vpow2.f32 %v1967_v13  ;;  %v5651_v31 = vld [vmem:[#allocation117_spill] sm:$0xff] }
 0x606   :  { %5612 = vst [vmem:[#allocation192_spill] sm:$0xff] %v4300_v40  ;;  %v1969_v1 = vmul.f32 1.442695, %v1947_v36  ;;  %1792 = vrot.lane.b32.xlu0 %v4300_v40, %s2882_s23  ;;  %v4308_v4 = vpop.eup %2586 }
 0x607   :  { %1790 = vrot.lane.b32.xlu1 %v4298_v38, %s2882_s23  ;;  %v1919_v41 = vpop.xlane.xlu0 %1918  ;;  %v1971_v5 = vmul.f32 1.442695, %v1948_v51  ;;  %5613 = vst [vmem:[#allocation193_spill] sm:$0xff] %v4308_v4 }
 0x608   :  { %v1922_v16 = vpop.xlane.xlu1 %1921  ;;  %v1949_v22 = vsub.f32 %v2971_v27, %v1919_v41  ;;  %2600 = vpow2.f32 %v1969_v1 }
 0x609   :  { %v1950_v46 = vsub.f32 %v2984_v35, %v1922_v16  ;;  %v4310_v2 = vpop.eup %2588  ;;  %2602 = vpow2.f32 %v1971_v5 }
 0x60a   :  { %5614 = vst [vmem:[#allocation194_spill] sm:$0xff] %v4310_v2  ;;  %v1973_v36 = vmul.f32 1.442695, %v1949_v22  ;;  %2005 = vrot.lane.b32.xlu0 %v4310_v2, %s2883_s24  ;;  %v4318_v38 = vpop.eup %2590  ;;  %v5665_v2 = vld [vmem:[#allocation31_spill] sm:$0xff] }
 0x60b   :  { %1794 = vrot.lane.b32.xlu1 %v4308_v4, %s2882_s23  ;;  %v1925_v13 = vpop.xlane.xlu0 %1924  ;;  %v1975_v51 = vmul.f32 1.442695, %v1950_v46  ;;  %5615 = vst [vmem:[#allocation195_spill] sm:$0xff] %v4318_v38 }
 0x60c   :  { %v1928_v40 = vpop.xlane.xlu1 %1927  ;;  %v1951_v41 = vsub.f32 %v3119_v47, %v1925_v13  ;;  %2604 = vpow2.f32 %v1973_v36 }
 0x60d   :  { %v1952_v16 = vsub.f32 %v3135_v43, %v1928_v40  ;;  %v4320_v1 = vpop.eup %2592  ;;  %2606 = vpow2.f32 %v1975_v51 }
 0x60e   :  { %5616 = vst [vmem:[#allocation196_spill] sm:$0xff] %v4320_v1  ;;  %v1977_v22 = vmul.f32 1.442695, %v1951_v41  ;;  %2009 = vrot.lane.b32.xlu0 %v4320_v1, %s2883_s24  ;;  %v4328_v13 = vpop.eup %2594  ;;  %v5660_v1 = vld [vmem:[#allocation126_spill] sm:$0xff] }
 0x60f   :  { %2007 = vrot.lane.b32.xlu1 %v4318_v38, %s2883_s24  ;;  %v1931_v27 = vpop.xlane.xlu0 %1930  ;;  %v1979_v5 = vmul.f32 1.442695, %v1952_v16  ;;  %5617 = vst [vmem:[#allocation197_spill] sm:$0xff] %v4328_v13 }
 0x610   :  { %v1934_v4 = vpop.xlane.xlu1 %1933  ;;  %v1953_v46 = vsub.f32 %v3037_v62, %v1931_v27  ;;  %2608 = vpow2.f32 %v1977_v22 }
 0x611   :  { %v1954_v40 = vsub.f32 %v3055_v8, %v1934_v4  ;;  %v4330_v36 = vpop.eup %2596  ;;  %2610 = vpow2.f32 %v1979_v5 }
 0x612   :  { %5618 = vst [vmem:[#allocation198_spill] sm:$0xff] %v4330_v36  ;;  %v1981_v41 = vmul.f32 1.442695, %v1953_v46  ;;  %2013 = vrot.lane.b32.xlu0 %v4330_v36, %s2883_s24  ;;  %v4337_v16 = vpop.eup %2598  ;;  %v5656_v36 = vld [vmem:[#allocation122_spill] sm:$0xff] }
 0x613   :  { %2011 = vrot.lane.b32.xlu1 %v4328_v13, %s2883_s24  ;;  %v1937_v43 = vpop.xlane.xlu0 %1936  ;;  %v1983_v51 = vmul.f32 1.442695, %v1954_v40  ;;  %5619 = vst [vmem:[#allocation199_spill] sm:$0xff] %v4337_v16  ;;  %v5661_v13 = vld [vmem:[#allocation128_spill] sm:$0xff] }
 0x614   :  { %v1940_v47 = vpop.xlane.xlu1 %1939  ;;  %v1955_v4 = vsub.f32 %v3073_v18, %v1937_v43  ;;  %2612 = vpow2.f32 %v1981_v41 }
 0x615   :  { %v1956_v27 = vsub.f32 %v3091_v32, %v1940_v47  ;;  %v4340_v22 = vpop.eup %2600  ;;  %2614 = vpow2.f32 %v1983_v51 }
 0x616   :  { %5620 = vst [vmem:[#allocation200_spill] sm:$0xff] %v4340_v22  ;;  %v1985_v46 = vmul.f32 1.442695, %v1955_v4  ;;  %2017 = vrot.lane.b32.xlu0 %v4340_v22, %s2883_s24  ;;  %v4346_v62 = vpop.eup %2602  ;;  %v5652_v22 = vld [vmem:[#allocation118_spill] sm:$0xff] }
 0x617   :  { %2015 = vrot.lane.b32.xlu1 %v4337_v16, %s2883_s24  ;;  %5621 = vst [vmem:[#allocation201_spill] sm:$0xff] %v4346_v62  ;;  %v1987_v5 = vmul.f32 1.442695, %v1956_v27  ;;  %v5657_v16 = vld [vmem:[#allocation123_spill] sm:$0xff] }
 0x618   :  { %2616 = vpow2.f32 %v1985_v46 }
 0x619   :  { %v4348_v43 = vpop.eup %2604  ;;  %2618 = vpow2.f32 %v1987_v5 }
 0x61a   :  { %5622 = vst [vmem:[#allocation202_spill] sm:$0xff] %v4348_v43  ;;  %2021 = vrot.lane.b32.xlu0 %v4348_v43, %s2883_s24  ;;  %v4354_v47 = vpop.eup %2606  ;;  %2620 = vrcp.f32 %v3652_v25 }
 0x61b   :  { %2019 = vrot.lane.b32.xlu1 %v4346_v62, %s2883_s24  ;;  %5623 = vst [vmem:[#allocation203_spill] sm:$0xff] %v4354_v47  ;;  %2622 = vrcp.f32 %v3632_v60  ;;  %v5653_v62 = vld [vmem:[#allocation119_spill] sm:$0xff] }
 0x61c   :  { %2624 = vrcp.f32 %v3658_v45 }
 0x61d   :  { %v4356_v40 = vpop.eup %2608  ;;  %2626 = vrcp.f32 %v3642_v34 }
 0x61e   :  { %5624 = vst [vmem:[#allocation204_spill] sm:$0xff] %v4356_v40  ;;  %2025 = vrot.lane.b32.xlu0 %v4356_v40, %s2883_s24  ;;  %v4362_v41 = vpop.eup %2610  ;;  %2628 = vrcp.f32 %v3674_v15 }
 0x61f   :  { %2023 = vrot.lane.b32.xlu1 %v4354_v47, %s2883_s24  ;;  %5625 = vst [vmem:[#allocation205_spill] sm:$0xff] %v4362_v41  ;;  %2630 = vrcp.f32 %v3679_v6 }
 0x620   :  { %2632 = vrcp.f32 %v3695_v14 }
 0x621   :  { %v4364_v51 = vpop.eup %2612  ;;  %2634 = vrcp.f32 %v3703_v58 }
 0x622   :  { %5626 = vst [vmem:[#allocation206_spill] sm:$0xff] %v4364_v51  ;;  %2029 = vrot.lane.b32.xlu0 %v4364_v51, %s2883_s24  ;;  %v4370_v4 = vpop.eup %2614  ;;  %2636 = vrcp.f32 %v3715_v44 }
 0x623   :  { %2027 = vrot.lane.b32.xlu1 %v4362_v41, %s2883_s24  ;;  %5627 = vst [vmem:[#allocation207_spill] sm:$0xff] %v4370_v4  ;;  %2638 = vrcp.f32 %v3721_v30 }
 0x624   :  { %2640 = vrcp.f32 %v3731_v52 }
 0x625   :  { %v4372_v27 = vpop.eup %2616  ;;  %2642 = vrcp.f32 %v3735_v50 }
 0x626   :  { %5628 = vst [vmem:[#allocation208_spill] sm:$0xff] %v4372_v27  ;;  %2033 = vrot.lane.b32.xlu0 %v4372_v27, %s2883_s24  ;;  %v4378_v46 = vpop.eup %2618  ;;  %2644 = vrcp.f32 %v3782_v21 }
 0x627   :  { %2031 = vrot.lane.b32.xlu1 %v4370_v4, %s2883_s24  ;;  %5629 = vst [vmem:[#allocation209_spill] sm:$0xff] %v4378_v46  ;;  %v4427_v45 = vpop.eup %2620  ;;  %2646 = vrcp.f32 %v3794_v37 }
 0x628   :  { %v4430_v34 = vpop.eup %2622  ;;  %2648 = vrcp.f32 %v3806_v11 }
 0x629   :  { %v4433_v60 = vpop.eup %2624  ;;  %2650 = vrcp.f32 %v3816_v0 }
 0x62a   :  { %v4436_v25 = vpop.eup %2626  ;;  %2652 = vrcp.f32 %v3826_v57  ;;  %v438_v3 = vmul.f32 %v4433_v60, %v5665_v2 }
 0x62b   :  { %2035 = vrot.lane.b32.xlu1 %v4378_v46, %s2883_s24  ;;  %v4439_v15 = vpop.eup %2628  ;;  %2654 = vrcp.f32 %v3836_v12 }
 0x62c   :  { %v4442_v6 = vpop.eup %2630  ;;  %2656 = vrcp.f32 %v3844_v24 }
 0x62d   :  { %v4445_v14 = vpop.eup %2632  ;;  %2658 = vrcp.f32 %v3848_v20  ;;  %v5630_v20 = vld [vmem:[#allocation96_spill] sm:$0xff] }
 0x62e   :  { %v4448_v58 = vpop.eup %2634  ;;  %2660 = vrcp.f32 %v3852_v42 }
 0x62f   :  { %v4451_v44 = vpop.eup %2636  ;;  %2662 = vrcp.f32 %v3854_v33  ;;  %v5631_v33 = vld [vmem:[#allocation97_spill] sm:$0xff] }
 0x630   :  { %v4454_v30 = vpop.eup %2638  ;;  %2664 = vrcp.f32 %v3856_v53 }
 0x631   :  { %v4457_v52 = vpop.eup %2640  ;;  %2666 = vrcp.f32 %v3858_v29  ;;  %v5632_v29 = vld [vmem:[#allocation98_spill] sm:$0xff] }
 0x632   :  { %v4460_v50 = vpop.eup %2642  ;;  %2668 = vrcp.f32 %v3860_v63 }
 0x633   :  { %v4463_v21 = vpop.eup %2644  ;;  %2670 = vrcp.f32 %v3862_v49  ;;  %v5633_v49 = vld [vmem:[#allocation99_spill] sm:$0xff] }
 0x634   :  { %v4466_v37 = vpop.eup %2646  ;;  %2672 = vrcp.f32 %v3864_v10 }
 0x635   :  { %v4469_v11 = vpop.eup %2648  ;;  %2674 = vrcp.f32 %v3866_v59  ;;  %v5634_v59 = vld [vmem:[#allocation100_spill] sm:$0xff] }
 0x636   :  { %v4472_v0 = vpop.eup %2650  ;;  %2676 = vrcp.f32 %v3868_v19 }
 0x637   :  { %v4475_v57 = vpop.eup %2652  ;;  %2678 = vrcp.f32 %v3870_v55  ;;  %v5635_v55 = vld [vmem:[#allocation101_spill] sm:$0xff] }
 0x638   :  { %v4478_v12 = vpop.eup %2654  ;;  %2680 = vrcp.f32 %v3872_v54 }
 0x639   :  { %v4481_v24 = vpop.eup %2656  ;;  %2682 = vrcp.f32 %v5630_v20 }
 0x63a   :  { %v4484_v42 = vpop.eup %2658  ;;  %2684 = vrcp.f32 %v5631_v33  ;;  %v5643_v33 = vld [vmem:[#allocation109_spill] sm:$0xff] }
 0x63b   :  { %v4487_v53 = vpop.eup %2660  ;;  %2686 = vrcp.f32 %v5632_v29 }
 0x63c   :  { %v4490_v63 = vpop.eup %2662  ;;  %2688 = vrcp.f32 %v5633_v49  ;;  %v5644_v49 = vld [vmem:[#allocation110_spill] sm:$0xff] }
 0x63d   :  { %v4493_v10 = vpop.eup %2664  ;;  %2690 = vrcp.f32 %v5634_v59 }
 0x63e   :  { %v4496_v19 = vpop.eup %2666  ;;  %2692 = vrcp.f32 %v5635_v55  ;;  %v5645_v55 = vld [vmem:[#allocation111_spill] sm:$0xff] }
 0x63f   :  { %v4499_v54 = vpop.eup %2668 }
 0x65d   :  { %v1767_v5 = vpop.permute.xlu1 %1766 }
 0x65e   :  { %v1815_v18 = vsel %vm269_vm1, %v1767_v5, 0.0  ;;  %v1765_v32 = vpop.permute.xlu0 %1764 }
 0x65f   :  { %v1812_v8 = vsel %vm269_vm1, %v1765_v32, 0.0  ;;  %1816 = vadd.xlane.f32.xlu1 %v1815_v18 }
 0x660   :  { %1813 = vadd.xlane.f32.xlu0 %v1812_v8 }
 0x661   :  { %v1769_v51 = vpop.permute.xlu1 %1768 }
 0x662   :  { %v1818_v40 = vsel %vm269_vm1, %v1769_v51, 0.0 }
 0x664   :  { %1819 = vadd.xlane.f32.xlu0 %v1818_v40  ;;  %v1773_v41 = vpop.permute.xlu0 %1772 }
 0x665   :  { %v1771_v4 = vpop.permute.xlu1 %1770  ;;  %v1824_v46 = vsel %vm269_vm1, %v1773_v41, 0.0 }
 0x666   :  { %v1821_v27 = vsel %vm269_vm1, %v1771_v4, 0.0 }
 0x668   :  { %1822 = vadd.xlane.f32.xlu0 %v1821_v27  ;;  %v1777_v43 = vpop.permute.xlu0 %1776 }
 0x669   :  { %v1775_v35 = vpop.permute.xlu1 %1774  ;;  %v1830_v8 = vsel %vm269_vm1, %v1777_v43, 0.0 }
 0x66a   :  { %v1827_v5 = vsel %vm269_vm1, %v1775_v35, 0.0 }
 0x66b   :  { %1828 = vadd.xlane.f32.xlu1 %v1827_v5 }
 0x66c   :  { %1825 = vadd.xlane.f32.xlu0 %v1824_v46  ;;  %v1781_v18 = vpop.permute.xlu0 %1780 }
 0x66d   :  { %v1779_v32 = vpop.permute.xlu1 %1778  ;;  %v1836_v4 = vsel %vm269_vm1, %v1781_v18, 0.0 }
 0x66e   :  { %v1833_v51 = vsel %vm269_vm1, %v1779_v32, 0.0 }
 0x66f   :  { %1834 = vadd.xlane.f32.xlu1 %v1833_v51 }
 0x670   :  { %1831 = vadd.xlane.f32.xlu0 %v1830_v8  ;;  %v1785_v47 = vpop.permute.xlu0 %1784 }
 0x671   :  { %v1783_v40 = vpop.permute.xlu1 %1782  ;;  %v1842_v46 = vsel %vm269_vm1, %v1785_v47, 0.0 }
 0x672   :  { %v1839_v27 = vsel %vm269_vm1, %v1783_v40, 0.0 }
 0x673   :  { %1840 = vadd.xlane.f32.xlu1 %v1839_v27 }
 0x674   :  { %1837 = vadd.xlane.f32.xlu0 %v1836_v4  ;;  %v1789_v35 = vpop.permute.xlu0 %1788 }
 0x675   :  { %v1787_v41 = vpop.permute.xlu1 %1786  ;;  %v1848_v8 = vsel %vm269_vm1, %v1789_v35, 0.0 }
 0x676   :  { %v1845_v5 = vsel %vm269_vm1, %v1787_v41, 0.0 }
 0x677   :  { %1846 = vadd.xlane.f32.xlu1 %v1845_v5 }
 0x678   :  { %1843 = vadd.xlane.f32.xlu0 %v1842_v46  ;;  %v1793_v32 = vpop.permute.xlu0 %1792 }
 0x679   :  { %v1791_v43 = vpop.permute.xlu1 %1790  ;;  %v1854_v4 = vsel %vm269_vm1, %v1793_v32, 0.0 }
 0x67a   :  { %v1851_v51 = vsel %vm269_vm1, %v1791_v43, 0.0 }
 0x67b   :  { %1852 = vadd.xlane.f32.xlu1 %v1851_v51 }
 0x67c   :  { %1849 = vadd.xlane.f32.xlu0 %v1848_v8  ;;  %v2006_v40 = vpop.permute.xlu0 %2005 }
 0x67d   :  { %v1795_v18 = vpop.permute.xlu1 %1794  ;;  %v2053_v46 = vsel %vm269_vm1, %v2006_v40, 0.0 }
 0x67e   :  { %v1857_v27 = vsel %vm269_vm1, %v1795_v18, 0.0 }
 0x67f   :  { %1858 = vadd.xlane.f32.xlu1 %v1857_v27 }
 0x680   :  { %1855 = vadd.xlane.f32.xlu0 %v1854_v4  ;;  %v2010_v41 = vpop.permute.xlu0 %2009 }
 0x681   :  { %v2008_v47 = vpop.permute.xlu1 %2007  ;;  %v2059_v8 = vsel %vm269_vm1, %v2010_v41, 0.0 }
 0x682   :  { %v2056_v5 = vsel %vm269_vm1, %v2008_v47, 0.0 }
 0x683   :  { %2057 = vadd.xlane.f32.xlu1 %v2056_v5 }
 0x684   :  { %2054 = vadd.xlane.f32.xlu0 %v2053_v46  ;;  %v2014_v43 = vpop.permute.xlu0 %2013 }
 0x685   :  { %v2012_v35 = vpop.permute.xlu1 %2011  ;;  %v2065_v4 = vsel %vm269_vm1, %v2014_v43, 0.0 }
 0x686   :  { %v2062_v51 = vsel %vm269_vm1, %v2012_v35, 0.0 }
 0x687   :  { %2063 = vadd.xlane.f32.xlu1 %v2062_v51 }
 0x688   :  { %2060 = vadd.xlane.f32.xlu0 %v2059_v8  ;;  %v2018_v18 = vpop.permute.xlu0 %2017 }
 0x689   :  { %v2016_v32 = vpop.permute.xlu1 %2015  ;;  %v2071_v46 = vsel %vm269_vm1, %v2018_v18, 0.0 }
 0x68a   :  { %v2068_v27 = vsel %vm269_vm1, %v2016_v32, 0.0 }
 0x68b   :  { %2069 = vadd.xlane.f32.xlu1 %v2068_v27 }
 0x68c   :  { %2066 = vadd.xlane.f32.xlu0 %v2065_v4  ;;  %v2022_v47 = vpop.permute.xlu0 %2021 }
 0x68d   :  { %v2020_v40 = vpop.permute.xlu1 %2019  ;;  %v2077_v8 = vsel %vm269_vm1, %v2022_v47, 0.0 }
 0x68e   :  { %v2074_v5 = vsel %vm269_vm1, %v2020_v40, 0.0 }
 0x68f   :  { %2075 = vadd.xlane.f32.xlu1 %v2074_v5 }
 0x690   :  { %2072 = vadd.xlane.f32.xlu0 %v2071_v46  ;;  %v2026_v35 = vpop.permute.xlu0 %2025 }
 0x691   :  { %v2024_v41 = vpop.permute.xlu1 %2023  ;;  %v2083_v4 = vsel %vm269_vm1, %v2026_v35, 0.0  ;;  %v5636_v35 = vld [vmem:[#allocation102_spill] sm:$0xff] }
 0x692   :  { %v2080_v51 = vsel %vm269_vm1, %v2024_v41, 0.0  ;;  %2694 = vrcp.f32 %v5636_v35 }
 0x693   :  { %2081 = vadd.xlane.f32.xlu1 %v2080_v51  ;;  %v4502_v51 = vpop.eup %2670 }
 0x694   :  { %2078 = vadd.xlane.f32.xlu0 %v2077_v8  ;;  %v2030_v32 = vpop.permute.xlu0 %2029 }
 0x695   :  { %v2028_v43 = vpop.permute.xlu1 %2027  ;;  %v2089_v40 = vsel %vm269_vm1, %v2030_v32, 0.0  ;;  %v4505_v32 = vpop.eup %2672 }
 0x696   :  { %v2086_v27 = vsel %vm269_vm1, %v2028_v43, 0.0  ;;  %v5637_v43 = vld [vmem:[#allocation103_spill] sm:$0xff] }
 0x697   :  { %2087 = vadd.xlane.f32.xlu1 %v2086_v27  ;;  %2696 = vrcp.f32 %v5637_v43  ;;  %v4508_v27 = vpop.eup %2674  ;;  %v5646_v43 = vld [vmem:[#allocation112_spill] sm:$0xff] }
 0x698   :  { %2084 = vadd.xlane.f32.xlu0 %v2083_v4  ;;  %v2034_v5 = vpop.permute.xlu0 %2033  ;;  %v5638_v4 = vld [vmem:[#allocation104_spill] sm:$0xff] }
 0x699   :  { %v2032_v18 = vpop.permute.xlu1 %2031  ;;  %v2095_v41 = vsel %vm269_vm1, %v2034_v5, 0.0  ;;  %2698 = vrcp.f32 %v5638_v4 }
 0x69a   :  { %v2092_v46 = vsel %vm269_vm1, %v2032_v18, 0.0  ;;  %v5639_v18 = vld [vmem:[#allocation105_spill] sm:$0xff] }
 0x69b   :  { %2093 = vadd.xlane.f32.xlu1 %v2092_v46  ;;  %2700 = vrcp.f32 %v5639_v18  ;;  %v5640_v46 = vld [vmem:[#allocation106_spill] sm:$0xff]  ;;  %v5647_v18 = vld [vmem:[#allocation113_spill] sm:$0xff] }
 0x69c   :  { %2090 = vadd.xlane.f32.xlu0 %v2089_v40  ;;  %v4511_v40 = vpop.eup %2676  ;;  %2702 = vrcp.f32 %v5640_v46 }
 0x69d   :  { %v2036_v47 = vpop.permute.xlu1 %2035  ;;  %v4514_v5 = vpop.eup %2678 }
 0x69e   :  { %v2098_v8 = vsel %vm269_vm1, %v2036_v47, 0.0  ;;  %v5641_v47 = vld [vmem:[#allocation107_spill] sm:$0xff] }
 0x69f   :  { %2099 = vadd.xlane.f32.xlu1 %v2098_v8  ;;  %2704 = vrcp.f32 %v5641_v47  ;;  %v5642_v8 = vld [vmem:[#allocation108_spill] sm:$0xff]  ;;  %v5648_v47 = vld [vmem:[#allocation114_spill] sm:$0xff] }
 0x6a0   :  { %2096 = vadd.xlane.f32.xlu0 %v2095_v41  ;;  %v4517_v41 = vpop.eup %2680  ;;  %2706 = vrcp.f32 %v5642_v8 }
 0x6a1   :  { %v4520_v20 = vpop.eup %2682  ;;  %2708 = vrcp.f32 %v5643_v33  ;;  %v5649_v33 = vld [vmem:[#allocation115_spill] sm:$0xff] }
 0x6a2   :  { %v4523_v29 = vpop.eup %2684  ;;  %2710 = vrcp.f32 %v5644_v49 }
 0x6a3   :  { %v4526_v59 = vpop.eup %2686  ;;  %2712 = vrcp.f32 %v5645_v55 }
 0x6a4   :  { %v4529_v35 = vpop.eup %2688  ;;  %2714 = vrcp.f32 %v5646_v43 }
 0x6a5   :  { %v4532_v4 = vpop.eup %2690  ;;  %2716 = vrcp.f32 %v5647_v18 }
 0x6a6   :  { %v4535_v46 = vpop.eup %2692  ;;  %2718 = vrcp.f32 %v5648_v47 }
 0x6a7   :  { %v4538_v8 = vpop.eup %2694  ;;  %2720 = vrcp.f32 %v5649_v33 }
 0x6a8   :  { %v4541_v49 = vpop.eup %2696  ;;  %2722 = vrcp.f32 %v5650_v17 }
 0x6a9   :  { %v4544_v55 = vpop.eup %2698  ;;  %2724 = vrcp.f32 %v5651_v31 }
 0x6aa   :  { %v4547_v43 = vpop.eup %2700  ;;  %2726 = vrcp.f32 %v5652_v22 }
 0x6ab   :  { %v4550_v18 = vpop.eup %2702  ;;  %2728 = vrcp.f32 %v5653_v62 }
 0x6ac   :  { %v4553_v47 = vpop.eup %2704  ;;  %2730 = vrcp.f32 %v5654_v61 }
 0x6ad   :  { %v4556_v33 = vpop.eup %2706  ;;  %2732 = vrcp.f32 %v5655_v7 }
 0x6ae   :  { %v4559_v17 = vpop.eup %2708  ;;  %2734 = vrcp.f32 %v5656_v36 }
 0x6af   :  { %v4562_v31 = vpop.eup %2710  ;;  %2736 = vrcp.f32 %v5657_v16  ;;  %v430_v16 = vmul.f32 %v4427_v45, %v5663_v26  ;;  %v5671_v26 = vld [vmem:[#allocation47_spill] sm:$0xff] }
 0x6b0   :  { %v4565_v22 = vpop.eup %2712  ;;  %2738 = vrcp.f32 %v5658_v23  ;;  %v431_v23 = vmul.f32 %v4430_v34, %v5664_v39  ;;  %v4598_v45 = vmul.f32 %v4442_v6, %v5671_v26  ;;  %v5672_v39 = vld [vmem:[#allocation131_spill] sm:$0xff]  ;;  %v5674_v34 = vld [vmem:[#allocation48_spill] sm:$0xff] }
 0x6b1   :  { %v4568_v62 = vpop.eup %2714  ;;  %2740 = vrcp.f32 %v5659_v48  ;;  %v5666_v48 = vld [vmem:[#allocation129_spill] sm:$0xff]  ;;  %v4605_v60 = vmul.f32 %v4445_v14, %v5674_v34  ;;  %v5679_v6 = vld [vmem:[#allocation19_spill] sm:$0xff] }
 0x6b2   :  { %v4571_v61 = vpop.eup %2716  ;;  %2742 = vrcp.f32 %v5660_v1  ;;  %v671_v26 = vmul.f32 %v4469_v11, %v5679_v6  ;;  %v5682_v34 = vld [vmem:[#allocation63_spill] sm:$0xff]  ;;  %v5688_v6 = vld [vmem:[#allocation64_spill] sm:$0xff] }
 0x6b3   :  { %v4574_v7 = vpop.eup %2718  ;;  %2744 = vrcp.f32 %v5661_v13  ;;  %v4592_v13 = vmul.f32 %v4436_v25, %v5669_v56  ;;  %v5676_v56 = vld [vmem:[#allocation132_spill] sm:$0xff]  ;;  %v5678_v25 = vld [vmem:[#allocation62_spill] sm:$0xff] }
 0x6b4   :  { %v4577_v36 = vpop.eup %2720  ;;  %2746 = vrcp.f32 %v5666_v48  ;;  %v5675_v48 = vld [vmem:[#allocation50_spill] sm:$0xff] }
 0x6b5   :  { %5662 = vst [vmem:[#allocation96_spill] sm:$0xff] %v4577_v36  ;;  %v4588_v1 = vpop.eup %2722  ;;  %v432_v36 = vmul.f32 %v4439_v15, %v5670_v9  ;;  %2748 = vrcp.f32 %v5672_v39  ;;  %v4616_v15 = vmul.f32 %v4451_v44, %v5678_v25  ;;  %v5680_v39 = vld [vmem:[#allocation134_spill] sm:$0xff]  ;;  %v5685_v44 = vld [vmem:[#allocation136_spill] sm:$0xff] }
 0x6b6   :  { %5668 = vst [vmem:[#allocation98_spill] sm:$0xff] %v4588_v1  ;;  %v4601_v2 = vpop.eup %2724  ;;  %2750 = vrcp.f32 %v5676_v56 }
 0x6b7   :  { %5673 = vst [vmem:[#allocation99_spill] sm:$0xff] %v4601_v2  ;;  %v4612_v9 = vpop.eup %2726  ;;  %2752 = vrcp.f32 %v5680_v39  ;;  %v4638_v39 = vmul.f32 %v4457_v52, %v5688_v6  ;;  %v5695_v52 = vld [vmem:[#allocation29_spill] sm:$0xff] }
 0x6b8   :  { %5677 = vst [vmem:[#allocation100_spill] sm:$0xff] %v4612_v9  ;;  %v4621_v14 = vpop.eup %2728  ;;  %v5684_v9 = vld [vmem:[#allocation23_spill] sm:$0xff]  ;;  %2754 = vrcp.f32 %v5685_v44  ;;  %v5694_v44 = vld [vmem:[#allocation78_spill] sm:$0xff]  ;;  %v1161_v6 = vmul.f32 %v4487_v53, %v5695_v52  ;;  %v5701_v52 = vld [vmem:[#allocation140_spill] sm:$0xff] }
 0x6b9   :  { %5681 = vst [vmem:[#allocation101_spill] sm:$0xff] %v4621_v14  ;;  %v912_v2 = vmul.f32 %v4475_v57, %v5684_v9  ;;  %v4634_v11 = vpop.eup %2730  ;;  %v5689_v14 = vld [vmem:[#allocation25_spill] sm:$0xff]  ;;  %v5693_v57 = vld [vmem:[#allocation66_spill] sm:$0xff] }
 0x6ba   :  { %5687 = vst [vmem:[#allocation103_spill] sm:$0xff] %v4634_v11  ;;  %v4649_v9 = vmul.f32 %v4460_v50, %v5693_v57  ;;  %v5696_v11 = vld [vmem:[#allocation138_spill] sm:$0xff]  ;;  %v5699_v57 = vld [vmem:[#allocation135_spill] sm:$0xff] }
 0x6e9   :  { %v4586_v38 = vpop.xlane.xlu0 %1813 }
 0x6ea   :  { %5667 = vst [vmem:[#allocation97_spill] sm:$0xff] %v4586_v38  ;;  %v4609_v38 = vmul.f32 %v4448_v58, %v5675_v48  ;;  %v4625_v58 = vmul.f32 %v4454_v30, %v5682_v34  ;;  %v5683_v48 = vld [vmem:[#allocation21_spill] sm:$0xff]  ;;  %v920_v30 = vmul.f32 %v4478_v12, %v5689_v14  ;;  %v5690_v34 = vld [vmem:[#allocation27_spill] sm:$0xff]  ;;  %v5697_v14 = vld [vmem:[#allocation34_spill] sm:$0xff] }
 0x6eb   :  { %v679_v56 = vmul.f32 %v4472_v0, %v5683_v48  ;;  %v1153_v1 = vmul.f32 %v4481_v24, %v5690_v34  ;;  %v5691_v0 = vld [vmem:[#allocation133_spill] sm:$0xff]  ;;  %v4645_v48 = vpop.eup %2732  ;;  %v2133_v24 = vsel %vm269_vm1, %v430_v16, %v671_v26  ;;  %v673_v34 = vmul.f32 %v4493_v10, %v5697_v14  ;;  %v4675_v16 = vpop.xlane.xlu1 %1816 }
 0x6ec   :  { %2756 = vrcp.f32 %v5691_v0  ;;  %5692 = vst [vmem:[#allocation104_spill] sm:$0xff] %v4645_v48  ;;  %v4658_v12 = vpop.eup %2734  ;;  %v5698_v0 = vld [vmem:[#allocation18_spill] sm:$0xff] }
 0x6ed   :  { %v4632_v25 = vpop.xlane.xlu0 %1819  ;;  %2758 = vrcp.f32 %v5696_v11  ;;  %v672_v50 = vmul.f32 %v4496_v19, %v5698_v0  ;;  %v4666_v48 = vpop.eup %2736  ;;  %v2141_v53 = vsel %vm269_vm1, %v438_v3, %v679_v56  ;;  %v2150_v11 = vsel %vm2149_vm9, %v2133_v24, %v912_v2  ;;  %v5703_v0 = vld [vmem:[#allocation80_spill] sm:$0xff]  ;;  %v5704_v3 = vld [vmem:[#allocation137_spill] sm:$0xff]  ;;  %v5706_v24 = vld [vmem:[#allocation35_spill] sm:$0xff] }
 0x6ee   :  { %5686 = vst [vmem:[#allocation102_spill] sm:$0xff] %v4632_v25  ;;  %v4653_v25 = vmul.f32 %v4463_v21, %v5694_v44  ;;  %2760 = vrcp.f32 %v5699_v57  ;;  %v5700_v21 = vld [vmem:[#allocation79_spill] sm:$0xff]  ;;  %v4679_v26 = vpop.eup %2738  ;;  %v2158_v19 = vsel %vm2149_vm9, %v2141_v53, %v920_v30  ;;  %v4683_v14 = vsel %vm2166_vm10, %v2150_v11, %v1153_v1  ;;  %v5709_v11 = vld [vmem:[#allocation81_spill] sm:$0xff] }
 0x6ef   :  { %v4670_v44 = vmul.f32 %v4466_v37, %v5700_v21  ;;  %2762 = vrcp.f32 %v5701_v52  ;;  %5702 = vst [vmem:[#allocation105_spill] sm:$0xff] %v4683_v14  ;;  %v4687_v37 = vmul.f32 %v4484_v42, %v5703_v0  ;;  %v4690_v2 = vpop.eup %2740  ;;  %v4693_v56 = vsel %vm2166_vm10, %v2158_v19, %v1161_v6  ;;  %v5707_v21 = vld [vmem:[#allocation20_spill] sm:$0xff]  ;;  %v5708_v53 = vld [vmem:[#allocation139_spill] sm:$0xff]  ;;  %v5710_v6 = vld [vmem:[#allocation141_spill] sm:$0xff] }
 0x6f0   :  { %2764 = vrcp.f32 %v5704_v3  ;;  %5705 = vst [vmem:[#allocation106_spill] sm:$0xff] %v4693_v56  ;;  %v681_v57 = vmul.f32 %v4499_v54, %v5706_v24  ;;  %v680_v30 = vmul.f32 %v4502_v51, %v5707_v21  ;;  %v4700_v1 = vpop.eup %2742  ;;  %v4704_v42 = vmul.f32 %v4490_v63, %v5709_v11  ;;  %v5711_v54 = vld [vmem:[#allocation36_spill] sm:$0xff]  ;;  %v5712_v51 = vld [vmem:[#allocation22_spill] sm:$0xff]  ;;  %v5713_v21 = vld [vmem:[#allocation37_spill] sm:$0xff] }
 0x6f1   :  { %v4677_v10 = vpop.xlane.xlu0 %1822  ;;  %2766 = vrcp.f32 %v5708_v53  ;;  %v2135_v52 = vsel %vm269_vm1, %v432_v36, %v673_v34  ;;  %v2134_v0 = vsel %vm269_vm1, %v431_v23, %v672_v50  ;;  %v4709_v19 = vpop.eup %2744  ;;  %v914_v3 = vmul.f32 %v4505_v32, %v5711_v54  ;;  %v5714_v56 = vld [vmem:[#allocation143_spill] sm:$0xff]  ;;  %v5716_v34 = vld [vmem:[#allocation24_spill] sm:$0xff]  ;;  %v5717_v11 = vld [vmem:[#allocation38_spill] sm:$0xff] }
 0x6f2   :  { %2768 = vrcp.f32 %v5710_v6  ;;  %v913_v24 = vmul.f32 %v4508_v27, %v5712_v51  ;;  %v922_v53 = vmul.f32 %v4511_v40, %v5713_v21  ;;  %v4722_v23 = vpop.eup %2746  ;;  %v921_v50 = vmul.f32 %v4514_v5, %v5716_v34  ;;  %v5718_v6 = vld [vmem:[#allocation26_spill] sm:$0xff]  ;;  %v5719_v54 = vld [vmem:[#allocation144_spill] sm:$0xff]  ;;  %v5720_v21 = vld [vmem:[#allocation39_spill] sm:$0xff] }
 0x6f3   :  { %2770 = vrcp.f32 %v5714_v56  ;;  %v1155_v32 = vmul.f32 %v4517_v41, %v5717_v11  ;;  %v1154_v27 = vmul.f32 %v4520_v20, %v5718_v6  ;;  %v4731_v40 = vpop.eup %2748  ;;  %v2143_v56 = vsel %vm269_vm1, %v4598_v45, %v681_v57  ;;  %v5721_v5 = vld [vmem:[#allocation145_spill] sm:$0xff]  ;;  %v5722_v41 = vld [vmem:[#allocation28_spill] sm:$0xff]  ;;  %v5725_v45 = vld [vmem:[#allocation142_spill] sm:$0xff] }
 0x6f4   :  { %v4718_v63 = vpop.xlane.xlu1 %1828  ;;  %2772 = vrcp.f32 %v5719_v54  ;;  %v2142_v51 = vsel %vm269_vm1, %v4592_v13, %v680_v30  ;;  %v1163_v14 = vmul.f32 %v4523_v29, %v5720_v21  ;;  %v4740_v34 = vpop.eup %2750  ;;  %v1162_v20 = vmul.f32 %v4526_v59, %v5722_v41  ;;  %v5723_v11 = vld [vmem:[#allocation40_spill] sm:$0xff]  ;;  %v5724_v54 = vld [vmem:[#allocation41_spill] sm:$0xff]  ;;  %v5726_v21 = vld [vmem:[#allocation146_spill] sm:$0xff] }
 0x6f5   :  { %v4720_v36 = vpop.xlane.xlu0 %1825  ;;  %2774 = vrcp.f32 %v5721_v5  ;;  %v674_v6 = vmul.f32 %v4529_v35, %v5723_v11  ;;  %v4749_v57 = vpop.eup %2752  ;;  %v2152_v13 = vsel %vm2149_vm9, %v2135_v52, %v914_v3  ;;  %v2151_v29 = vsel %vm2149_vm9, %v2134_v0, %v913_v24  ;;  %v5728_v3 = vld [vmem:[#allocation42_spill] sm:$0xff] }
 0x6f6   :  { %5715 = vst [vmem:[#allocation107_spill] sm:$0xff] %v4720_v36  ;;  %v682_v36 = vmul.f32 %v4532_v4, %v5724_v54  ;;  %2776 = vrcp.f32 %v5725_v45  ;;  %v2160_v30 = vsel %vm2149_vm9, %v2143_v56, %v922_v53  ;;  %v4759_v35 = vpop.eup %2754  ;;  %v2159_v4 = vsel %vm2149_vm9, %v2142_v51, %v921_v50  ;;  %v5729_v53 = vld [vmem:[#allocation43_spill] sm:$0xff]  ;;  %v5731_v51 = vld [vmem:[#allocation164_spill] sm:$0xff]  ;;  %v5733_v45 = vld [vmem:[#allocation45_spill] sm:$0xff] }
 0x6f7   :  { %2778 = vrcp.f32 %v5726_v21  ;;  %v4763_v41 = vsel %vm2166_vm10, %v2152_v13, %v1155_v32  ;;  %v4766_v11 = vsel %vm2166_vm10, %v2151_v29, %v1154_v27  ;;  %v4772_v0 = vsel %vm2166_vm10, %v2160_v30, %v1163_v14  ;;  %v5730_v50 = vld [vmem:[#allocation163_spill] sm:$0xff]  ;;  %v5734_v29 = vld [vmem:[#allocation49_spill] sm:$0xff] }
 0x6f8   :  { %v4755_v5 = vpop.xlane.xlu1 %1834  ;;  %2780 = vrcp.f32 %v4194_v28  ;;  %5727 = vst [vmem:[#allocation108_spill] sm:$0xff] %v4772_v0  ;;  %v915_v24 = vmul.f32 %v4535_v46, %v5728_v3  ;;  %v923_v56 = vmul.f32 %v4538_v8, %v5729_v53  ;;  %v4782_v27 = vsel %vm2166_vm10, %v2159_v4, %v1162_v20  ;;  %v5732_v46 = vld [vmem:[#allocation44_spill] sm:$0xff]  ;;  %v5735_v30 = vld [vmem:[#allocation165_spill] sm:$0xff]  ;;  %v5737_v4 = vld [vmem:[#allocation51_spill] sm:$0xff] }
 0x6f9   :  { %v4757_v59 = vpop.xlane.xlu0 %1831  ;;  %v4769_v52 = vpop.eup %2756  ;;  %2782 = vrcp.f32 %v5730_v50  ;;  %v2136_v28 = vsel %vm269_vm1, %v4605_v60, %v674_v6  ;;  %v2144_v14 = vsel %vm269_vm1, %v4609_v38, %v682_v36  ;;  %v1156_v8 = vmul.f32 %v4541_v49, %v5732_v46  ;;  %v5736_v36 = vld [vmem:[#allocation56_spill] sm:$0xff]  ;;  %v5738_v3 = vld [vmem:[#allocation57_spill] sm:$0xff]  ;;  %v5739_v53 = vld [vmem:[#allocation166_spill] sm:$0xff] }
 0x6fa   :  { %v4779_v32 = vpop.eup %2758  ;;  %2784 = vrcp.f32 %v5731_v51  ;;  %v1164_v13 = vmul.f32 %v4544_v55, %v5733_v45  ;;  %v675_v20 = vmul.f32 %v4547_v43, %v5734_v29  ;;  %v676_v6 = vmul.f32 %v4550_v18, %v5736_v36  ;;  %v5740_v46 = vld [vmem:[#allocation52_spill] sm:$0xff]  ;;  %v5741_v29 = vld [vmem:[#allocation167_spill] sm:$0xff]  ;;  %v5743_v36 = vld [vmem:[#allocation53_spill] sm:$0xff] }
 0x6fb   :  { %v4789_v54 = vpop.eup %2760  ;;  %2786 = vrcp.f32 %v5735_v30  ;;  %v683_v49 = vmul.f32 %v4553_v47, %v5737_v4  ;;  %v684_v55 = vmul.f32 %v4556_v33, %v5738_v3  ;;  %v2153_v50 = vsel %vm2149_vm9, %v2136_v28, %v915_v24  ;;  %v5742_v30 = vld [vmem:[#allocation58_spill] sm:$0xff]  ;;  %v5744_v4 = vld [vmem:[#allocation59_spill] sm:$0xff] }
 0x6fc   :  { %v4798_v21 = vpop.xlane.xlu1 %1840  ;;  %v4802_v38 = vpop.eup %2762  ;;  %2788 = vrcp.f32 %v5739_v53  ;;  %v2161_v51 = vsel %vm2149_vm9, %v2144_v14, %v923_v56  ;;  %v916_v45 = vmul.f32 %v4559_v17, %v5740_v46  ;;  %v917_v47 = vmul.f32 %v4562_v31, %v5742_v30  ;;  %v5745_v53 = vld [vmem:[#allocation168_spill] sm:$0xff]  ;;  %v5746_v31 = vld [vmem:[#allocation169_spill] sm:$0xff]  ;;  %v5769_v0 = vld [vmem:[#allocation103_spill] sm:$0xff] }
 0x6fd   :  { %v4800_v60 = vpop.xlane.xlu0 %1837  ;;  %v4811_v43 = vpop.eup %2764  ;;  %2790 = vrcp.f32 %v5741_v29  ;;  %v924_v33 = vmul.f32 %v4565_v22, %v5743_v36  ;;  %v925_v3 = vmul.f32 %v4568_v62, %v5744_v4  ;;  %v4830_v56 = vsel %vm2166_vm10, %v2153_v50, %v1156_v8  ;;  %v5748_v50 = vld [vmem:[#allocation170_spill] sm:$0xff]  ;;  %v5750_v30 = vld [vmem:[#allocation60_spill] sm:$0xff]  ;;  %v5751_v4 = vld [vmem:[#allocation171_spill] sm:$0xff] }
 0x6fe   :  { %v4818_v18 = vpop.eup %2766  ;;  %2792 = vrcp.f32 %v5745_v53  ;;  %v4833_v17 = vsel %vm2166_vm10, %v2161_v51, %v1164_v13  ;;  %v2137_v28 = vsel %vm269_vm1, %v4616_v15, %v675_v20  ;;  %v2138_v46 = vsel %vm269_vm1, %v4638_v39, %v676_v6  ;;  %v5749_v51 = vld [vmem:[#allocation54_spill] sm:$0xff]  ;;  %v5755_v53 = vld [vmem:[#allocation96_spill] sm:$0xff] }
 0x6ff   :  { %v4827_v24 = vpop.eup %2768  ;;  %2794 = vrcp.f32 %v5746_v31  ;;  %v2145_v8 = vsel %vm269_vm1, %v4625_v58, %v683_v49  ;;  %v2146_v13 = vsel %vm269_vm1, %v4649_v9, %v684_v55  ;;  %v2154_v20 = vsel %vm2149_vm9, %v2137_v28, %v916_v45  ;;  %v5752_v49 = vld [vmem:[#allocation172_spill] sm:$0xff]  ;;  %v5754_v45 = vld [vmem:[#allocation55_spill] sm:$0xff]  ;;  %v5756_v28 = vld [vmem:[#allocation61_spill] sm:$0xff] }
 0x700   :  { %v4838_v14 = vpop.xlane.xlu1 %1846  ;;  %v4842_v62 = vpop.eup %2770  ;;  %2796 = vrcp.f32 %v5748_v50  ;;  %v1157_v29 = vmul.f32 %v4571_v61, %v5749_v51  ;;  %v1158_v36 = vmul.f32 %v4574_v7, %v5750_v30  ;;  %v2155_v58 = vsel %vm2149_vm9, %v2138_v46, %v917_v47  ;;  %v5757_v31 = vld [vmem:[#allocation98_spill] sm:$0xff]  ;;  %v5758_v50 = vld [vmem:[#allocation65_spill] sm:$0xff]  ;;  %v5759_v51 = vld [vmem:[#allocation99_spill] sm:$0xff] }
 0x701   :  { %v4840_v22 = vpop.xlane.xlu0 %1843  ;;  %v4851_v15 = vpop.eup %2772  ;;  %2798 = vrcp.f32 %v5751_v4  ;;  %v2162_v9 = vsel %vm2149_vm9, %v2145_v8, %v924_v33  ;;  %v2163_v6 = vsel %vm2149_vm9, %v2146_v13, %v925_v3  ;;  %v1165_v61 = vmul.f32 %v5755_v53, %v5754_v45  ;;  %v5760_v4 = vld [vmem:[#allocation173_spill] sm:$0xff]  ;;  %v5764_v46 = vld [vmem:[#allocation67_spill] sm:$0xff]  ;;  %v5765_v8 = vld [vmem:[#allocation100_spill] sm:$0xff] }
 0x702   :  { %5747 = vst [vmem:[#allocation109_spill] sm:$0xff] %v4840_v22  ;;  %v4859_v39 = vpop.eup %2774  ;;  %2800 = vrcp.f32 %v5752_v49  ;;  %v1166_v7 = vmul.f32 %v5757_v31, %v5756_v28  ;;  %v677_v30 = vmul.f32 %v5759_v51, %v5758_v50  ;;  %v685_v13 = vmul.f32 %v5765_v8, %v5764_v46  ;;  %v5766_v49 = vld [vmem:[#allocation72_spill] sm:$0xff]  ;;  %v5770_v31 = vld [vmem:[#allocation174_spill] sm:$0xff]  ;;  %v5773_v22 = vld [vmem:[#allocation175_spill] sm:$0xff] }
 0x703   :  { %v4865_v55 = vpop.eup %2776  ;;  %2802 = vrcp.f32 %v5760_v4  ;;  %v5768_v53 = vld [vmem:[#allocation68_spill] sm:$0xff]  ;;  %v4890_v51 = vsel %vm2166_vm10, %v2154_v20, %v1157_v29  ;;  %v2172_v4 = vsel %vm2166_vm10, %v2155_v58, %v1158_v36  ;;  %v4908_v36 = vsel %vm2166_vm10, %v2162_v9, %v1165_v61  ;;  %v5778_v61 = vld [vmem:[#allocation97_spill] sm:$0xff] }
 0x704   :  { %5753 = vst [vmem:[#allocation110_spill] sm:$0xff] %v4865_v55  ;;  %v4874_v47 = vpop.xlane.xlu1 %1852  ;;  %v4878_v3 = vpop.eup %2778  ;;  %v5767_v55 = vld [vmem:[#allocation101_spill] sm:$0xff]  ;;  %v918_v28 = vmul.f32 %v5769_v0, %v5768_v53  ;;  %2804 = vrcp.f32 %v5770_v31  ;;  %v5775_v0 = vld [vmem:[#allocation74_spill] sm:$0xff]  ;;  %v5777_v20 = vld [vmem:[#allocation176_spill] sm:$0xff]  ;;  %v2139_v58 = vsel %vm269_vm1, %v4653_v25, %v677_v30 }
 0x705   :  { %5761 = vst [vmem:[#allocation111_spill] sm:$0xff] %v4874_v47  ;;  %v4876_v33 = vpop.xlane.xlu0 %1849  ;;  %5763 = vst [vmem:[#allocation113_spill] sm:$0xff] %v4878_v3  ;;  %v678_v45 = vmul.f32 %v5767_v55, %v5766_v49  ;;  %v4887_v50 = vpop.eup %2780  ;;  %v5772_v3 = vld [vmem:[#allocation104_spill] sm:$0xff]  ;;  %2806 = vrcp.f32 %v5773_v22  ;;  %v5774_v55 = vld [vmem:[#allocation69_spill] sm:$0xff]  ;;  %v919_v49 = vmul.f32 %v4666_v48, %v5775_v0  ;;  %v4911_v22 = vsel %vm2166_vm10, %v2163_v6, %v1166_v7 }
 0x706   :  { %5762 = vst [vmem:[#allocation112_spill] sm:$0xff] %v4876_v33  ;;  %v5771_v33 = vld [vmem:[#allocation73_spill] sm:$0xff]  ;;  %v4896_v46 = vpop.eup %2782  ;;  %v926_v8 = vmul.f32 %v4658_v12, %v5774_v55  ;;  %v5776_v53 = vld [vmem:[#allocation70_spill] sm:$0xff]  ;;  %2808 = vrcp.f32 %v5777_v20  ;;  %v2156_v6 = vsel %vm2149_vm9, %v2139_v58, %v918_v28  ;;  %v5785_v20 = vld [vmem:[#allocation88_spill] sm:$0xff] }
 0x707   :  { %v686_v47 = vmul.f32 %v5772_v3, %v5771_v33  ;;  %v1159_v31 = vmul.f32 %v4679_v26, %v5776_v53  ;;  %v4905_v29 = vpop.eup %2784  ;;  %2810 = vrcp.f32 %v4675_v16  ;;  %v2147_v33 = vsel %vm269_vm1, %v4670_v44, %v685_v13  ;;  %v5779_v16 = vld [vmem:[#allocation75_spill] sm:$0xff]  ;;  %v5780_v3 = vld [vmem:[#allocation76_spill] sm:$0xff]  ;;  %v5781_v0 = vld [vmem:[#allocation177_spill] sm:$0xff] }
 0x708   :  { %v4916_v12 = vpop.xlane.xlu1 %1858  ;;  %v4920_v26 = vpop.eup %2786  ;;  %v2140_v9 = vsel %vm269_vm1, %v4687_v37, %v678_v45  ;;  %2812 = vrcp.f32 %v5778_v61  ;;  %v927_v30 = vmul.f32 %v4690_v2, %v5779_v16  ;;  %v1160_v55 = vmul.f32 %v4709_v19, %v5780_v3  ;;  %v5782_v28 = vld [vmem:[#allocation102_spill] sm:$0xff] }
 0x709   :  { %v4918_v48 = vpop.xlane.xlu0 %1855  ;;  %v4928_v7 = vpop.eup %2788  ;;  %v2148_v25 = vsel %vm269_vm1, %v4704_v42, %v686_v47  ;;  %2814 = vrcp.f32 %v5781_v0  ;;  %v4940_v37 = vsel %vm2149_vm9, %v2147_v33, %v926_v8  ;;  %v2157_v13 = vsel %vm2149_vm9, %v2140_v9, %v919_v49  ;;  %v5783_v47 = vld [vmem:[#allocation71_spill] sm:$0xff]  ;;  %v5784_v19 = vld [vmem:[#allocation82_spill] sm:$0xff]  ;;  %v5789_v0 = vld [vmem:[#allocation77_spill] sm:$0xff] }
 0x70a   :  { %v4937_v44 = vpop.eup %2790  ;;  %v2173_v45 = vsel %vm2166_vm10, %v2156_v6, %v1159_v31  ;;  %2816 = vrcp.f32 %v5782_v28  ;;  %v4949_v2 = vmul.f32 %v4700_v1, %v5783_v47  ;;  %v1395_v53 = vmul.f32 %v4731_v40, %v5784_v19  ;;  %v5786_v31 = vld [vmem:[#allocation90_spill] sm:$0xff]  ;;  %v5787_v6 = vld [vmem:[#allocation92_spill] sm:$0xff] }
 0x70b   :  { %v4945_v42 = vpop.eup %2792  ;;  %v1399_v58 = vmul.f32 %v4740_v34, %v5785_v20  ;;  %2818 = vrcp.f32 %v4677_v10  ;;  %v1401_v9 = vmul.f32 %v4749_v57, %v5786_v31  ;;  %v1403_v1 = vmul.f32 %v4759_v35, %v5787_v6  ;;  %v5788_v10 = vld [vmem:[#allocation83_spill] sm:$0xff]  ;;  %v5790_v28 = vld [vmem:[#allocation94_spill] sm:$0xff]  ;;  %v5791_v47 = vld [vmem:[#allocation84_spill] sm:$0xff] }
 0x70c   :  { %v2058_v8 = vpop.xlane.xlu1 %2057  ;;  %v4956_v33 = vpop.eup %2794  ;;  %v4965_v40 = vsel %vm2149_vm9, %v2148_v25, %v927_v30  ;;  %v2174_v34 = vsel %vm2166_vm10, %v2157_v13, %v1160_v55  ;;  %v1394_v16 = vmul.f32 %v4769_v52, %v5788_v10  ;;  %v4974_v57 = vmul.f32 %v4722_v23, %v5789_v0  ;;  %v5792_v55 = vld [vmem:[#allocation95_spill] sm:$0xff] }
 0x70d   :  { %v2055_v49 = vpop.xlane.xlu0 %2054  ;;  %2820 = vrcp.f32 %v2058_v8  ;;  %v4962_v61 = vpop.eup %2796  ;;  %v1405_v35 = vmul.f32 %v4779_v32, %v5790_v28  ;;  %v1396_v19 = vmul.f32 %v4789_v54, %v5791_v47  ;;  %v2185_v52 = vsel %vm2183_vm11, %v4766_v11, %v1395_v53  ;;  %v5793_v13 = vld [vmem:[#allocation107_spill] sm:$0xff]  ;;  %v5794_v11 = vld [vmem:[#allocation86_spill] sm:$0xff]  ;;  %v5800_v28 = vld [vmem:[#allocation148_spill] sm:$0xff] }
 0x70e   :  { %2822 = vrcp.f32 %v2055_v49  ;;  %v4970_v3 = vpop.eup %2798  ;;  %v4986_v30 = vsel %vm2183_vm11, %v2172_v4, %v1399_v58  ;;  %v1407_v23 = vmul.f32 %v4802_v38, %v5792_v55  ;;  %v4994_v54 = vsel %vm2183_vm11, %v2174_v34, %v1401_v9  ;;  %v5795_v38 = vld [vmem:[#allocation105_spill] sm:$0xff]  ;;  %v5797_v6 = vld [vmem:[#allocation87_spill] sm:$0xff] }
 0x70f   :  { %2824 = vrcp.f32 %v4718_v63  ;;  %v4981_v25 = vpop.eup %2800  ;;  %v4998_v63 = vsel %vm2183_vm11, %v4782_v27, %v1403_v1  ;;  %v1397_v4 = vmul.f32 %v4811_v43, %v5794_v11  ;;  %v2184_v58 = vsel %vm2183_vm11, %v5795_v38, %v1394_v16  ;;  %v5796_v49 = vld [vmem:[#allocation85_spill] sm:$0xff] }
 0x710   :  { %2826 = vrcp.f32 %v5793_v13  ;;  %v2064_v20 = vpop.xlane.xlu1 %2063  ;;  %v4991_v8 = vpop.eup %2802  ;;  %v1398_v31 = vmul.f32 %v4818_v18, %v5796_v49  ;;  %v1400_v9 = vmul.f32 %v4827_v24, %v5797_v6  ;;  %v5014_v27 = vsel %vm2183_vm11, %v4833_v17, %v1405_v35  ;;  %v5798_v1 = vld [vmem:[#allocation89_spill] sm:$0xff]  ;;  %v5799_v24 = vld [vmem:[#allocation147_spill] sm:$0xff]  ;;  %v5803_v13 = vld [vmem:[#allocation106_spill] sm:$0xff] }
 0x711   :  { %v2061_v32 = vpop.xlane.xlu0 %2060  ;;  %2828 = vrcp.f32 %v2064_v20  ;;  %v5002_v53 = vpop.eup %2804  ;;  %v2186_v43 = vsel %vm2183_vm11, %v4763_v41, %v1396_v19  ;;  %v1402_v10 = vmul.f32 %v4842_v62, %v5798_v1  ;;  %v5025_v18 = vsel %vm2183_vm11, %v4911_v22, %v1407_v23  ;;  %v5801_v62 = vld [vmem:[#allocation149_spill] sm:$0xff]  ;;  %v5804_v20 = vld [vmem:[#allocation91_spill] sm:$0xff] }
 0x712   :  { %2830 = vrcp.f32 %v2061_v32  ;;  %v5010_v34 = vpop.eup %2806  ;;  %v1636_v0 = vmul.f32 %v4887_v50, %v5799_v24  ;;  %v1635_v17 = vmul.f32 %v4896_v46, %v5800_v28  ;;  %v1637_v19 = vmul.f32 %v4905_v29, %v5801_v62  ;;  %v5802_v46 = vld [vmem:[#allocation150_spill] sm:$0xff]  ;;  %v5805_v32 = vld [vmem:[#allocation93_spill] sm:$0xff]  ;;  %v5809_v24 = vld [vmem:[#allocation151_spill] sm:$0xff] }
 0x713   :  { %2832 = vrcp.f32 %v4755_v5  ;;  %v5021_v16 = vpop.eup %2808  ;;  %v2187_v5 = vsel %vm2183_vm11, %v4830_v56, %v1397_v4  ;;  %v2188_v50 = vsel %vm2183_vm11, %v4890_v51, %v1398_v31  ;;  %v5039_v55 = vsel %vm2183_vm11, %v2173_v45, %v1400_v9  ;;  %v5806_v4 = vld [vmem:[#allocation178_spill] sm:$0xff]  ;;  %v5807_v9 = vld [vmem:[#allocation179_spill] sm:$0xff] }
 0x714   :  { %2834 = vrcp.f32 %v4757_v59  ;;  %v2070_v41 = vpop.xlane.xlu1 %2069  ;;  %v2811_v47 = vpop.eup %2810  ;;  %v1638_v59 = vmul.f32 %v4920_v26, %v5802_v46  ;;  %v5047_v56 = vsel %vm2183_vm11, %v5803_v13, %v1402_v10  ;;  %v5051_v29 = vmul.f32 %v4851_v15, %v5804_v20  ;;  %v5808_v10 = vld [vmem:[#allocation153_spill] sm:$0xff] }
 0x715   :  { %v2067_v35 = vpop.xlane.xlu0 %2066  ;;  %2836 = vrcp.f32 %v2070_v41  ;;  %v2813_v22 = vpop.eup %2812  ;;  %v5055_v51 = vmul.f32 %v4859_v39, %v5805_v32  ;;  %v2202_v26 = vsel %vm2200_vm12, %v2185_v52, %v1636_v0  ;;  %v2201_v11 = vsel %vm2200_vm12, %v2184_v58, %v1635_v17  ;;  %v5811_v41 = vld [vmem:[#allocation181_spill] sm:$0xff] }
 0x716   :  { %2838 = vrcp.f32 %v2067_v35  ;;  %v5043_v23 = vpop.eup %2814  ;;  %v1877_v38 = vmul.f32 %v2811_v47, %v5806_v4  ;;  %v2203_v15 = vsel %vm2200_vm12, %v2186_v43, %v1637_v19  ;;  %v1876_v39 = vmul.f32 %v2813_v22, %v5807_v9  ;;  %v5810_v43 = vld [vmem:[#allocation195_spill] sm:$0xff]  ;;  %v5812_v47 = vld [vmem:[#allocation109_spill] sm:$0xff] }
 0x717   :  { %2840 = vrcp.f32 %v4798_v21  ;;  %v2817_v45 = vpop.eup %2816  ;;  %v2204_v21 = vsel %vm2200_vm12, %v2187_v5, %v1638_v59  ;;  %v1640_v52 = vmul.f32 %v4928_v7, %v5808_v10  ;;  %v5813_v5 = vld [vmem:[#allocation194_spill] sm:$0xff]  ;;  %v5815_v32 = vld [vmem:[#allocation5_spill] sm:$0xff] }
 0x718   :  { %2842 = vrcp.f32 %v4800_v60  ;;  %v2076_v49 = vpop.xlane.xlu1 %2075  ;;  %v2819_v6 = vpop.eup %2818  ;;  %v1639_v60 = vmul.f32 %v4937_v44, %v5809_v24  ;;  %v2219_v17 = vsel %vm2217_vm13, %v2202_v26, %v1877_v38  ;;  %v2218_v46 = vsel %vm2217_vm13, %v2201_v11, %v1876_v39  ;;  %v5814_v44 = vld [vmem:[#allocation180_spill] sm:$0xff] }
 0x719   :  { %v2073_v31 = vpop.xlane.xlu0 %2072  ;;  %2844 = vrcp.f32 %v2076_v49  ;;  %v1879_v35 = vmul.f32 %v2819_v6, %v5811_v41  ;;  %v1878_v59 = vmul.f32 %v2817_v45, %v5814_v44  ;;  %v2206_v20 = vsel %vm2200_vm12, %v4986_v30, %v1640_v52  ;;  %v5817_v45 = vld [vmem:[#allocation2_spill] sm:$0xff]  ;;  %v5818_v6 = vld [vmem:[#allocation197_spill] sm:$0xff]  ;;  %v5820_v52 = vld [vmem:[#allocation112_spill] sm:$0xff] }
 0x71a   :  { %v2821_v1 = vpop.eup %2820  ;;  %2846 = vrcp.f32 %v2073_v31  ;;  %v2205_v49 = vsel %vm2200_vm12, %v2188_v50, %v1639_v60  ;;  %v5816_v31 = vld [vmem:[#allocation111_spill] sm:$0xff]  ;;  %v5821_v50 = vld [vmem:[#allocation196_spill] sm:$0xff] }
 0x71b   :  { %v2823_v58 = vpop.eup %2822  ;;  %2848 = vrcp.f32 %v4838_v14  ;;  %v2118_v0 = vmul.f32 %v2821_v1, %v5810_v43  ;;  %v2221_v39 = vsel %vm2217_vm13, %v2204_v21, %v1879_v35  ;;  %v5819_v1 = vld [vmem:[#allocation183_spill] sm:$0xff] }
 0x71c   :  { %v2825_v28 = vpop.eup %2824  ;;  %2850 = vrcp.f32 %v5812_v47  ;;  %v2117_v7 = vmul.f32 %v2823_v58, %v5813_v5  ;;  %v2082_v62 = vpop.xlane.xlu1 %2081  ;;  %v5824_v5 = vld [vmem:[#allocation16_spill] sm:$0xff] }
 0x71d   :  { %v2079_v19 = vpop.xlane.xlu0 %2078  ;;  %v2827_v22 = vpop.eup %2826  ;;  %v2236_v14 = vsel %vm2234_vm14, %v2219_v17, %v2118_v0  ;;  %2852 = vrcp.f32 %v2082_v62  ;;  %v1881_v10 = vmul.f32 %v2825_v28, %v5819_v1  ;;  %v2220_v0 = vsel %vm2217_vm13, %v2203_v15, %v1878_v59  ;;  %v5822_v17 = vld [vmem:[#allocation182_spill] sm:$0xff]  ;;  %v5823_v28 = vld [vmem:[#allocation155_spill] sm:$0xff] }
 0x71e   :  { %v2829_v13 = vpop.eup %2828  ;;  %v2253_v26 = vsel %vm2251_vm15, %v2236_v14, %v5815_v32  ;;  %v2235_v4 = vsel %vm2234_vm14, %v2218_v46, %v2117_v7  ;;  %2854 = vrcp.f32 %v2079_v19  ;;  %v1880_v41 = vmul.f32 %v2827_v22, %v5822_v17  ;;  %v5825_v46 = vld [vmem:[#allocation152_spill] sm:$0xff]  ;;  %v5826_v15 = vld [vmem:[#allocation14_spill] sm:$0xff]  ;;  %v5828_v32 = vld [vmem:[#allocation185_spill] sm:$0xff] }
 0x71f   :  { %v2831_v38 = vpop.eup %2830  ;;  %2856 = vrcp.f32 %v5816_v31  ;;  %2270 = vst [vmem:[%s5277_s3 + $0x10] sm:$0xff] %v2253_v26  ;;  %v2252_v11 = vsel %vm2251_vm15, %v2235_v4, %v5817_v45  ;;  %v2120_v30 = vmul.f32 %v2829_v13, %v5818_v6  ;;  %v1642_v35 = vmul.f32 %v4945_v42, %v5823_v28  ;;  %v5827_v42 = vld [vmem:[#allocation199_spill] sm:$0xff] }
 0x720   :  { %v2833_v9 = vpop.eup %2832  ;;  %2858 = vrcp.f32 %v5820_v52  ;;  %2268 = vst [vmem:[%s5277_s3] sm:$0xff] %v2252_v11  ;;  %v2119_v58 = vmul.f32 %v2831_v38, %v5821_v50  ;;  %v2088_v24 = vpop.xlane.xlu1 %2087  ;;  %v1641_v44 = vmul.f32 %v4956_v33, %v5825_v46  ;;  %v2223_v13 = vsel %vm2217_vm13, %v2206_v20, %v1881_v10  ;;  %v5830_v11 = vld [vmem:[#allocation184_spill] sm:$0xff] }
 0x721   :  { %v2085_v60 = vpop.xlane.xlu0 %2084  ;;  %v2835_v43 = vpop.eup %2834  ;;  %v2238_v47 = vsel %vm2234_vm14, %v2221_v39, %v2120_v30  ;;  %2860 = vrcp.f32 %v2088_v24  ;;  %v1883_v26 = vmul.f32 %v2833_v9, %v5828_v32  ;;  %v2222_v45 = vsel %vm2217_vm13, %v2205_v49, %v1880_v41  ;;  %v5831_v9 = vld [vmem:[#allocation157_spill] sm:$0xff]  ;;  %v5832_v39 = vld [vmem:[#allocation8_spill] sm:$0xff]  ;;  %v5833_v49 = vld [vmem:[#allocation154_spill] sm:$0xff] }
 0x722   :  { %v2837_v21 = vpop.eup %2836  ;;  %v2255_v7 = vsel %vm2251_vm15, %v2238_v47, %v5824_v5  ;;  %v2237_v62 = vsel %vm2234_vm14, %v2220_v0, %v2119_v58  ;;  %2862 = vrcp.f32 %v2085_v60  ;;  %v1882_v6 = vmul.f32 %v2835_v43, %v5830_v11  ;;  %v5834_v24 = vld [vmem:[#allocation6_spill] sm:$0xff]  ;;  %v5835_v60 = vld [vmem:[#allocation201_spill] sm:$0xff]  ;;  %v5836_v47 = vld [vmem:[#allocation187_spill] sm:$0xff] }
 0x723   :  { %v2839_v19 = vpop.eup %2838  ;;  %2864 = vrcp.f32 %v4916_v12  ;;  %2274 = vst [vmem:[%s5277_s3 + $0x30] sm:$0xff] %v2255_v7  ;;  %v2254_v22 = vsel %vm2251_vm15, %v2237_v62, %v5826_v15  ;;  %v2122_v59 = vmul.f32 %v2837_v21, %v5827_v42  ;;  %v5829_v12 = vld [vmem:[#allocation198_spill] sm:$0xff]  ;;  %v2208_v50 = vsel %vm2200_vm12, %v4994_v54, %v1642_v35  ;;  %v5839_v15 = vld [vmem:[#allocation12_spill] sm:$0xff]  ;;  %v5844_v11 = vld [vmem:[#allocation189_spill] sm:$0xff] }
 0x724   :  { %v2841_v14 = vpop.eup %2840  ;;  %2866 = vrcp.f32 %v4918_v48  ;;  %2272 = vst [vmem:[%s5277_s3 + $0x20] sm:$0xff] %v2254_v22  ;;  %v2121_v33 = vmul.f32 %v2839_v19, %v5829_v12  ;;  %v2094_v4 = vpop.xlane.xlu1 %2093  ;;  %v1644_v48 = vmul.f32 %v4962_v61, %v5831_v9  ;;  %v1643_v58 = vmul.f32 %v4970_v3, %v5833_v49  ;;  %v5837_v3 = vld [vmem:[#allocation200_spill] sm:$0xff]  ;;  %v5838_v62 = vld [vmem:[#allocation186_spill] sm:$0xff]  ;;  %v5842_v12 = vld [vmem:[#allocation203_spill] sm:$0xff] }
 0x725   :  { %v2091_v38 = vpop.xlane.xlu0 %2090  ;;  %v2843_v31 = vpop.eup %2842  ;;  %v2240_v30 = vsel %vm2234_vm14, %v2223_v13, %v2122_v59  ;;  %2868 = vrcp.f32 %v2094_v4  ;;  %v2207_v17 = vsel %vm2200_vm12, %v5039_v55, %v1641_v44  ;;  %v2225_v41 = vsel %vm2217_vm13, %v2208_v50, %v1883_v26  ;;  %v5840_v13 = vld [vmem:[#allocation159_spill] sm:$0xff]  ;;  %v5841_v26 = vld [vmem:[#allocation10_spill] sm:$0xff]  ;;  %v5848_v50 = vld [vmem:[#allocation161_spill] sm:$0xff] }
 0x726   :  { %v2845_v20 = vpop.eup %2844  ;;  %v2257_v1 = vsel %vm2251_vm15, %v2240_v30, %v5832_v39  ;;  %v2239_v10 = vsel %vm2234_vm14, %v2222_v45, %v2121_v33  ;;  %2870 = vrcp.f32 %v2091_v38  ;;  %v1885_v54 = vmul.f32 %v2841_v14, %v5836_v47  ;;  %v5843_v38 = vld [vmem:[#allocation156_spill] sm:$0xff] }
 0x727   :  { %v2847_v52 = vpop.eup %2846  ;;  %2278 = vst [vmem:[%s5277_s3 + $0x50] sm:$0xff] %v2257_v1  ;;  %v2256_v61 = vsel %vm2251_vm15, %v2239_v10, %v5834_v24  ;;  %v2124_v43 = vmul.f32 %v2845_v20, %v5835_v60  ;;  %v2224_v7 = vsel %vm2217_vm13, %v2207_v17, %v1882_v6  ;;  %v1884_v19 = vmul.f32 %v2843_v31, %v5838_v62  ;;  %v5846_v20 = vld [vmem:[#allocation108_spill] sm:$0xff] }
 0x728   :  { %v2849_v0 = vpop.eup %2848  ;;  %2276 = vst [vmem:[%s5277_s3 + $0x40] sm:$0xff] %v2256_v61  ;;  %v2123_v21 = vmul.f32 %v2847_v52, %v5837_v3  ;;  %v2100_v28 = vpop.xlane.xlu1 %2099  ;;  %v2210_v44 = vsel %vm2200_vm12, %v4998_v63, %v1644_v48  ;;  %v2209_v14 = vsel %vm2200_vm12, %v5047_v56, %v1643_v58  ;;  %v1646_v32 = vmul.f32 %v4981_v25, %v5840_v13  ;;  %v5845_v25 = vld [vmem:[#allocation202_spill] sm:$0xff]  ;;  %v5847_v39 = vld [vmem:[#allocation188_spill] sm:$0xff]  ;;  %v5853_v3 = vld [vmem:[#allocation191_spill] sm:$0xff] }
 0x729   :  { %v2097_v35 = vpop.xlane.xlu0 %2096  ;;  %v2851_v5 = vpop.eup %2850  ;;  %v2242_v46 = vsel %vm2234_vm14, %v2225_v41, %v2124_v43  ;;  %2872 = vrcp.f32 %v2100_v28  ;;  %v1645_v31 = vmul.f32 %v4991_v8, %v5843_v38  ;;  %v2227_v45 = vsel %vm2217_vm13, %v2210_v44, %v1885_v54  ;;  %v5849_v58 = vld [vmem:[#allocation4_spill] sm:$0xff]  ;;  %v5850_v43 = vld [vmem:[#allocation158_spill] sm:$0xff] }
 0x72a   :  { %v2853_v55 = vpop.eup %2852  ;;  %v2259_v22 = vsel %vm2251_vm15, %v2242_v46, %v5839_v15  ;;  %v2241_v42 = vsel %vm2234_vm14, %v2224_v7, %v2123_v21  ;;  %2874 = vrcp.f32 %v2097_v35  ;;  %v1887_v56 = vmul.f32 %v2849_v0, %v5844_v11  ;;  %v5855_v35 = vld [vmem:[#allocation127_spill] sm:$0xff]  ;;  %v5858_v15 = vld [vmem:[#allocation130_spill] sm:$0xff] }
 0x72b   :  { %v2855_v59 = vpop.eup %2854  ;;  %2282 = vst [vmem:[%s5277_s3 + $0x70] sm:$0xff] %v2259_v22  ;;  %v2258_v63 = vsel %vm2251_vm15, %v2241_v42, %v5841_v26  ;;  %v2126_v33 = vmul.f32 %v2853_v55, %v5842_v12  ;;  %v2194_v9 = vsel %vm2183_vm11, %v5846_v20, %v5051_v29  ;;  %v2226_v48 = vsel %vm2217_vm13, %v2209_v14, %v1884_v19  ;;  %v5857_v19 = vld [vmem:[#allocation190_spill] sm:$0xff]  ;;  %v5859_v22 = vld [vmem:[#allocation113_spill] sm:$0xff] }
 0x72c   :  { %v2857_v4 = vpop.eup %2856  ;;  %2280 = vst [vmem:[%s5277_s3 + $0x60] sm:$0xff] %v2258_v63  ;;  %v2125_v6 = vmul.f32 %v2855_v59, %v5845_v25  ;;  %v1886_v1 = vmul.f32 %v2851_v5, %v5847_v39  ;;  %v2196_v52 = vsel %vm2183_vm11, %v4908_v36, %v5055_v51  ;;  %v1648_v49 = vmul.f32 %v5002_v53, %v5848_v50  ;;  %v5851_v36 = vld [vmem:[#allocation3_spill] sm:$0xff]  ;;  %v5852_v53 = vld [vmem:[#allocation205_spill] sm:$0xff]  ;;  %v5856_v5 = vld [vmem:[#allocation110_spill] sm:$0xff] }
 0x72d   :  { %v2859_v30 = vpop.eup %2858  ;;  %v2244_v8 = vsel %vm2234_vm14, %v2227_v45, %v2126_v33  ;;  %v2212_v60 = vsel %vm2200_vm12, %v5014_v27, %v1646_v32  ;;  %v1647_v0 = vmul.f32 %v5010_v34, %v5850_v43  ;;  %v2211_v47 = vsel %vm2200_vm12, %v2194_v9, %v1645_v31  ;;  %v5854_v34 = vld [vmem:[#allocation204_spill] sm:$0xff]  ;;  %v5860_v14 = vld [vmem:[#allocation17_spill] sm:$0xff]  ;;  %v5861_v12 = vld [vmem:[#allocation162_spill] sm:$0xff] }
 0x72e   :  { %v2861_v10 = vpop.eup %2860  ;;  %v2261_v24 = vsel %vm2251_vm15, %v2244_v8, %v5849_v58  ;;  %v2243_v61 = vsel %vm2234_vm14, %v2226_v48, %v2125_v6  ;;  %v2229_v54 = vsel %vm2217_vm13, %v2212_v60, %v1887_v56  ;;  %v1889_v21 = vmul.f32 %v2857_v4, %v5853_v3  ;;  %v5862_v4 = vld [vmem:[#allocation15_spill] sm:$0xff]  ;;  %v5864_v45 = vld [vmem:[#allocation160_spill] sm:$0xff]  ;;  %v5865_v25 = vld [vmem:[#allocation193_spill] sm:$0xff] }
 0x72f   :  { %v2863_v29 = vpop.eup %2862  ;;  %2286 = vst [vmem:[%s5277_s3 + $0x90] sm:$0xff] %v2261_v24  ;;  %v2260_v51 = vsel %vm2251_vm15, %v2243_v61, %v5851_v36  ;;  %v2128_v17 = vmul.f32 %v2861_v10, %v5852_v53  ;;  %v1409_v7 = vmul.f32 %v5856_v5, %v5855_v35  ;;  %v2228_v62 = vsel %vm2217_vm13, %v2211_v47, %v1886_v1  ;;  %v5863_v31 = vld [vmem:[#allocation207_spill] sm:$0xff]  ;;  %v5867_v48 = vld [vmem:[#allocation192_spill] sm:$0xff]  ;;  %v5872_v53 = vld [vmem:[#allocation13_spill] sm:$0xff] }
 0x730   :  { %v2865_v41 = vpop.eup %2864  ;;  %2284 = vst [vmem:[%s5277_s3 + $0x80] sm:$0xff] %v2260_v51  ;;  %v2127_v27 = vmul.f32 %v2863_v29, %v5854_v34  ;;  %v1888_v46 = vmul.f32 %v2859_v30, %v5857_v19  ;;  %v1408_v42 = vmul.f32 %v5859_v22, %v5858_v15  ;;  %v2214_v59 = vsel %vm2200_vm12, %v5025_v18, %v1648_v49  ;;  %v5869_v24 = vld [vmem:[#allocation7_spill] sm:$0xff]  ;;  %v5871_v43 = vld [vmem:[#allocation208_spill] sm:$0xff] }
 0x731   :  { %v2867_v28 = vpop.eup %2866  ;;  %v2246_v55 = vsel %vm2234_vm14, %v2229_v54, %v2128_v17  ;;  %v2213_v63 = vsel %vm2200_vm12, %v2196_v52, %v1647_v0  ;;  %v1650_v33 = vmul.f32 %v5021_v16, %v5861_v12  ;;  %v1649_v11 = vmul.f32 %v5043_v23, %v5864_v45  ;;  %v5866_v16 = vld [vmem:[#allocation206_spill] sm:$0xff]  ;;  %v5868_v52 = vld [vmem:[#allocation9_spill] sm:$0xff]  ;;  %v5873_v47 = vld [vmem:[#allocation11_spill] sm:$0xff] }
 0x732   :  { %v2869_v44 = vpop.eup %2868  ;;  %v2263_v13 = vsel %vm2251_vm15, %v2246_v55, %v5860_v14  ;;  %v2245_v32 = vsel %vm2234_vm14, %v2228_v62, %v2127_v27  ;;  %v2231_v56 = vsel %vm2217_vm13, %v2214_v59, %v1889_v21  ;;  %v1891_v6 = vmul.f32 %v2865_v41, %v5865_v25 }
 0x733   :  { %v2871_v26 = vpop.eup %2870  ;;  %2290 = vst [vmem:[%s5277_s3 + $0xb0] sm:$0xff] %v2263_v13  ;;  %v2262_v38 = vsel %vm2251_vm15, %v2245_v32, %v5862_v4  ;;  %v2130_v18 = vmul.f32 %v2869_v44, %v5863_v31  ;;  %v2182_v20 = vsel %vm2166_vm10, %v4965_v40, %v4974_v57  ;;  %v2230_v9 = vsel %vm2217_vm13, %v2213_v63, %v1888_v46 }
 0x734   :  { %2288 = vst [vmem:[%s5277_s3 + $0xa0] sm:$0xff] %v2262_v38  ;;  %v2129_v30 = vmul.f32 %v2871_v26, %v5866_v16  ;;  %v1890_v39 = vmul.f32 %v2867_v28, %v5867_v48  ;;  %v2181_v8 = vsel %vm2166_vm10, %v4940_v37, %v4949_v2  ;;  %v2199_v10 = vsel %vm2183_vm11, %v2182_v20, %v1409_v7  ;;  %v5870_v37 = vld [vmem:[#allocation209_spill] sm:$0xff] }
 0x735   :  { %v2248_v23 = vsel %vm2234_vm14, %v2231_v56, %v2130_v18  ;;  %v2198_v40 = vsel %vm2183_vm11, %v2181_v8, %v1408_v42  ;;  %v2216_v57 = vsel %vm2200_vm12, %v2199_v10, %v1650_v33 }
 0x736   :  { %v2873_v1 = vpop.eup %2872  ;;  %v2265_v50 = vsel %vm2251_vm15, %v2248_v23, %v5868_v52  ;;  %v2247_v49 = vsel %vm2234_vm14, %v2230_v9, %v2129_v30  ;;  %v2215_v29 = vsel %vm2200_vm12, %v2198_v40, %v1649_v11  ;;  %v2233_v60 = vsel %vm2217_vm13, %v2216_v57, %v1891_v6 }
 0x737   :  { %v2875_v58 = vpop.eup %2874  ;;  %2294 = vst [vmem:[%s5277_s3 + $0xd0] sm:$0xff] %v2265_v50  ;;  %v2264_v61 = vsel %vm2251_vm15, %v2247_v49, %v5869_v24  ;;  %v2132_v2 = vmul.f32 %v2873_v1, %v5870_v37  ;;  %v2232_v36 = vsel %vm2217_vm13, %v2215_v29, %v1890_v39 }
 0x738   :  { %2292 = vst [vmem:[%s5277_s3 + $0xc0] sm:$0xff] %v2264_v61  ;;  %v2131_v0 = vmul.f32 %v2875_v58, %v5871_v43 }
 0x739   :  { %v2250_v51 = vsel %vm2234_vm14, %v2233_v60, %v2132_v2 }
 0x73a   :  { %v2267_v17 = vsel %vm2251_vm15, %v2250_v51, %v5872_v53  ;;  %v2249_v41 = vsel %vm2234_vm14, %v2232_v36, %v2131_v0 }
 0x73b   :  { %2298 = vst [vmem:[%s5277_s3 + $0xf0] sm:$0xff] %v2267_v17  ;;  %v2266_v54 = vsel %vm2251_vm15, %v2249_v41, %v5873_v47 }
 0x73c   :  { %2296 = vst [vmem:[%s5277_s3 + $0xe0] sm:$0xff] %v2266_v54 }

// kernel: detr_forward.5
= control target key start
LH: loop header
LB: loop body
LE: loop exit
PB: predicated region body
PF: predicated region fallthrough
CT: control target
= control target key end

     0   :  { %vm110_vm0 = vcmask 523264   ;;  %s460_s1 = inlined_call_operand.vmem [shape: bf16[64,64], index: 1, kind: input, shape index: {}]   ;;  %s461_s0 = inlined_call_operand.vmem [shape: bf16[128,64], index: 0, kind: input, shape index: {}]   ;;  %s462_s2 = inlined_call_operand.vmem [shape: f32[1,64], index: 2, kind: input, shape index: {}]   ;;  %s463_s3 = inlined_call_operand.vmem [shape: f32[128,64], index: 3, kind: output, shape index: {}]  }
   0x1   :  { %v317_v0 = vld [vmem:[%s460_s1 + $0x18] sm:$0xff]   ;;  %v318_v1 = vld [vmem:[%s460_s1 + $0x10] sm:$0xff]   ;;  %v319_v2 = vld [vmem:[%s460_s1 + $0x8] sm:$0xff]  }
   0x2   :  { %285 = vmatprep.subr.bf16.mxu0 %v317_v0  ;;  %309 = vmatprep.subr.bf16.mxu1 %v317_v0  ;;  %v321_v3 = vld [vmem:[%s461_s0] sm:$0xff]   ;;  %v323_v6 = vld [vmem:[%s461_s0 + $0x8] sm:$0xff]   ;;  %v325_v8 = vld [vmem:[%s461_s0 + $0x10] sm:$0xff]  }
   0x3   :  { %286 = vmatpush3.bf16.msra.mxu0 %v317_v0  ;;  %313 = vmatpush3.bf16.msra.mxu1 %v317_v0  ;;  %v322_v4 = vld [vmem:[%s461_s0 + $0x20] sm:$0xff]   ;;  %v324_v7 = vld [vmem:[%s461_s0 + $0x28] sm:$0xff]   ;;  %v326_v9 = vld [vmem:[%s461_s0 + $0x30] sm:$0xff]  }
   0x4   :  { %287 = vmatprep.subr.bf16.mxu0 %v318_v1  ;;  %310 = vmatprep.subr.bf16.mxu1 %v318_v1  ;;  %v320_v5 = vld [vmem:[%s460_s1] sm:$0xff]   ;;  %v327_v10 = vld [vmem:[%s461_s0 + $0x18] sm:$0xff]  }
   0x5   :  { %293 = vmatprep.mubr.msk.bf16.mxu0 %vm110_vm0, %v321_v3  ;;  %301 = vmatprep.mubr.msk.bf16.mxu1 %vm110_vm0, %v322_v4  ;;  %v328_v11 = vld [vmem:[%s461_s0 + $0x38] sm:$0xff]   ;;  %v252_v12 = vld [vmem:[%s462_s2] ss:$0 sm:$0xff] }
   0x7   :  { %288 = vmatpush3.bf16.msra.mxu0 %v318_v1  ;;  %314 = vmatpush3.bf16.msra.mxu1 %v318_v1 }
   0x8   :  { %289 = vmatprep.subr.bf16.mxu0 %v319_v2  ;;  %311 = vmatprep.subr.bf16.mxu1 %v319_v2 }
   0xb   :  { %290 = vmatpush3.bf16.msra.mxu0 %v319_v2  ;;  %315 = vmatpush3.bf16.msra.mxu1 %v319_v2 }
   0xc   :  { %291 = vmatprep.subr.bf16.mxu0 %v320_v5  ;;  %312 = vmatprep.subr.bf16.mxu1 %v320_v5 }
   0xf   :  { %292 = vmatpush3.bf16.msra.mxu0 %v320_v5  ;;  %316 = vmatpush3.bf16.msra.mxu1 %v320_v5 }
  0x12   :  { %294 = vmatmul.mubr.msk.bf16.vlgmr.msra.gmra.mxu0 %vm110_vm0, %v323_v6  ;;  %302 = vmatmul.mubr.msk.bf16.vlgmr.msra.gmra.mxu1 %vm110_vm0, %v324_v7 }
  0x13   :  { %297 = vmatprep.mubr.msk.bf16.mxu0 %vm110_vm0, %v325_v8  ;;  %305 = vmatprep.mubr.msk.bf16.mxu1 %vm110_vm0, %v326_v9 }
  0x1a   :  { %298 = vmatmul.mubr.msk.bf16.gmra.mxu0 %vm110_vm0, %v327_v10  ;;  %306 = vmatmul.mubr.msk.bf16.gmra.mxu1 %vm110_vm0, %v328_v11 }
  0xd2   :  { %v295_v13 = vpop.f32.mrf.mxu0  ;;  %v303_v14 = vpop.f32.mrf.mxu1 }
  0xd3   :  { %v178_v15 = vadd.f32 %v295_v13, %v252_v12  ;;  %v210_v16 = vadd.f32 %v303_v14, %v252_v12 }
  0xd4   :  { %v169_v17 = vpop.f32.mrf.mxu0  ;;  %v201_v18 = vpop.f32.mrf.mxu1 }
  0xd5   :  { %234 = vst.msk [vmem:[%s463_s3 + $0x10] sm:$0xff] %vm110_vm0, %v178_v15  ;;  %242 = vst.msk [vmem:[%s463_s3 + $0x50] sm:$0xff] %vm110_vm0, %v210_v16  ;;  %v170_v19 = vadd.f32 %v252_v12, %v169_v17  ;;  %v202_v20 = vadd.f32 %v252_v12, %v201_v18 }
  0xd6   :  { %v296_v21 = vpop.f32.mrf.mxu0  ;;  %v304_v22 = vpop.f32.mrf.mxu1 }
  0xd7   :  { %232 = vst.msk [vmem:[%s463_s3] sm:$0xff] %vm110_vm0, %v170_v19  ;;  %240 = vst.msk [vmem:[%s463_s3 + $0x40] sm:$0xff] %vm110_vm0, %v202_v20  ;;  %v181_v23 = vadd.f32 %v296_v21, %v252_v12  ;;  %v213_v24 = vadd.f32 %v304_v22, %v252_v12 }
  0xd8   :  { %v172_v25 = vpop.f32.mrf.mxu0  ;;  %v204_v26 = vpop.f32.mrf.mxu1 }
  0xd9   :  { %235 = vst.msk [vmem:[%s463_s3 + $0x18] sm:$0xff] %vm110_vm0, %v181_v23  ;;  %243 = vst.msk [vmem:[%s463_s3 + $0x58] sm:$0xff] %vm110_vm0, %v213_v24  ;;  %v173_v27 = vadd.f32 %v252_v12, %v172_v25  ;;  %v205_v28 = vadd.f32 %v252_v12, %v204_v26 }
  0xda   :  { %v299_v29 = vpop.f32.mrf.mxu0  ;;  %v307_v30 = vpop.f32.mrf.mxu1 }
  0xdb   :  { %233 = vst.msk [vmem:[%s463_s3 + $0x8] sm:$0xff] %vm110_vm0, %v173_v27  ;;  %241 = vst.msk [vmem:[%s463_s3 + $0x48] sm:$0xff] %vm110_vm0, %v205_v28  ;;  %v194_v31 = vadd.f32 %v299_v29, %v252_v12  ;;  %v226_v32 = vadd.f32 %v307_v30, %v252_v12 }
  0xdc   :  { %v185_v33 = vpop.f32.mrf.mxu0  ;;  %v217_v34 = vpop.f32.mrf.mxu1 }
  0xdd   :  { %238 = vst.msk [vmem:[%s463_s3 + $0x30] sm:$0xff] %vm110_vm0, %v194_v31  ;;  %246 = vst.msk [vmem:[%s463_s3 + $0x70] sm:$0xff] %vm110_vm0, %v226_v32  ;;  %v186_v35 = vadd.f32 %v252_v12, %v185_v33  ;;  %v218_v36 = vadd.f32 %v252_v12, %v217_v34 }
  0xde   :  { %v300_v37 = vpop.f32.mrf.mxu0  ;;  %v308_v38 = vpop.f32.mrf.mxu1 }
  0xdf   :  { %236 = vst.msk [vmem:[%s463_s3 + $0x20] sm:$0xff] %vm110_vm0, %v186_v35  ;;  %244 = vst.msk [vmem:[%s463_s3 + $0x60] sm:$0xff] %vm110_vm0, %v218_v36  ;;  %v197_v39 = vadd.f32 %v300_v37, %v252_v12  ;;  %v229_v40 = vadd.f32 %v308_v38, %v252_v12 }
  0xe0   :  { %v188_v41 = vpop.f32.mrf.mxu0  ;;  %v220_v42 = vpop.f32.mrf.mxu1 }
  0xe1   :  { %239 = vst.msk [vmem:[%s463_s3 + $0x38] sm:$0xff] %vm110_vm0, %v197_v39  ;;  %247 = vst.msk [vmem:[%s463_s3 + $0x78] sm:$0xff] %vm110_vm0, %v229_v40  ;;  %v189_v43 = vadd.f32 %v252_v12, %v188_v41  ;;  %v221_v44 = vadd.f32 %v252_v12, %v220_v42 }
  0xe3   :  { %237 = vst.msk [vmem:[%s463_s3 + $0x28] sm:$0xff] %vm110_vm0, %v189_v43  ;;  %245 = vst.msk [vmem:[%s463_s3 + $0x68] sm:$0xff] %vm110_vm0, %v221_v44 }

// kernel: detr_forward.7
= control target key start
LH: loop header
LB: loop body
LE: loop exit
PB: predicated region body
PF: predicated region fallthrough
CT: control target
= control target key end

     0   :  { %vm113_vm0 = vcmask 523264   ;;  %s1191_s2 = inlined_call_operand.vmem [shape: bf16[64,64], index: 2, kind: input, shape index: {}]   ;;  %s1192_s0 = inlined_call_operand.vmem [shape: bf16[128,64], index: 0, kind: input, shape index: {}]   ;;  %s1193_s1 = inlined_call_operand.vmem [shape: f32[128,64], index: 1, kind: input, shape index: {}]   ;;  %s1194_s3 = inlined_call_operand.vmem [shape: f32[1,64], index: 3, kind: input, shape index: {}]   ;;  %s1195_s4 = inlined_call_operand.vmem [shape: f32[128,128], index: 4, kind: output, shape index: {}]  }
   0x1   :  { %v673_v0 = vld [vmem:[%s1191_s2 + $0x18] sm:$0xff]   ;;  %v674_v1 = vld [vmem:[%s1191_s2 + $0x10] sm:$0xff]   ;;  %v675_v2 = vld [vmem:[%s1191_s2 + $0x8] sm:$0xff]  }
   0x2   :  { %640 = vmatprep.subr.bf16.mxu0 %v673_v0  ;;  %664 = vmatprep.subr.bf16.mxu1 %v673_v0  ;;  %v677_v3 = vld [vmem:[%s1192_s0] sm:$0xff]   ;;  %v798_v6 = vld [vmem:[%s1193_s1 + $0x8] sm:$0xff]  ;;  %v808_v8 = vld [vmem:[%s1193_s1 + $0x18] sm:$0xff] }
   0x3   :  { %641 = vmatpush3.bf16.msra.mxu0 %v673_v0  ;;  %668 = vmatpush3.bf16.msra.mxu1 %v673_v0  ;;  %v678_v4 = vld [vmem:[%s1192_s0 + $0x20] sm:$0xff]   ;;  %v679_v9 = vld [vmem:[%s1192_s0 + $0x8] sm:$0xff]   ;;  %v252_v10 = vmul.f32 %v798_v6, %v798_v6  ;;  %v254_v12 = vmul.f32 %v808_v8, %v808_v8  ;;  %v822_v13 = vld [vmem:[%s1193_s1 + $0x10] sm:$0xff] }
   0x4   :  { %642 = vmatprep.subr.bf16.mxu0 %v674_v1  ;;  %665 = vmatprep.subr.bf16.mxu1 %v674_v1  ;;  %v676_v5 = vld [vmem:[%s1191_s2] sm:$0xff]   ;;  %v680_v14 = vld [vmem:[%s1192_s0 + $0x28] sm:$0xff]   ;;  %v253_v15 = vmul.f32 %v822_v13, %v822_v13  ;;  %v681_v18 = vld [vmem:[%s1192_s0 + $0x10] sm:$0xff]  }
   0x5   :  { %648 = vmatprep.mubr.msk.bf16.mxu0 %vm113_vm0, %v677_v3  ;;  %656 = vmatprep.mubr.msk.bf16.mxu1 %vm113_vm0, %v678_v4  ;;  %v803_v7 = vld [vmem:[%s1193_s1] sm:$0xff]  ;;  %v832_v16 = vld [vmem:[%s1193_s1 + $0x28] sm:$0xff]  ;;  %v683_v19 = vld [vmem:[%s1192_s0 + $0x30] sm:$0xff]   ;;  %v270_v20 = vsel %vm113_vm0, %v252_v10, 0.0  ;;  %v276_v22 = vsel %vm113_vm0, %v254_v12, 0.0 }
   0x6   :  { %v251_v11 = vmul.f32 %v803_v7, %v803_v7  ;;  %v837_v17 = vld [vmem:[%s1193_s1 + $0x20] sm:$0xff]  ;;  %271 = vadd.xlane.f32.xlu1 %v270_v20  ;;  %v273_v23 = vsel %vm113_vm0, %v253_v15, 0.0  ;;  %v256_v24 = vmul.f32 %v832_v16, %v832_v16  ;;  %v858_v26 = vld [vmem:[%s1193_s1 + $0x38] sm:$0xff]  ;;  %v863_v27 = vld [vmem:[%s1193_s1 + $0x30] sm:$0xff] }
   0x7   :  { %643 = vmatpush3.bf16.msra.mxu0 %v674_v1  ;;  %669 = vmatpush3.bf16.msra.mxu1 %v674_v1  ;;  %v255_v25 = vmul.f32 %v837_v17, %v837_v17  ;;  %v682_v28 = vld [vmem:[%s1192_s0 + $0x18] sm:$0xff]   ;;  %v258_v31 = vmul.f32 %v858_v26, %v858_v26  ;;  %v257_v32 = vmul.f32 %v863_v27, %v863_v27  ;;  %v882_v34 = vld [vmem:[%s1193_s1 + $0x48] sm:$0xff]  ;;  %v887_v35 = vld [vmem:[%s1193_s1 + $0x40] sm:$0xff] }
   0x8   :  { %644 = vmatprep.subr.bf16.mxu0 %v675_v2  ;;  %666 = vmatprep.subr.bf16.mxu1 %v675_v2  ;;  %v267_v21 = vsel %vm113_vm0, %v251_v11, 0.0  ;;  %v282_v29 = vsel %vm113_vm0, %v256_v24, 0.0  ;;  %v684_v33 = vld [vmem:[%s1192_s0 + $0x38] sm:$0xff]   ;;  %v260_v38 = vmul.f32 %v882_v34, %v882_v34  ;;  %v259_v39 = vmul.f32 %v887_v35, %v887_v35  ;;  %v905_v41 = vld [vmem:[%s1193_s1 + $0x50] sm:$0xff]  ;;  %v918_v48 = vld [vmem:[%s1193_s1 + $0x68] sm:$0xff] }
   0x9   :  { %268 = vadd.xlane.f32.xlu0 %v267_v21  ;;  %v279_v30 = vsel %vm113_vm0, %v255_v25, 0.0  ;;  %v288_v36 = vsel %vm113_vm0, %v258_v31, 0.0  ;;  %v285_v37 = vsel %vm113_vm0, %v257_v32, 0.0  ;;  %v900_v40 = vld [vmem:[%s1193_s1 + $0x58] sm:$0xff]  ;;  %v261_v45 = vmul.f32 %v905_v41, %v905_v41  ;;  %v923_v49 = vld [vmem:[%s1193_s1 + $0x60] sm:$0xff] }
   0xa   :  { %277 = vadd.xlane.f32.xlu1 %v276_v22  ;;  %v294_v42 = vsel %vm113_vm0, %v260_v38, 0.0  ;;  %v291_v43 = vsel %vm113_vm0, %v259_v39, 0.0  ;;  %v262_v44 = vmul.f32 %v900_v40, %v900_v40  ;;  %v264_v50 = vmul.f32 %v918_v48, %v918_v48  ;;  %v934_v54 = vld [vmem:[%s1194_s3] ss:$0 sm:$0xff] }
   0xb   :  { %645 = vmatpush3.bf16.msra.mxu0 %v675_v2  ;;  %670 = vmatpush3.bf16.msra.mxu1 %v675_v2  ;;  %v297_v47 = vsel %vm113_vm0, %v261_v45, 0.0  ;;  %v263_v51 = vmul.f32 %v923_v49, %v923_v49 }
   0xc   :  { %646 = vmatprep.subr.bf16.mxu0 %v676_v5  ;;  %667 = vmatprep.subr.bf16.mxu1 %v676_v5  ;;  %v300_v46 = vsel %vm113_vm0, %v262_v44, 0.0  ;;  %v306_v52 = vsel %vm113_vm0, %v264_v50, 0.0 }
   0xd   :  { %274 = vadd.xlane.f32.xlu0 %v273_v23  ;;  %v303_v53 = vsel %vm113_vm0, %v263_v51, 0.0 }
   0xe   :  { %283 = vadd.xlane.f32.xlu1 %v282_v29 }
   0xf   :  { %647 = vmatpush3.bf16.msra.mxu0 %v676_v5  ;;  %671 = vmatpush3.bf16.msra.mxu1 %v676_v5 }
  0x11   :  { %280 = vadd.xlane.f32.xlu0 %v279_v30 }
  0x12   :  { %649 = vmatmul.mubr.msk.bf16.vlgmr.msra.gmra.mxu0 %vm113_vm0, %v679_v9  ;;  %657 = vmatmul.mubr.msk.bf16.vlgmr.msra.gmra.mxu1 %vm113_vm0, %v680_v14 }
  0x13   :  { %652 = vmatprep.mubr.msk.bf16.mxu0 %vm113_vm0, %v681_v18  ;;  %660 = vmatprep.mubr.msk.bf16.mxu1 %vm113_vm0, %v683_v19 }
  0x14   :  { %289 = vadd.xlane.f32.xlu1 %v288_v36 }
  0x15   :  { %286 = vadd.xlane.f32.xlu0 %v285_v37 }
  0x18   :  { %295 = vadd.xlane.f32.xlu1 %v294_v42 }
  0x19   :  { %292 = vadd.xlane.f32.xlu0 %v291_v43 }
  0x1a   :  { %653 = vmatmul.mubr.msk.bf16.gmra.mxu0 %vm113_vm0, %v682_v28  ;;  %661 = vmatmul.mubr.msk.bf16.gmra.mxu1 %vm113_vm0, %v684_v33 }
  0x1c   :  { %301 = vadd.xlane.f32.xlu1 %v300_v46 }
  0x1d   :  { %298 = vadd.xlane.f32.xlu0 %v297_v47 }
  0x20   :  { %307 = vadd.xlane.f32.xlu1 %v306_v52 }
  0x21   :  { %304 = vadd.xlane.f32.xlu0 %v303_v53 }
  0xd2   :  { %v650_v55 = vpop.f32.mrf.mxu0  ;;  %v658_v56 = vpop.f32.mrf.mxu1 }
  0xd3   :  { %v937_v57 = vadd.f32 %v650_v55, %v934_v54  ;;  %v940_v58 = vadd.f32 %v658_v56, %v934_v54 }
  0xd4   :  { %v172_v59 = vpop.f32.mrf.mxu0  ;;  %v204_v60 = vpop.f32.mrf.mxu1 }
  0xd5   :  { %v943_v61 = vadd.f32 %v934_v54, %v172_v59  ;;  %v357_v62 = vmul.f32 %v940_v58, %v940_v58  ;;  %v349_v63 = vmul.f32 %v937_v57, %v937_v57  ;;  %v950_v0 = vadd.f32 %v934_v54, %v204_v60 }
  0xd6   :  { %v651_v1 = vpop.f32.mrf.mxu0  ;;  %v659_v2 = vpop.f32.mrf.mxu1 }
  0xd7   :  { %v953_v3 = vadd.f32 %v651_v1, %v934_v54  ;;  %v956_v4 = vadd.f32 %v659_v2, %v934_v54  ;;  %v393_v5 = vsel %vm113_vm0, %v357_v62, 0.0  ;;  %v369_v9 = vsel %vm113_vm0, %v349_v63, 0.0 }
  0xd8   :  { %394 = vadd.xlane.f32.xlu0 %v393_v5  ;;  %v207_v10 = vpop.f32.mrf.mxu1  ;;  %370 = vadd.xlane.f32.xlu1 %v369_v9  ;;  %v175_v11 = vpop.f32.mrf.mxu0  ;;  %v347_v12 = vmul.f32 %v943_v61, %v943_v61  ;;  %v355_v20 = vmul.f32 %v950_v0, %v950_v0  ;;  %v1027_v9 = vld [vmem:[%s1193_s1 + $0x78] sm:$0xff] }
  0xd9   :  { %v350_v14 = vmul.f32 %v953_v3, %v953_v3  ;;  %v965_v15 = vadd.f32 %v934_v54, %v207_v10  ;;  %v970_v21 = vadd.f32 %v934_v54, %v175_v11  ;;  %v358_v24 = vmul.f32 %v956_v4, %v956_v4 }
  0xda   :  { %v654_v18 = vpop.f32.mrf.mxu0  ;;  %v662_v19 = vpop.f32.mrf.mxu1  ;;  %v363_v23 = vsel %vm113_vm0, %v347_v12, 0.0  ;;  %v387_v31 = vsel %vm113_vm0, %v355_v20, 0.0 }
  0xdb   :  { %v372_v22 = vsel %vm113_vm0, %v350_v14, 0.0  ;;  %v977_v28 = vadd.f32 %v654_v18, %v934_v54  ;;  %v396_v33 = vsel %vm113_vm0, %v358_v24, 0.0  ;;  %v356_v36 = vmul.f32 %v965_v15, %v965_v15 }
  0xdc   :  { %373 = vadd.xlane.f32.xlu1 %v372_v22  ;;  %v188_v25 = vpop.f32.mrf.mxu0  ;;  %364 = vadd.xlane.f32.xlu0 %v363_v23  ;;  %v220_v30 = vpop.f32.mrf.mxu1  ;;  %v348_v37 = vmul.f32 %v970_v21, %v970_v21  ;;  %v989_v38 = vadd.f32 %v662_v19, %v934_v54  ;;  %v266_v18 = vmul.f32 %v1027_v9, %v1027_v9 }
  0xdd   :  { %v353_v42 = vmul.f32 %v977_v28, %v977_v28  ;;  %v390_v44 = vsel %vm113_vm0, %v356_v36, 0.0  ;;  %v1001_v50 = vadd.f32 %v934_v54, %v188_v25  ;;  %v1013_v60 = vadd.f32 %v934_v54, %v220_v30  ;;  %v272_v25 = vpop.xlane.xlu1 %271 }
  0xde   :  { %v655_v29 = vpop.f32.mrf.mxu0  ;;  %v663_v39 = vpop.f32.mrf.mxu1  ;;  %v366_v45 = vsel %vm113_vm0, %v348_v37, 0.0  ;;  %v361_v51 = vmul.f32 %v989_v38, %v989_v38  ;;  %v312_v23 = vsel %vm113_vm0, %v266_v18, 0.0 }
  0xdf   :  { %v981_v32 = vadd.f32 %v655_v29, %v934_v54  ;;  %v994_v43 = vadd.f32 %v663_v39, %v934_v54  ;;  %v381_v55 = vsel %vm113_vm0, %v353_v42, 0.0  ;;  %v351_v5 = vmul.f32 %v1001_v50, %v1001_v50  ;;  %v269_v29 = vpop.xlane.xlu0 %268 }
  0xe0   :  { %397 = vadd.xlane.f32.xlu1 %v396_v33  ;;  %388 = vadd.xlane.f32.xlu0 %v387_v31  ;;  %v191_v47 = vpop.f32.mrf.mxu0  ;;  %v223_v59 = vpop.f32.mrf.mxu1  ;;  %v405_v62 = vsel %vm113_vm0, %v361_v51, 0.0  ;;  %v359_v14 = vmul.f32 %v1013_v60, %v1013_v60 }
  0xe1   :  { %v354_v46 = vmul.f32 %v981_v32, %v981_v32  ;;  %v1006_v52 = vadd.f32 %v934_v54, %v191_v47  ;;  %v362_v56 = vmul.f32 %v994_v43, %v994_v43  ;;  %v1017_v63 = vadd.f32 %v934_v54, %v223_v59  ;;  %v1032_v54 = vld [vmem:[%s1193_s1 + $0x70] sm:$0xff]  ;;  %v278_v30 = vpop.xlane.xlu1 %277  ;;  %s749_s1 = smov 64  }
  0xe2   :  { %v375_v11 = vsel %vm113_vm0, %v351_v5, 0.0  ;;  %v265_v19 = vmul.f32 %v1032_v54, %v1032_v54  ;;  %v399_v22 = vsel %vm113_vm0, %v359_v14, 0.0  ;;  %v318_v5 = vmax.f32 %v278_v30, 1e-24 }
  0xe3   :  { %v384_v53 = vsel %vm113_vm0, %v354_v46, 0.0  ;;  %v408_v1 = vsel %vm113_vm0, %v362_v56, 0.0  ;;  %v352_v2 = vmul.f32 %v1006_v52, %v1006_v52  ;;  %v360_v12 = vmul.f32 %v1017_v63, %v1017_v63  ;;  %v275_v31 = vpop.xlane.xlu0 %274 }
  0xe4   :  { %391 = vadd.xlane.f32.xlu1 %v390_v44  ;;  %367 = vadd.xlane.f32.xlu0 %v366_v45  ;;  %v309_v24 = vsel %vm113_vm0, %v265_v19, 0.0 }
  0xe5   :  { %v378_v10 = vsel %vm113_vm0, %v352_v2, 0.0  ;;  %v402_v20 = vsel %vm113_vm0, %v360_v12, 0.0  ;;  %v1048_v33 = vpop.xlane.xlu1 %283 }
  0xe7   :  { %v1050_v36 = vpop.xlane.xlu0 %280 }
  0xe8   :  { %385 = vadd.xlane.f32.xlu1 %v384_v53  ;;  %382 = vadd.xlane.f32.xlu0 %v381_v55  ;;  %v317_v53 = vmax.f32 %v275_v31, 1e-24 }
  0xe9   :  { %v1052_v37 = vpop.xlane.xlu1 %289 }
  0xea   :  { %685 = vrsqrt.f32 %v317_v53 }
  0xeb   :  { %v287_v39 = vpop.xlane.xlu0 %286 }
  0xec   :  { %409 = vadd.xlane.f32.xlu1 %v408_v1  ;;  %406 = vadd.xlane.f32.xlu0 %v405_v62  ;;  %v315_v62 = vmax.f32 %v269_v29, 1e-24  ;;  %v316_v29 = vmax.f32 %v272_v25, 1e-24 }
  0xed   :  { %v296_v42 = vpop.xlane.xlu1 %295 }
  0xef   :  { %v293_v44 = vpop.xlane.xlu0 %292 }
  0xf0   :  { %379 = vadd.xlane.f32.xlu1 %v378_v10  ;;  %376 = vadd.xlane.f32.xlu0 %v375_v11  ;;  %v323_v12 = vmax.f32 %v293_v44, 1e-24 }
  0xf1   :  { %v302_v45 = vpop.xlane.xlu1 %301 }
  0xf2   :  { %v326_v19 = vmax.f32 %v302_v45, 1e-24 }
  0xf3   :  { %v299_v46 = vpop.xlane.xlu0 %298 }
  0xf4   :  { %403 = vadd.xlane.f32.xlu1 %v402_v20  ;;  %400 = vadd.xlane.f32.xlu0 %v399_v22  ;;  %v325_v55 = vmax.f32 %v299_v46, 1e-24  ;;  %v321_v46 = vmax.f32 %v287_v39, 1e-24 }
  0xf5   :  { %v1054_v47 = vpop.xlane.xlu1 %307 }
  0xf6   :  { %687 = vrsqrt.f32 %v325_v55 }
  0xf7   :  { %v1056_v51 = vpop.xlane.xlu0 %304  ;;  %v686_v55 = vpop.eup %685 }
  0xf8   :  { %313 = vadd.xlane.f32.xlu1 %v312_v23  ;;  %310 = vadd.xlane.f32.xlu0 %v309_v24 }
 0x103   :  { %v688_v45 = vpop.eup %687 }
 0x161   :  { %v395_v56 = vpop.xlane.xlu0 %394  ;;  %v371_v59 = vpop.xlane.xlu1 %370 }
 0x162   :  { %v421_v1 = vmax.f32 %v395_v56, 1e-24  ;;  %v413_v2 = vmax.f32 %v371_v59, 1e-24  ;;  %v324_v56 = vmax.f32 %v296_v42, 1e-24 }
 0x164   :  { %689 = vrsqrt.f32 %v421_v1 }
 0x165   :  { %691 = vrsqrt.f32 %v413_v2  ;;  %v374_v10 = vpop.xlane.xlu1 %373  ;;  %v365_v11 = vpop.xlane.xlu0 %364 }
 0x166   :  { %693 = vrsqrt.f32 %v315_v62  ;;  %v414_v14 = vmax.f32 %v374_v10, 1e-24  ;;  %v411_v18 = vmax.f32 %v365_v11, 1e-24  ;;  %v320_v62 = vmax.f32 %v1048_v33, 1e-24 }
 0x167   :  { %695 = vrsqrt.f32 %v318_v5  ;;  %v453_v33 = vmul.f32 %v688_v45, %v905_v41 }
 0x168   :  { %697 = vrsqrt.f32 %v414_v14 }
 0x169   :  { %699 = vrsqrt.f32 %v411_v18  ;;  %v398_v20 = vpop.xlane.xlu1 %397  ;;  %v389_v22 = vpop.xlane.xlu0 %388  ;;  %v322_v18 = vmax.f32 %v1052_v37, 1e-24  ;;  %v327_v37 = vmax.f32 %v1056_v51, 1e-24 }
 0x16a   :  { %701 = vrsqrt.f32 %v323_v12  ;;  %v422_v23 = vmax.f32 %v398_v20, 1e-24  ;;  %v419_v24 = vmax.f32 %v389_v22, 1e-24  ;;  %v319_v12 = vmax.f32 %v1050_v36, 1e-24 }
 0x16b   :  { %703 = vrsqrt.f32 %v326_v19  ;;  %v328_v22 = vmax.f32 %v1054_v47, 1e-24 }
 0x16c   :  { %705 = vrsqrt.f32 %v422_v23 }
 0x16d   :  { %707 = vrsqrt.f32 %v419_v24  ;;  %v392_v30 = vpop.xlane.xlu1 %391  ;;  %v368_v31 = vpop.xlane.xlu0 %367 }
 0x16e   :  { %v420_v53 = vmax.f32 %v392_v30, 1e-24  ;;  %v412_v44 = vmax.f32 %v368_v31, 1e-24  ;;  %709 = vrsqrt.f32 %v316_v29  ;;  %v445_v29 = vmul.f32 %v686_v55, %v822_v13 }
 0x170   :  { %711 = vrsqrt.f32 %v420_v53 }
 0x171   :  { %v690_v59 = vpop.eup %689  ;;  %713 = vrsqrt.f32 %v412_v44  ;;  %v386_v1 = vpop.xlane.xlu1 %385 }
 0x172   :  { %v383_v2 = vpop.xlane.xlu0 %382  ;;  %v692_v25 = vpop.eup %691  ;;  %715 = vrsqrt.f32 %v321_v46  ;;  %v418_v5 = vmax.f32 %v386_v1, 1e-24  ;;  %v469_v11 = vmul.f32 %v690_v59, %v940_v58 }
 0x173   :  { %v417_v10 = vmax.f32 %v383_v2, 1e-24  ;;  %v694_v39 = vpop.eup %693  ;;  %717 = vrsqrt.f32 %v324_v56  ;;  %v461_v42 = vmul.f32 %v692_v25, %v937_v57 }
 0x174   :  { %v696_v14 = vpop.eup %695  ;;  %719 = vrsqrt.f32 %v418_v5  ;;  %v485_v19 = vmul.f32 0.5, %v469_v11  ;;  %v443_v51 = vmul.f32 %v694_v39, %v803_v7 }
 0x175   :  { %v698_v20 = vpop.eup %697  ;;  %721 = vrsqrt.f32 %v417_v10  ;;  %v410_v23 = vpop.xlane.xlu1 %409  ;;  %v477_v30 = vmul.f32 0.5, %v461_v42  ;;  %v446_v13 = vmul.f32 %v696_v14, %v808_v8 }
 0x176   :  { %v407_v24 = vpop.xlane.xlu0 %406  ;;  %v700_v36 = vpop.eup %699  ;;  %723 = vrsqrt.f32 %v320_v62  ;;  %v501_v31 = vadd.f32 %v485_v19, %v453_v33  ;;  %v462_v46 = vmul.f32 %v698_v20, %v953_v3  ;;  %v426_v45 = vmax.f32 %v410_v23, 1e-24 }
 0x177   :  { %v702_v53 = vpop.eup %701  ;;  %725 = vrsqrt.f32 %v319_v12  ;;  %v493_v41 = vadd.f32 %v477_v30, %v445_v29  ;;  %v459_v44 = vmul.f32 %v700_v36, %v943_v61  ;;  %v425_v12 = vmax.f32 %v407_v24, 1e-24 }
 0x178   :  { %v704_v56 = vpop.eup %703  ;;  %727 = vrsqrt.f32 %v322_v18  ;;  %543 = vrot.lane.b32.xlu0 %v501_v31, %s749_s1  ;;  %v478_v47 = vmul.f32 0.5, %v462_v46  ;;  %v451_v20 = vmul.f32 %v702_v53, %v887_v35 }
 0x179   :  { %v706_v55 = vpop.eup %705  ;;  %729 = vrsqrt.f32 %v328_v22  ;;  %527 = vrot.lane.b32.xlu1 %v493_v41, %s749_s1  ;;  %v380_v59 = vpop.xlane.xlu1 %379  ;;  %v475_v1 = vmul.f32 0.5, %v459_v44  ;;  %v454_v18 = vmul.f32 %v704_v56, %v900_v40 }
 0x17a   :  { %v377_v62 = vpop.xlane.xlu0 %376  ;;  %v708_v2 = vpop.eup %707  ;;  %v416_v25 = vmax.f32 %v380_v59, 1e-24  ;;  %v494_v10 = vadd.f32 %v478_v47, %v446_v13  ;;  %v470_v11 = vmul.f32 %v706_v55, %v956_v4  ;;  %731 = vrsqrt.f32 %v327_v37 }
 0x17b   :  { %v415_v5 = vmax.f32 %v377_v62, 1e-24  ;;  %v491_v8 = vadd.f32 %v475_v1, %v443_v51  ;;  %v467_v42 = vmul.f32 %v708_v2, %v950_v0  ;;  %v710_v14 = vpop.eup %709 }
 0x17c   :  { %733 = vrsqrt.f32 %v416_v25  ;;  %v486_v33 = vmul.f32 0.5, %v470_v11  ;;  %v444_v44 = vmul.f32 %v710_v14, %v798_v6 }
 0x17d   :  { %v712_v19 = vpop.eup %711  ;;  %735 = vrsqrt.f32 %v415_v5  ;;  %529 = vrot.lane.b32.xlu1 %v494_v10, %s749_s1  ;;  %523 = vrot.lane.b32.xlu0 %v491_v8, %s749_s1  ;;  %v404_v7 = vpop.xlane.xlu1 %403  ;;  %v483_v22 = vmul.f32 0.5, %v467_v42 }
 0x17e   :  { %v401_v39 = vpop.xlane.xlu0 %400  ;;  %v714_v23 = vpop.eup %713  ;;  %737 = vrsqrt.f32 %v426_v45  ;;  %v424_v24 = vmax.f32 %v404_v7, 1e-24  ;;  %v502_v30 = vadd.f32 %v486_v33, %v454_v18  ;;  %v468_v46 = vmul.f32 %v712_v19, %v965_v15 }
 0x17f   :  { %v423_v29 = vmax.f32 %v401_v39, 1e-24  ;;  %v716_v36 = vpop.eup %715  ;;  %739 = vrsqrt.f32 %v425_v12  ;;  %v499_v40 = vadd.f32 %v483_v22, %v451_v20  ;;  %v460_v31 = vmul.f32 %v714_v23, %v970_v21 }
 0x180   :  { %v718_v37 = vpop.eup %717  ;;  %741 = vrsqrt.f32 %v424_v24  ;;  %v484_v62 = vmul.f32 0.5, %v468_v46  ;;  %v449_v6 = vmul.f32 %v716_v36, %v863_v27 }
 0x181   :  { %v720_v41 = vpop.eup %719  ;;  %743 = vrsqrt.f32 %v423_v29  ;;  %545 = vrot.lane.b32.xlu1 %v502_v30, %s749_s1  ;;  %539 = vrot.lane.b32.xlu0 %v499_v40, %s749_s1  ;;  %v314_v35 = vpop.xlane.xlu1 %313  ;;  %v476_v56 = vmul.f32 0.5, %v460_v31  ;;  %v452_v5 = vmul.f32 %v718_v37, %v882_v34 }
 0x182   :  { %v311_v53 = vpop.xlane.xlu0 %310  ;;  %v722_v13 = vpop.eup %721  ;;  %v330_v47 = vmax.f32 %v314_v35, 1e-24  ;;  %v466_v1 = vmul.f32 %v720_v41, %v981_v32 }
 0x183   :  { %v329_v55 = vmax.f32 %v311_v53, 1e-24  ;;  %v724_v45 = vpop.eup %723  ;;  %v492_v59 = vadd.f32 %v476_v56, %v444_v44  ;;  %v465_v51 = vmul.f32 %v722_v13, %v977_v28  ;;  %v500_v12 = vadd.f32 %v484_v62, %v452_v5 }
 0x184   :  { %v726_v2 = vpop.eup %725  ;;  %745 = vrsqrt.f32 %v330_v47  ;;  %v482_v42 = vmul.f32 0.5, %v466_v1  ;;  %v448_v22 = vmul.f32 %v724_v45, %v832_v16 }
 0x185   :  { %v728_v25 = vpop.eup %727  ;;  %747 = vrsqrt.f32 %v329_v55  ;;  %525 = vrot.lane.b32.xlu1 %v492_v59, %s749_s1  ;;  %v481_v10 = vmul.f32 0.5, %v465_v51  ;;  %v447_v29 = vmul.f32 %v726_v2, %v837_v17 }
 0x186   :  { %v730_v11 = vpop.eup %729  ;;  %v450_v33 = vmul.f32 %v728_v25, %v858_v26 }
 0x187   :  { %v497_v8 = vadd.f32 %v481_v10, %v449_v6  ;;  %v732_v14 = vpop.eup %731  ;;  %v456_v37 = vmul.f32 %v730_v11, %v918_v48 }
 0x188   :  { %v498_v34 = vadd.f32 %v482_v42, %v450_v33  ;;  %v455_v16 = vmul.f32 %v732_v14, %v923_v49 }
 0x189   :  { %v734_v18 = vpop.eup %733  ;;  %541 = vrot.lane.b32.xlu1 %v500_v12, %s749_s1  ;;  %535 = vrot.lane.b32.xlu0 %v497_v8, %s749_s1 }
 0x18a   :  { %v736_v19 = vpop.eup %735  ;;  %v464_v7 = vmul.f32 %v734_v18, %v1006_v52 }
 0x18b   :  { %v738_v39 = vpop.eup %737  ;;  %v463_v27 = vmul.f32 %v736_v19, %v1001_v50 }
 0x18c   :  { %v740_v20 = vpop.eup %739  ;;  %v480_v23 = vmul.f32 0.5, %v464_v7  ;;  %v474_v17 = vmul.f32 %v738_v39, %v994_v43 }
 0x18d   :  { %v742_v24 = vpop.eup %741  ;;  %537 = vrot.lane.b32.xlu1 %v498_v34, %s749_s1  ;;  %v479_v30 = vmul.f32 0.5, %v463_v27  ;;  %v473_v44 = vmul.f32 %v740_v20, %v989_v38 }
 0x18e   :  { %v744_v36 = vpop.eup %743  ;;  %v496_v40 = vadd.f32 %v480_v23, %v448_v22  ;;  %v472_v26 = vmul.f32 %v742_v24, %v1017_v63  ;;  %v490_v45 = vmul.f32 0.5, %v474_v17 }
 0x18f   :  { %v495_v31 = vadd.f32 %v479_v30, %v447_v29  ;;  %v471_v46 = vmul.f32 %v744_v36, %v1013_v60  ;;  %v489_v59 = vmul.f32 0.5, %v473_v44 }
 0x190   :  { %v488_v41 = vmul.f32 0.5, %v472_v26 }
 0x191   :  { %v746_v35 = vpop.eup %745  ;;  %533 = vrot.lane.b32.xlu1 %v496_v40, %s749_s1  ;;  %531 = vrot.lane.b32.xlu0 %v495_v31, %s749_s1  ;;  %v487_v53 = vmul.f32 0.5, %v471_v46 }
 0x192   :  { %v748_v56 = vpop.eup %747  ;;  %v504_v13 = vadd.f32 %v488_v41, %v456_v37  ;;  %v458_v55 = vmul.f32 %v746_v35, %v1027_v9 }
 0x193   :  { %v503_v47 = vadd.f32 %v487_v53, %v455_v16  ;;  %v457_v48 = vmul.f32 %v748_v56, %v1032_v54 }
 0x194   :  { %v506_v62 = vadd.f32 %v490_v45, %v458_v55 }
 0x195   :  { %549 = vrot.lane.b32.xlu1 %v504_v13, %s749_s1  ;;  %547 = vrot.lane.b32.xlu0 %v503_v47, %s749_s1  ;;  %v505_v49 = vadd.f32 %v489_v59, %v457_v48 }
 0x199   :  { %553 = vrot.lane.b32.xlu1 %v506_v62, %s749_s1  ;;  %551 = vrot.lane.b32.xlu0 %v505_v49, %s749_s1 }
 0x1ea   :  { %v544_v51 = vpop.permute.xlu0 %543 }
 0x1eb   :  { %v528_v1 = vpop.permute.xlu1 %527  ;;  %v581_v2 = vsel %vm113_vm0, %v940_v58, %v544_v51 }
 0x1ec   :  { %v573_v9 = vsel %vm113_vm0, %v937_v57, %v528_v1  ;;  %597 = vst [vmem:[%s1195_s4 + $0x50] sm:$0xff] %v581_v2 }
 0x1ed   :  { %589 = vst [vmem:[%s1195_s4 + $0x10] sm:$0xff] %v573_v9 }
 0x1ef   :  { %v530_v54 = vpop.permute.xlu1 %529  ;;  %v524_v25 = vpop.permute.xlu0 %523 }
 0x1f0   :  { %v574_v5 = vsel %vm113_vm0, %v953_v3, %v530_v54  ;;  %v571_v6 = vsel %vm113_vm0, %v943_v61, %v524_v25 }
 0x1f1   :  { %590 = vst [vmem:[%s1195_s4 + $0x18] sm:$0xff] %v574_v5  ;;  %587 = vst [vmem:[%s1195_s4] sm:$0xff] %v571_v6 }
 0x1f3   :  { %v546_v57 = vpop.permute.xlu1 %545  ;;  %v540_v58 = vpop.permute.xlu0 %539 }
 0x1f4   :  { %v582_v10 = vsel %vm113_vm0, %v956_v4, %v546_v57  ;;  %v579_v11 = vsel %vm113_vm0, %v950_v0, %v540_v58 }
 0x1f5   :  { %598 = vst [vmem:[%s1195_s4 + $0x58] sm:$0xff] %v582_v10  ;;  %595 = vst [vmem:[%s1195_s4 + $0x40] sm:$0xff] %v579_v11 }
 0x1f7   :  { %v526_v61 = vpop.permute.xlu1 %525 }
 0x1f8   :  { %v572_v3 = vsel %vm113_vm0, %v970_v21, %v526_v61 }
 0x1f9   :  { %588 = vst [vmem:[%s1195_s4 + $0x8] sm:$0xff] %v572_v3 }
 0x1fb   :  { %v542_v4 = vpop.permute.xlu1 %541  ;;  %v536_v12 = vpop.permute.xlu0 %535 }
 0x1fc   :  { %v580_v0 = vsel %vm113_vm0, %v965_v15, %v542_v4  ;;  %v577_v8 = vsel %vm113_vm0, %v977_v28, %v536_v12 }
 0x1fd   :  { %596 = vst [vmem:[%s1195_s4 + $0x48] sm:$0xff] %v580_v0  ;;  %593 = vst [vmem:[%s1195_s4 + $0x30] sm:$0xff] %v577_v8 }
 0x1ff   :  { %v538_v21 = vpop.permute.xlu1 %537 }
 0x200   :  { %v578_v42 = vsel %vm113_vm0, %v981_v32, %v538_v21 }
 0x201   :  { %594 = vst [vmem:[%s1195_s4 + $0x38] sm:$0xff] %v578_v42 }
 0x203   :  { %v534_v15 = vpop.permute.xlu1 %533  ;;  %v532_v14 = vpop.permute.xlu0 %531 }
 0x204   :  { %v576_v28 = vsel %vm113_vm0, %v1006_v52, %v534_v15  ;;  %v575_v18 = vsel %vm113_vm0, %v1001_v50, %v532_v14 }
 0x205   :  { %592 = vst [vmem:[%s1195_s4 + $0x28] sm:$0xff] %v576_v28  ;;  %591 = vst [vmem:[%s1195_s4 + $0x20] sm:$0xff] %v575_v18 }
 0x207   :  { %v550_v32 = vpop.permute.xlu1 %549  ;;  %v548_v33 = vpop.permute.xlu0 %547 }
 0x208   :  { %v584_v19 = vsel %vm113_vm0, %v1017_v63, %v550_v32  ;;  %v583_v7 = vsel %vm113_vm0, %v1013_v60, %v548_v33 }
 0x209   :  { %600 = vst [vmem:[%s1195_s4 + $0x68] sm:$0xff] %v584_v19  ;;  %599 = vst [vmem:[%s1195_s4 + $0x60] sm:$0xff] %v583_v7 }
 0x20b   :  { %v554_v50 = vpop.permute.xlu1 %553  ;;  %v552_v52 = vpop.permute.xlu0 %551 }
 0x20c   :  { %v586_v39 = vsel %vm113_vm0, %v994_v43, %v554_v50  ;;  %v585_v34 = vsel %vm113_vm0, %v989_v38, %v552_v52 }
 0x20d   :  { %602 = vst [vmem:[%s1195_s4 + $0x78] sm:$0xff] %v586_v39  ;;  %601 = vst [vmem:[%s1195_s4 + $0x70] sm:$0xff] %v585_v34 }

</bundles_post_ra>
